<compile_context>
chip_gen: v5e
topology: v5e:2x2
jax: 0.10.0
libtpu: 0.0.40
codegen_flags: <defaults>
</compile_context>

<pallas_src>
import functools

import jax
import jax.numpy as jnp
from jax import lax
from jax.experimental import pallas as pl
from jax.experimental.pallas import tpu as pltpu

IN_CH = 8        # in_ch == out_ch (module default structure, shrunk for test)
OUT_CH = 8
CONV_K = 3
LC_K = 7
K2 = LC_K * LC_K


def _make_kernel(bt, c, h, w):
    """Builds the fused kernel for a (bt, c, h*w) block."""
    hw = h * w
    # One lane pad wide enough for both the 3x3 convs (|off| <= w+1) and the
    # 7x7 local conv (|off| <= 3*w+3), rounded to a 128-lane boundary so the
    # zero concat stays lane-group aligned.
    lpad = ((3 * w + 3 + 127) // 128) * 128
    half = LC_K // 2

    def kernel(x_ref, kf_ref,
               wc1, bc1, wc2, bc2,
               wm1, bm1, wm2, bm2,
               wl1, bl1, wl2, bl2,
               out_ref):
        f32 = jnp.float32

        # Per-lane column index of each pixel (exact float math, no int mod).
        lane = lax.broadcasted_iota(jnp.int32, (1, 1, hw), 2).astype(f32)
        col = lane - jnp.floor(lane / float(w)) * float(w)

        def col_mask(dj):
            cj = col + float(dj)
            return jnp.logical_and(cj >= 0.0, cj < float(w))   # (1, 1, hw)

        masks = {dj: col_mask(dj) for dj in range(-half, half + 1)}

        def pad_lanes(v):
            z = jnp.zeros(v.shape[:-1] + (lpad,), v.dtype)
            return jnp.concatenate([z, v, z], axis=-1)

        def shift(vp, off):
            # Source value at flat pixel (p + off); rows outside the image come
            # from the zero pad, column wrap is masked by the caller.
            return vp[..., lpad + off: lpad + off + hw]

        def conv3x3(src, w_ref, b_ref, relu):
            # src: (bt, c, hw) value; w_ref: (c, 9*c); b_ref: (c, 1).
            sp = pad_lanes(src)
            taps = []
            for di in (-1, 0, 1):
                for dj in (-1, 0, 1):
                    s = shift(sp, di * w + dj)
                    if dj != 0:
                        s = jnp.where(masks[dj], s, 0.0)
                    taps.append(s)
            patches = jnp.concatenate(taps, axis=1)            # (bt, 9c, hw)
            wm = w_ref[...]
            bb = b_ref[...]
            outs = []
            for b in range(bt):
                outs.append(jnp.dot(wm, patches[b],
                                    preferred_element_type=f32) + bb)
            out = jnp.stack(outs, axis=0)                      # (bt, c, hw)
            if relu:
                out = jnp.maximum(out, 0.0)
            return out

        x = x_ref[...].astype(f32)        # (bt, c, hw)
        kf = kf_ref[...].astype(f32)

        # self.conv branch: conv3x3 -> relu -> conv3x3 -> relu
        hfeat = conv3x3(x, wc1, bc1, relu=True)
        hfeat = conv3x3(hfeat, wc2, bc2, relu=True)

        # self.mult_conv branch: conv3x3 -> relu -> conv3x3
        m = conv3x3(kf, wm1, bm1, relu=True)
        m = conv3x3(m, wm2, bm2, relu=False)
        hfeat = hfeat * m

        # self.loc_filter_conv: 1x1 -> relu -> 1x1, with KernelNormalize folded
        # into the (tiny) second-conv weights: f - mean_k(f) + 1/k^2 is linear.
        w1 = wl1[...]
        b1 = bl1[...]
        w2 = wl2[...]
        b2 = bl2[...]
        w2e = w2 - jnp.mean(w2, axis=0, keepdims=True)
        b2e = b2 - jnp.mean(b2, axis=0, keepdims=True) + 1.0 / float(K2)
        frows = []
        for b in range(bt):
            f1 = jnp.maximum(
                jnp.dot(w1, kf[b], preferred_element_type=f32) + b1, 0.0)
            frows.append(jnp.dot(w2e, f1, preferred_element_type=f32) + b2e)
        f = jnp.stack(frows, axis=0)                           # (bt, K2, hw)

        # LocalConvFeat: per-pixel 7x7 filter shared across the channels.
        hp = pad_lanes(hfeat)
        y = jnp.zeros((bt, c, hw), f32)
        for di in range(-half, half + 1):
            for dj in range(-half, half + 1):
                tap = (di + half) * LC_K + (dj + half)
                hsh = shift(hp, di * w + dj)                   # (bt, c, hw)
                frow = f[:, tap:tap + 1, :]                    # (bt, 1, hw)
                if dj != 0:
                    frow = jnp.where(masks[dj], frow, 0.0)
                y = y + hsh * frow

        out_ref[...] = (x + y).astype(out_ref.dtype)

    return kernel


def _pick_bt(n, max_bt=8):
    # Batch several images per grid step (amortizes per-step pipeline overhead,
    # bigger DMAs) but keep >= 2 grid steps when possible so v7x's two
    # TensorCores can split the "parallel" batch axis.
    if n <= 1:
        return 1
    best = 1
    for bt in range(1, min(n, max_bt) + 1):
        if n % bt == 0 and n // bt >= 2:
            best = bt
    return best


def koala_forward_nchw(x_nchw, k_nchw, params):
    """KOALAModlule.forward for NCHW inputs (PyTorch convention)."""
    n, c, h, w = x_nchw.shape
    hw = h * w
    (wc1, bc1, wc2, bc2, wm1, bm1, wm2, bm2, wl1, bl1, wl2, bl2) = params

    def conv_w(wt):       # HWIO (3,3,ci,co) -> (co, 9*ci) in im2col tap order
        return jnp.transpose(wt, (3, 0, 1, 2)).reshape(wt.shape[-1], -1)

    def colv(b):          # (1, k) bias -> (k, 1) column (broadcasts over lanes)
        return jnp.reshape(b, (-1, 1))

    args = (
        jnp.reshape(x_nchw, (n, c, hw)).astype(jnp.float32),
        jnp.reshape(k_nchw, (n, c, hw)).astype(jnp.float32),
        conv_w(wc1), colv(bc1), conv_w(wc2), colv(bc2),
        conv_w(wm1), colv(bm1), conv_w(wm2), colv(bm2),
        jnp.transpose(wl1), colv(bl1),          # (co, ci), (co, 1)
        jnp.transpose(wl2), colv(bl2),          # (K2, ci), (K2, 1)
    )

    bt = _pick_bt(n)
    kernel = _make_kernel(bt, c, h, w)

    io_spec = pl.BlockSpec((bt, c, hw), lambda i: (i, 0, 0))

    def full_spec(shape):
        return pl.BlockSpec(shape, lambda i, _r=len(shape): (0,) * _r)

    in_specs = [io_spec, io_spec] + [full_spec(a.shape) for a in args[2:]]

    # NOTE: for production-size H/W the per-step working set should be tiled
    # into H row-strips with a halo to respect v7x's smaller (64 MiB) VMEM.
    out = pl.pallas_call(
        kernel,
        out_shape=jax.ShapeDtypeStruct((n, c, hw), jnp.float32),
        grid_spec=pltpu.PrefetchScalarGridSpec(
            num_scalar_prefetch=0,
            grid=(n // bt,),
            in_specs=in_specs,
            out_specs=io_spec,
        ),
        compiler_params=pltpu.CompilerParams(
            dimension_semantics=("parallel",)),
    )(*args)
    return jnp.reshape(out, (n, c, h, w))


def init_params(key):
    ks = jax.random.split(key, 12)

    def w3(k):
        return jax.random.normal(k, (3, 3, IN_CH, OUT_CH), jnp.float32) * 0.1

    def w1(k, cin, cout):
        return jax.random.normal(k, (cin, cout), jnp.float32) * 0.1

    def b(k, ch):
        return jax.random.normal(k, (1, ch), jnp.float32) * 0.1

    return (w3(ks[0]), b(ks[1], OUT_CH),
            w3(ks[2]), b(ks[3], OUT_CH),
            w3(ks[4]), b(ks[5], OUT_CH),
            w3(ks[6]), b(ks[7], OUT_CH),
            w1(ks[8], IN_CH, OUT_CH), b(ks[9], OUT_CH),
            w1(ks[10], IN_CH, K2), b(ks[11], K2))


def reference_forward_nhwc(x, kfeat, params):
    (wc1, bc1, wc2, bc2, wm1, bm1, wm2, bm2, wl1, bl1, wl2, bl2) = params
    dn = ('NHWC', 'HWIO', 'NHWC')
    conv = functools.partial(lax.conv_general_dilated, window_strides=(1, 1),
                             padding='SAME', dimension_numbers=dn)
    h = jax.nn.relu(conv(x, wc1) + bc1)
    h = jax.nn.relu(conv(h, wc2) + bc2)
    m = jax.nn.relu(conv(kfeat, wm1) + bm1)
    m = conv(m, wm2) + bm2
    h = h * m
    f = jax.nn.relu(jnp.einsum('nhwc,co->nhwo', kfeat, wl1) + bl1)
    f = jnp.einsum('nhwc,co->nhwo', f, wl2) + bl2
    f = f - jnp.mean(f, axis=-1, keepdims=True) + 1.0 / (LC_K * LC_K)
    N, H, W, C = h.shape
    hp = jnp.pad(h, ((0, 0), (3, 3), (3, 3), (0, 0)))
    y = jnp.zeros_like(h)
    for di in range(LC_K):
        for dj in range(LC_K):
            idx = di * LC_K + dj
            y = y + hp[:, di:di + H, dj:dj + W, :] * f[:, :, :, idx:idx + 1]
    return x + y


if __name__ == "__main__":
    key = jax.random.PRNGKey(0)
    kx, kk, kp = jax.random.split(key, 3)

    N, C, H, W = 2, IN_CH, 16, 16
    x_nchw = jax.random.normal(kx, (N, C, H, W), jnp.float32)
    k_nchw = jax.random.normal(kk, (N, C, H, W), jnp.float32)
    params = init_params(kp)

    out = koala_forward_nchw(x_nchw, k_nchw, params)
    out = jax.block_until_ready(out)

    # Cross-check against a pure-JAX reference of the same math.
    ref = reference_forward_nhwc(jnp.transpose(x_nchw, (0, 2, 3, 1)),
                                 jnp.transpose(k_nchw, (0, 2, 3, 1)), params)
    ref = jnp.transpose(ref, (0, 3, 1, 2))
    assert out.shape == (N, C, H, W)
    err = float(jnp.max(jnp.abs(out - ref)))
    assert err < 2e-4, err
    print("KERNEL_OK")
</pallas_src>

<mosaic_0001>
module attributes {stable_mosaic.version = 11 : i64} {
  func.func @kernel(%arg0: i32, %arg1: memref<1x8x256xf32, #tpu.memory_space<vmem>>, %arg2: memref<1x8x256xf32, #tpu.memory_space<vmem>>, %arg3: memref<8x72xf32, #tpu.memory_space<vmem>>, %arg4: memref<8x1xf32, #tpu.memory_space<vmem>>, %arg5: memref<8x72xf32, #tpu.memory_space<vmem>>, %arg6: memref<8x1xf32, #tpu.memory_space<vmem>>, %arg7: memref<8x72xf32, #tpu.memory_space<vmem>>, %arg8: memref<8x1xf32, #tpu.memory_space<vmem>>, %arg9: memref<8x72xf32, #tpu.memory_space<vmem>>, %arg10: memref<8x1xf32, #tpu.memory_space<vmem>>, %arg11: memref<8x8xf32, #tpu.memory_space<vmem>>, %arg12: memref<8x1xf32, #tpu.memory_space<vmem>>, %arg13: memref<49x8xf32, #tpu.memory_space<vmem>>, %arg14: memref<49x1xf32, #tpu.memory_space<vmem>>, %arg15: memref<1x8x256xf32, #tpu.memory_space<vmem>>) attributes {dimension_semantics = [#tpu.dimension_semantics<parallel>], iteration_bounds = array<i64: 2>, scalar_prefetch = 0 : i64, scratch_operands = 0 : i64, tpu.core_type = #tpu.core_type<tc>, window_params = [{transform_indices = @transform_0, window_bounds = array<i64: 1, 8, 256>}, {transform_indices = @transform_1, window_bounds = array<i64: 1, 8, 256>}, {pipeline_mode = #tpu.pipeline_mode<synchronous>, transform_indices = @transform_2, window_bounds = array<i64: 8, 72>}, {pipeline_mode = #tpu.pipeline_mode<synchronous>, transform_indices = @transform_3, window_bounds = array<i64: 8, 1>}, {pipeline_mode = #tpu.pipeline_mode<synchronous>, transform_indices = @transform_4, window_bounds = array<i64: 8, 72>}, {pipeline_mode = #tpu.pipeline_mode<synchronous>, transform_indices = @transform_5, window_bounds = array<i64: 8, 1>}, {pipeline_mode = #tpu.pipeline_mode<synchronous>, transform_indices = @transform_6, window_bounds = array<i64: 8, 72>}, {pipeline_mode = #tpu.pipeline_mode<synchronous>, transform_indices = @transform_7, window_bounds = array<i64: 8, 1>}, {pipeline_mode = #tpu.pipeline_mode<synchronous>, transform_indices = @transform_8, window_bounds = array<i64: 8, 72>}, {pipeline_mode = #tpu.pipeline_mode<synchronous>, transform_indices = @transform_9, window_bounds = array<i64: 8, 1>}, {pipeline_mode = #tpu.pipeline_mode<synchronous>, transform_indices = @transform_10, window_bounds = array<i64: 8, 8>}, {pipeline_mode = #tpu.pipeline_mode<synchronous>, transform_indices = @transform_11, window_bounds = array<i64: 8, 1>}, {pipeline_mode = #tpu.pipeline_mode<synchronous>, transform_indices = @transform_12, window_bounds = array<i64: 49, 8>}, {pipeline_mode = #tpu.pipeline_mode<synchronous>, transform_indices = @transform_13, window_bounds = array<i64: 49, 1>}, {transform_indices = @transform_14, window_bounds = array<i64: 1, 8, 256>}]} {
    %0 = tpu.iota {dimensions = array<i32: 2>} : vector<1x1x256xi32>
    %1 = arith.sitofp %0 : vector<1x1x256xi32> to vector<1x1x256xf32>
    %cst = arith.constant 1.600000e+01 : f32
    %2 = vector.broadcast %cst : f32 to vector<1x1x256xf32>
    %3 = arith.divf %1, %2 : vector<1x1x256xf32>
    %4 = math.floor %3 : vector<1x1x256xf32>
    %cst_0 = arith.constant 1.600000e+01 : f32
    %5 = vector.broadcast %cst_0 : f32 to vector<1x1x256xf32>
    %6 = arith.mulf %4, %5 : vector<1x1x256xf32>
    %7 = arith.subf %1, %6 : vector<1x1x256xf32>
    %cst_1 = arith.constant -3.000000e+00 : f32
    %8 = vector.broadcast %cst_1 : f32 to vector<1x1x256xf32>
    %9 = arith.addf %7, %8 : vector<1x1x256xf32>
    %cst_2 = arith.constant 0.000000e+00 : f32
    %10 = vector.broadcast %cst_2 : f32 to vector<1x1x256xf32>
    %11 = arith.cmpf oge, %9, %10 : vector<1x1x256xf32>
    %cst_3 = arith.constant 1.600000e+01 : f32
    %12 = vector.broadcast %cst_3 : f32 to vector<1x1x256xf32>
    %13 = arith.cmpf olt, %9, %12 : vector<1x1x256xf32>
    %14 = arith.andi %11, %13 : vector<1x1x256xi1>
    %cst_4 = arith.constant -2.000000e+00 : f32
    %15 = vector.broadcast %cst_4 : f32 to vector<1x1x256xf32>
    %16 = arith.addf %7, %15 : vector<1x1x256xf32>
    %cst_5 = arith.constant 0.000000e+00 : f32
    %17 = vector.broadcast %cst_5 : f32 to vector<1x1x256xf32>
    %18 = arith.cmpf oge, %16, %17 : vector<1x1x256xf32>
    %cst_6 = arith.constant 1.600000e+01 : f32
    %19 = vector.broadcast %cst_6 : f32 to vector<1x1x256xf32>
    %20 = arith.cmpf olt, %16, %19 : vector<1x1x256xf32>
    %21 = arith.andi %18, %20 : vector<1x1x256xi1>
    %cst_7 = arith.constant -1.000000e+00 : f32
    %22 = vector.broadcast %cst_7 : f32 to vector<1x1x256xf32>
    %23 = arith.addf %7, %22 : vector<1x1x256xf32>
    %cst_8 = arith.constant 0.000000e+00 : f32
    %24 = vector.broadcast %cst_8 : f32 to vector<1x1x256xf32>
    %25 = arith.cmpf oge, %23, %24 : vector<1x1x256xf32>
    %cst_9 = arith.constant 1.600000e+01 : f32
    %26 = vector.broadcast %cst_9 : f32 to vector<1x1x256xf32>
    %27 = arith.cmpf olt, %23, %26 : vector<1x1x256xf32>
    %28 = arith.andi %25, %27 : vector<1x1x256xi1>
    %cst_10 = arith.constant 1.000000e+00 : f32
    %29 = vector.broadcast %cst_10 : f32 to vector<1x1x256xf32>
    %30 = arith.addf %7, %29 : vector<1x1x256xf32>
    %cst_11 = arith.constant 0.000000e+00 : f32
    %31 = vector.broadcast %cst_11 : f32 to vector<1x1x256xf32>
    %32 = arith.cmpf oge, %30, %31 : vector<1x1x256xf32>
    %cst_12 = arith.constant 1.600000e+01 : f32
    %33 = vector.broadcast %cst_12 : f32 to vector<1x1x256xf32>
    %34 = arith.cmpf olt, %30, %33 : vector<1x1x256xf32>
    %35 = arith.andi %32, %34 : vector<1x1x256xi1>
    %cst_13 = arith.constant 2.000000e+00 : f32
    %36 = vector.broadcast %cst_13 : f32 to vector<1x1x256xf32>
    %37 = arith.addf %7, %36 : vector<1x1x256xf32>
    %cst_14 = arith.constant 0.000000e+00 : f32
    %38 = vector.broadcast %cst_14 : f32 to vector<1x1x256xf32>
    %39 = arith.cmpf oge, %37, %38 : vector<1x1x256xf32>
    %cst_15 = arith.constant 1.600000e+01 : f32
    %40 = vector.broadcast %cst_15 : f32 to vector<1x1x256xf32>
    %41 = arith.cmpf olt, %37, %40 : vector<1x1x256xf32>
    %42 = arith.andi %39, %41 : vector<1x1x256xi1>
    %cst_16 = arith.constant 3.000000e+00 : f32
    %43 = vector.broadcast %cst_16 : f32 to vector<1x1x256xf32>
    %44 = arith.addf %7, %43 : vector<1x1x256xf32>
    %cst_17 = arith.constant 0.000000e+00 : f32
    %45 = vector.broadcast %cst_17 : f32 to vector<1x1x256xf32>
    %46 = arith.cmpf oge, %44, %45 : vector<1x1x256xf32>
    %cst_18 = arith.constant 1.600000e+01 : f32
    %47 = vector.broadcast %cst_18 : f32 to vector<1x1x256xf32>
    %48 = arith.cmpf olt, %44, %47 : vector<1x1x256xf32>
    %49 = arith.andi %46, %48 : vector<1x1x256xi1>
    %c0 = arith.constant 0 : index
    %c0_19 = arith.constant 0 : index
    %c0_20 = arith.constant 0 : index
    %50 = vector.load %arg1[%c0, %c0_19, %c0_20] : memref<1x8x256xf32, #tpu.memory_space<vmem>>, vector<1x8x256xf32>
    %c0_21 = arith.constant 0 : index
    %c0_22 = arith.constant 0 : index
    %c0_23 = arith.constant 0 : index
    %51 = vector.load %arg2[%c0_21, %c0_22, %c0_23] : memref<1x8x256xf32, #tpu.memory_space<vmem>>, vector<1x8x256xf32>
    %cst_24 = arith.constant 0.000000e+00 : f32
    %52 = vector.broadcast %cst_24 : f32 to vector<1x8x128xf32>
    %53 = tpu.concatenate %52, %50, %52 in 2 : vector<1x8x128xf32>, vector<1x8x256xf32>, vector<1x8x128xf32> -> vector<1x8x512xf32>
    %54 = vector.extract_strided_slice %53 {offsets = [0, 0, 111], sizes = [1, 8, 256], strides = [1, 1, 1]} : vector<1x8x512xf32> to vector<1x8x256xf32>
    %cst_25 = arith.constant 0.000000e+00 : f32
    %55 = vector.shape_cast %28 : vector<1x1x256xi1> to vector<1x1x256xi1>
    %56 = vector.broadcast %55 : vector<1x1x256xi1> to vector<1x8x256xi1>
    %57 = vector.broadcast %cst_25 : f32 to vector<1x8x256xf32>
    %58 = arith.select %56, %54, %57 : vector<1x8x256xi1>, vector<1x8x256xf32>
    %59 = vector.extract_strided_slice %53 {offsets = [0, 0, 112], sizes = [1, 8, 256], strides = [1, 1, 1]} : vector<1x8x512xf32> to vector<1x8x256xf32>
    %60 = vector.extract_strided_slice %53 {offsets = [0, 0, 113], sizes = [1, 8, 256], strides = [1, 1, 1]} : vector<1x8x512xf32> to vector<1x8x256xf32>
    %cst_26 = arith.constant 0.000000e+00 : f32
    %61 = vector.shape_cast %35 : vector<1x1x256xi1> to vector<1x1x256xi1>
    %62 = vector.broadcast %61 : vector<1x1x256xi1> to vector<1x8x256xi1>
    %63 = vector.broadcast %cst_26 : f32 to vector<1x8x256xf32>
    %64 = arith.select %62, %60, %63 : vector<1x8x256xi1>, vector<1x8x256xf32>
    %65 = vector.extract_strided_slice %53 {offsets = [0, 0, 127], sizes = [1, 8, 256], strides = [1, 1, 1]} : vector<1x8x512xf32> to vector<1x8x256xf32>
    %cst_27 = arith.constant 0.000000e+00 : f32
    %66 = vector.shape_cast %28 : vector<1x1x256xi1> to vector<1x1x256xi1>
    %67 = vector.broadcast %66 : vector<1x1x256xi1> to vector<1x8x256xi1>
    %68 = vector.broadcast %cst_27 : f32 to vector<1x8x256xf32>
    %69 = arith.select %67, %65, %68 : vector<1x8x256xi1>, vector<1x8x256xf32>
    %70 = vector.extract_strided_slice %53 {offsets = [0, 0, 128], sizes = [1, 8, 256], strides = [1, 1, 1]} : vector<1x8x512xf32> to vector<1x8x256xf32>
    %71 = vector.extract_strided_slice %53 {offsets = [0, 0, 129], sizes = [1, 8, 256], strides = [1, 1, 1]} : vector<1x8x512xf32> to vector<1x8x256xf32>
    %cst_28 = arith.constant 0.000000e+00 : f32
    %72 = vector.shape_cast %35 : vector<1x1x256xi1> to vector<1x1x256xi1>
    %73 = vector.broadcast %72 : vector<1x1x256xi1> to vector<1x8x256xi1>
    %74 = vector.broadcast %cst_28 : f32 to vector<1x8x256xf32>
    %75 = arith.select %73, %71, %74 : vector<1x8x256xi1>, vector<1x8x256xf32>
    %76 = vector.extract_strided_slice %53 {offsets = [0, 0, 143], sizes = [1, 8, 256], strides = [1, 1, 1]} : vector<1x8x512xf32> to vector<1x8x256xf32>
    %cst_29 = arith.constant 0.000000e+00 : f32
    %77 = vector.shape_cast %28 : vector<1x1x256xi1> to vector<1x1x256xi1>
    %78 = vector.broadcast %77 : vector<1x1x256xi1> to vector<1x8x256xi1>
    %79 = vector.broadcast %cst_29 : f32 to vector<1x8x256xf32>
    %80 = arith.select %78, %76, %79 : vector<1x8x256xi1>, vector<1x8x256xf32>
    %81 = vector.extract_strided_slice %53 {offsets = [0, 0, 144], sizes = [1, 8, 256], strides = [1, 1, 1]} : vector<1x8x512xf32> to vector<1x8x256xf32>
    %82 = vector.extract_strided_slice %53 {offsets = [0, 0, 145], sizes = [1, 8, 256], strides = [1, 1, 1]} : vector<1x8x512xf32> to vector<1x8x256xf32>
    %cst_30 = arith.constant 0.000000e+00 : f32
    %83 = vector.shape_cast %35 : vector<1x1x256xi1> to vector<1x1x256xi1>
    %84 = vector.broadcast %83 : vector<1x1x256xi1> to vector<1x8x256xi1>
    %85 = vector.broadcast %cst_30 : f32 to vector<1x8x256xf32>
    %86 = arith.select %84, %82, %85 : vector<1x8x256xi1>, vector<1x8x256xf32>
    %87 = tpu.concatenate %58, %59, %64, %69, %70, %75, %80, %81, %86 in 1 : vector<1x8x256xf32>, vector<1x8x256xf32>, vector<1x8x256xf32>, vector<1x8x256xf32>, vector<1x8x256xf32>, vector<1x8x256xf32>, vector<1x8x256xf32>, vector<1x8x256xf32>, vector<1x8x256xf32> -> vector<1x72x256xf32>
    %c0_31 = arith.constant 0 : index
    %c0_32 = arith.constant 0 : index
    %88 = vector.load %arg3[%c0_31, %c0_32] : memref<8x72xf32, #tpu.memory_space<vmem>>, vector<8x72xf32>
    %c0_33 = arith.constant 0 : index
    %c0_34 = arith.constant 0 : index
    %89 = vector.load %arg4[%c0_33, %c0_34] : memref<8x1xf32, #tpu.memory_space<vmem>>, vector<8x1xf32>
    %90 = vector.shape_cast %87 : vector<1x72x256xf32> to vector<72x256xf32>
    %cst_35 = arith.constant dense<0.000000e+00> : vector<8x256xf32>
    %91 = tpu.matmul %88, %90, %cst_35 {dimension_numbers = #tpu.dot_dimension_numbers<[1], [0], [0], [1], [0, 0, 1, 1], [], []>} : vector<8x72xf32>, vector<72x256xf32>, vector<8x256xf32> -> vector<8x256xf32>
    %92 = vector.broadcast %89 : vector<8x1xf32> to vector<8x256xf32>
    %93 = arith.addf %91, %92 : vector<8x256xf32>
    %94 = vector.shape_cast %93 : vector<8x256xf32> to vector<1x8x256xf32>
    %cst_36 = arith.constant 0.000000e+00 : f32
    %95 = vector.broadcast %cst_36 : f32 to vector<1x8x256xf32>
    %96 = arith.maximumf %94, %95 : vector<1x8x256xf32>
    %cst_37 = arith.constant 0.000000e+00 : f32
    %97 = vector.broadcast %cst_37 : f32 to vector<1x8x128xf32>
    %98 = tpu.concatenate %97, %96, %97 in 2 : vector<1x8x128xf32>, vector<1x8x256xf32>, vector<1x8x128xf32> -> vector<1x8x512xf32>
    %99 = vector.extract_strided_slice %98 {offsets = [0, 0, 111], sizes = [1, 8, 256], strides = [1, 1, 1]} : vector<1x8x512xf32> to vector<1x8x256xf32>
    %cst_38 = arith.constant 0.000000e+00 : f32
    %100 = vector.shape_cast %28 : vector<1x1x256xi1> to vector<1x1x256xi1>
    %101 = vector.broadcast %100 : vector<1x1x256xi1> to vector<1x8x256xi1>
    %102 = vector.broadcast %cst_38 : f32 to vector<1x8x256xf32>
    %103 = arith.select %101, %99, %102 : vector<1x8x256xi1>, vector<1x8x256xf32>
    %104 = vector.extract_strided_slice %98 {offsets = [0, 0, 112], sizes = [1, 8, 256], strides = [1, 1, 1]} : vector<1x8x512xf32> to vector<1x8x256xf32>
    %105 = vector.extract_strided_slice %98 {offsets = [0, 0, 113], sizes = [1, 8, 256], strides = [1, 1, 1]} : vector<1x8x512xf32> to vector<1x8x256xf32>
    %cst_39 = arith.constant 0.000000e+00 : f32
    %106 = vector.shape_cast %35 : vector<1x1x256xi1> to vector<1x1x256xi1>
    %107 = vector.broadcast %106 : vector<1x1x256xi1> to vector<1x8x256xi1>
    %108 = vector.broadcast %cst_39 : f32 to vector<1x8x256xf32>
    %109 = arith.select %107, %105, %108 : vector<1x8x256xi1>, vector<1x8x256xf32>
    %110 = vector.extract_strided_slice %98 {offsets = [0, 0, 127], sizes = [1, 8, 256], strides = [1, 1, 1]} : vector<1x8x512xf32> to vector<1x8x256xf32>
    %cst_40 = arith.constant 0.000000e+00 : f32
    %111 = vector.shape_cast %28 : vector<1x1x256xi1> to vector<1x1x256xi1>
    %112 = vector.broadcast %111 : vector<1x1x256xi1> to vector<1x8x256xi1>
    %113 = vector.broadcast %cst_40 : f32 to vector<1x8x256xf32>
    %114 = arith.select %112, %110, %113 : vector<1x8x256xi1>, vector<1x8x256xf32>
    %115 = vector.extract_strided_slice %98 {offsets = [0, 0, 128], sizes = [1, 8, 256], strides = [1, 1, 1]} : vector<1x8x512xf32> to vector<1x8x256xf32>
    %116 = vector.extract_strided_slice %98 {offsets = [0, 0, 129], sizes = [1, 8, 256], strides = [1, 1, 1]} : vector<1x8x512xf32> to vector<1x8x256xf32>
    %cst_41 = arith.constant 0.000000e+00 : f32
    %117 = vector.shape_cast %35 : vector<1x1x256xi1> to vector<1x1x256xi1>
    %118 = vector.broadcast %117 : vector<1x1x256xi1> to vector<1x8x256xi1>
    %119 = vector.broadcast %cst_41 : f32 to vector<1x8x256xf32>
    %120 = arith.select %118, %116, %119 : vector<1x8x256xi1>, vector<1x8x256xf32>
    %121 = vector.extract_strided_slice %98 {offsets = [0, 0, 143], sizes = [1, 8, 256], strides = [1, 1, 1]} : vector<1x8x512xf32> to vector<1x8x256xf32>
    %cst_42 = arith.constant 0.000000e+00 : f32
    %122 = vector.shape_cast %28 : vector<1x1x256xi1> to vector<1x1x256xi1>
    %123 = vector.broadcast %122 : vector<1x1x256xi1> to vector<1x8x256xi1>
    %124 = vector.broadcast %cst_42 : f32 to vector<1x8x256xf32>
    %125 = arith.select %123, %121, %124 : vector<1x8x256xi1>, vector<1x8x256xf32>
    %126 = vector.extract_strided_slice %98 {offsets = [0, 0, 144], sizes = [1, 8, 256], strides = [1, 1, 1]} : vector<1x8x512xf32> to vector<1x8x256xf32>
    %127 = vector.extract_strided_slice %98 {offsets = [0, 0, 145], sizes = [1, 8, 256], strides = [1, 1, 1]} : vector<1x8x512xf32> to vector<1x8x256xf32>
    %cst_43 = arith.constant 0.000000e+00 : f32
    %128 = vector.shape_cast %35 : vector<1x1x256xi1> to vector<1x1x256xi1>
    %129 = vector.broadcast %128 : vector<1x1x256xi1> to vector<1x8x256xi1>
    %130 = vector.broadcast %cst_43 : f32 to vector<1x8x256xf32>
    %131 = arith.select %129, %127, %130 : vector<1x8x256xi1>, vector<1x8x256xf32>
    %132 = tpu.concatenate %103, %104, %109, %114, %115, %120, %125, %126, %131 in 1 : vector<1x8x256xf32>, vector<1x8x256xf32>, vector<1x8x256xf32>, vector<1x8x256xf32>, vector<1x8x256xf32>, vector<1x8x256xf32>, vector<1x8x256xf32>, vector<1x8x256xf32>, vector<1x8x256xf32> -> vector<1x72x256xf32>
    %c0_44 = arith.constant 0 : index
    %c0_45 = arith.constant 0 : index
    %133 = vector.load %arg5[%c0_44, %c0_45] : memref<8x72xf32, #tpu.memory_space<vmem>>, vector<8x72xf32>
    %c0_46 = arith.constant 0 : index
    %c0_47 = arith.constant 0 : index
    %134 = vector.load %arg6[%c0_46, %c0_47] : memref<8x1xf32, #tpu.memory_space<vmem>>, vector<8x1xf32>
    %135 = vector.shape_cast %132 : vector<1x72x256xf32> to vector<72x256xf32>
    %cst_48 = arith.constant dense<0.000000e+00> : vector<8x256xf32>
    %136 = tpu.matmul %133, %135, %cst_48 {dimension_numbers = #tpu.dot_dimension_numbers<[1], [0], [0], [1], [0, 0, 1, 1], [], []>} : vector<8x72xf32>, vector<72x256xf32>, vector<8x256xf32> -> vector<8x256xf32>
    %137 = vector.broadcast %134 : vector<8x1xf32> to vector<8x256xf32>
    %138 = arith.addf %136, %137 : vector<8x256xf32>
    %139 = vector.shape_cast %138 : vector<8x256xf32> to vector<1x8x256xf32>
    %cst_49 = arith.constant 0.000000e+00 : f32
    %140 = vector.broadcast %cst_49 : f32 to vector<1x8x256xf32>
    %141 = arith.maximumf %139, %140 : vector<1x8x256xf32>
    %cst_50 = arith.constant 0.000000e+00 : f32
    %142 = vector.broadcast %cst_50 : f32 to vector<1x8x128xf32>
    %143 = tpu.concatenate %142, %51, %142 in 2 : vector<1x8x128xf32>, vector<1x8x256xf32>, vector<1x8x128xf32> -> vector<1x8x512xf32>
    %144 = vector.extract_strided_slice %143 {offsets = [0, 0, 111], sizes = [1, 8, 256], strides = [1, 1, 1]} : vector<1x8x512xf32> to vector<1x8x256xf32>
    %cst_51 = arith.constant 0.000000e+00 : f32
    %145 = vector.shape_cast %28 : vector<1x1x256xi1> to vector<1x1x256xi1>
    %146 = vector.broadcast %145 : vector<1x1x256xi1> to vector<1x8x256xi1>
    %147 = vector.broadcast %cst_51 : f32 to vector<1x8x256xf32>
    %148 = arith.select %146, %144, %147 : vector<1x8x256xi1>, vector<1x8x256xf32>
    %149 = vector.extract_strided_slice %143 {offsets = [0, 0, 112], sizes = [1, 8, 256], strides = [1, 1, 1]} : vector<1x8x512xf32> to vector<1x8x256xf32>
    %150 = vector.extract_strided_slice %143 {offsets = [0, 0, 113], sizes = [1, 8, 256], strides = [1, 1, 1]} : vector<1x8x512xf32> to vector<1x8x256xf32>
    %cst_52 = arith.constant 0.000000e+00 : f32
    %151 = vector.shape_cast %35 : vector<1x1x256xi1> to vector<1x1x256xi1>
    %152 = vector.broadcast %151 : vector<1x1x256xi1> to vector<1x8x256xi1>
    %153 = vector.broadcast %cst_52 : f32 to vector<1x8x256xf32>
    %154 = arith.select %152, %150, %153 : vector<1x8x256xi1>, vector<1x8x256xf32>
    %155 = vector.extract_strided_slice %143 {offsets = [0, 0, 127], sizes = [1, 8, 256], strides = [1, 1, 1]} : vector<1x8x512xf32> to vector<1x8x256xf32>
    %cst_53 = arith.constant 0.000000e+00 : f32
    %156 = vector.shape_cast %28 : vector<1x1x256xi1> to vector<1x1x256xi1>
    %157 = vector.broadcast %156 : vector<1x1x256xi1> to vector<1x8x256xi1>
    %158 = vector.broadcast %cst_53 : f32 to vector<1x8x256xf32>
    %159 = arith.select %157, %155, %158 : vector<1x8x256xi1>, vector<1x8x256xf32>
    %160 = vector.extract_strided_slice %143 {offsets = [0, 0, 128], sizes = [1, 8, 256], strides = [1, 1, 1]} : vector<1x8x512xf32> to vector<1x8x256xf32>
    %161 = vector.extract_strided_slice %143 {offsets = [0, 0, 129], sizes = [1, 8, 256], strides = [1, 1, 1]} : vector<1x8x512xf32> to vector<1x8x256xf32>
    %cst_54 = arith.constant 0.000000e+00 : f32
    %162 = vector.shape_cast %35 : vector<1x1x256xi1> to vector<1x1x256xi1>
    %163 = vector.broadcast %162 : vector<1x1x256xi1> to vector<1x8x256xi1>
    %164 = vector.broadcast %cst_54 : f32 to vector<1x8x256xf32>
    %165 = arith.select %163, %161, %164 : vector<1x8x256xi1>, vector<1x8x256xf32>
    %166 = vector.extract_strided_slice %143 {offsets = [0, 0, 143], sizes = [1, 8, 256], strides = [1, 1, 1]} : vector<1x8x512xf32> to vector<1x8x256xf32>
    %cst_55 = arith.constant 0.000000e+00 : f32
    %167 = vector.shape_cast %28 : vector<1x1x256xi1> to vector<1x1x256xi1>
    %168 = vector.broadcast %167 : vector<1x1x256xi1> to vector<1x8x256xi1>
    %169 = vector.broadcast %cst_55 : f32 to vector<1x8x256xf32>
    %170 = arith.select %168, %166, %169 : vector<1x8x256xi1>, vector<1x8x256xf32>
    %171 = vector.extract_strided_slice %143 {offsets = [0, 0, 144], sizes = [1, 8, 256], strides = [1, 1, 1]} : vector<1x8x512xf32> to vector<1x8x256xf32>
    %172 = vector.extract_strided_slice %143 {offsets = [0, 0, 145], sizes = [1, 8, 256], strides = [1, 1, 1]} : vector<1x8x512xf32> to vector<1x8x256xf32>
    %cst_56 = arith.constant 0.000000e+00 : f32
    %173 = vector.shape_cast %35 : vector<1x1x256xi1> to vector<1x1x256xi1>
    %174 = vector.broadcast %173 : vector<1x1x256xi1> to vector<1x8x256xi1>
    %175 = vector.broadcast %cst_56 : f32 to vector<1x8x256xf32>
    %176 = arith.select %174, %172, %175 : vector<1x8x256xi1>, vector<1x8x256xf32>
    %177 = tpu.concatenate %148, %149, %154, %159, %160, %165, %170, %171, %176 in 1 : vector<1x8x256xf32>, vector<1x8x256xf32>, vector<1x8x256xf32>, vector<1x8x256xf32>, vector<1x8x256xf32>, vector<1x8x256xf32>, vector<1x8x256xf32>, vector<1x8x256xf32>, vector<1x8x256xf32> -> vector<1x72x256xf32>
    %c0_57 = arith.constant 0 : index
    %c0_58 = arith.constant 0 : index
    %178 = vector.load %arg7[%c0_57, %c0_58] : memref<8x72xf32, #tpu.memory_space<vmem>>, vector<8x72xf32>
    %c0_59 = arith.constant 0 : index
    %c0_60 = arith.constant 0 : index
    %179 = vector.load %arg8[%c0_59, %c0_60] : memref<8x1xf32, #tpu.memory_space<vmem>>, vector<8x1xf32>
    %180 = vector.shape_cast %177 : vector<1x72x256xf32> to vector<72x256xf32>
    %cst_61 = arith.constant dense<0.000000e+00> : vector<8x256xf32>
    %181 = tpu.matmul %178, %180, %cst_61 {dimension_numbers = #tpu.dot_dimension_numbers<[1], [0], [0], [1], [0, 0, 1, 1], [], []>} : vector<8x72xf32>, vector<72x256xf32>, vector<8x256xf32> -> vector<8x256xf32>
    %182 = vector.broadcast %179 : vector<8x1xf32> to vector<8x256xf32>
    %183 = arith.addf %181, %182 : vector<8x256xf32>
    %184 = vector.shape_cast %183 : vector<8x256xf32> to vector<1x8x256xf32>
    %cst_62 = arith.constant 0.000000e+00 : f32
    %185 = vector.broadcast %cst_62 : f32 to vector<1x8x256xf32>
    %186 = arith.maximumf %184, %185 : vector<1x8x256xf32>
    %cst_63 = arith.constant 0.000000e+00 : f32
    %187 = vector.broadcast %cst_63 : f32 to vector<1x8x128xf32>
    %188 = tpu.concatenate %187, %186, %187 in 2 : vector<1x8x128xf32>, vector<1x8x256xf32>, vector<1x8x128xf32> -> vector<1x8x512xf32>
    %189 = vector.extract_strided_slice %188 {offsets = [0, 0, 111], sizes = [1, 8, 256], strides = [1, 1, 1]} : vector<1x8x512xf32> to vector<1x8x256xf32>
    %cst_64 = arith.constant 0.000000e+00 : f32
    %190 = vector.shape_cast %28 : vector<1x1x256xi1> to vector<1x1x256xi1>
    %191 = vector.broadcast %190 : vector<1x1x256xi1> to vector<1x8x256xi1>
    %192 = vector.broadcast %cst_64 : f32 to vector<1x8x256xf32>
    %193 = arith.select %191, %189, %192 : vector<1x8x256xi1>, vector<1x8x256xf32>
    %194 = vector.extract_strided_slice %188 {offsets = [0, 0, 112], sizes = [1, 8, 256], strides = [1, 1, 1]} : vector<1x8x512xf32> to vector<1x8x256xf32>
    %195 = vector.extract_strided_slice %188 {offsets = [0, 0, 113], sizes = [1, 8, 256], strides = [1, 1, 1]} : vector<1x8x512xf32> to vector<1x8x256xf32>
    %cst_65 = arith.constant 0.000000e+00 : f32
    %196 = vector.shape_cast %35 : vector<1x1x256xi1> to vector<1x1x256xi1>
    %197 = vector.broadcast %196 : vector<1x1x256xi1> to vector<1x8x256xi1>
    %198 = vector.broadcast %cst_65 : f32 to vector<1x8x256xf32>
    %199 = arith.select %197, %195, %198 : vector<1x8x256xi1>, vector<1x8x256xf32>
    %200 = vector.extract_strided_slice %188 {offsets = [0, 0, 127], sizes = [1, 8, 256], strides = [1, 1, 1]} : vector<1x8x512xf32> to vector<1x8x256xf32>
    %cst_66 = arith.constant 0.000000e+00 : f32
    %201 = vector.shape_cast %28 : vector<1x1x256xi1> to vector<1x1x256xi1>
    %202 = vector.broadcast %201 : vector<1x1x256xi1> to vector<1x8x256xi1>
    %203 = vector.broadcast %cst_66 : f32 to vector<1x8x256xf32>
    %204 = arith.select %202, %200, %203 : vector<1x8x256xi1>, vector<1x8x256xf32>
    %205 = vector.extract_strided_slice %188 {offsets = [0, 0, 128], sizes = [1, 8, 256], strides = [1, 1, 1]} : vector<1x8x512xf32> to vector<1x8x256xf32>
    %206 = vector.extract_strided_slice %188 {offsets = [0, 0, 129], sizes = [1, 8, 256], strides = [1, 1, 1]} : vector<1x8x512xf32> to vector<1x8x256xf32>
    %cst_67 = arith.constant 0.000000e+00 : f32
    %207 = vector.shape_cast %35 : vector<1x1x256xi1> to vector<1x1x256xi1>
    %208 = vector.broadcast %207 : vector<1x1x256xi1> to vector<1x8x256xi1>
    %209 = vector.broadcast %cst_67 : f32 to vector<1x8x256xf32>
    %210 = arith.select %208, %206, %209 : vector<1x8x256xi1>, vector<1x8x256xf32>
    %211 = vector.extract_strided_slice %188 {offsets = [0, 0, 143], sizes = [1, 8, 256], strides = [1, 1, 1]} : vector<1x8x512xf32> to vector<1x8x256xf32>
    %cst_68 = arith.constant 0.000000e+00 : f32
    %212 = vector.shape_cast %28 : vector<1x1x256xi1> to vector<1x1x256xi1>
    %213 = vector.broadcast %212 : vector<1x1x256xi1> to vector<1x8x256xi1>
    %214 = vector.broadcast %cst_68 : f32 to vector<1x8x256xf32>
    %215 = arith.select %213, %211, %214 : vector<1x8x256xi1>, vector<1x8x256xf32>
    %216 = vector.extract_strided_slice %188 {offsets = [0, 0, 144], sizes = [1, 8, 256], strides = [1, 1, 1]} : vector<1x8x512xf32> to vector<1x8x256xf32>
    %217 = vector.extract_strided_slice %188 {offsets = [0, 0, 145], sizes = [1, 8, 256], strides = [1, 1, 1]} : vector<1x8x512xf32> to vector<1x8x256xf32>
    %cst_69 = arith.constant 0.000000e+00 : f32
    %218 = vector.shape_cast %35 : vector<1x1x256xi1> to vector<1x1x256xi1>
    %219 = vector.broadcast %218 : vector<1x1x256xi1> to vector<1x8x256xi1>
    %220 = vector.broadcast %cst_69 : f32 to vector<1x8x256xf32>
    %221 = arith.select %219, %217, %220 : vector<1x8x256xi1>, vector<1x8x256xf32>
    %222 = tpu.concatenate %193, %194, %199, %204, %205, %210, %215, %216, %221 in 1 : vector<1x8x256xf32>, vector<1x8x256xf32>, vector<1x8x256xf32>, vector<1x8x256xf32>, vector<1x8x256xf32>, vector<1x8x256xf32>, vector<1x8x256xf32>, vector<1x8x256xf32>, vector<1x8x256xf32> -> vector<1x72x256xf32>
    %c0_70 = arith.constant 0 : index
    %c0_71 = arith.constant 0 : index
    %223 = vector.load %arg9[%c0_70, %c0_71] : memref<8x72xf32, #tpu.memory_space<vmem>>, vector<8x72xf32>
    %c0_72 = arith.constant 0 : index
    %c0_73 = arith.constant 0 : index
    %224 = vector.load %arg10[%c0_72, %c0_73] : memref<8x1xf32, #tpu.memory_space<vmem>>, vector<8x1xf32>
    %225 = vector.shape_cast %222 : vector<1x72x256xf32> to vector<72x256xf32>
    %cst_74 = arith.constant dense<0.000000e+00> : vector<8x256xf32>
    %226 = tpu.matmul %223, %225, %cst_74 {dimension_numbers = #tpu.dot_dimension_numbers<[1], [0], [0], [1], [0, 0, 1, 1], [], []>} : vector<8x72xf32>, vector<72x256xf32>, vector<8x256xf32> -> vector<8x256xf32>
    %227 = vector.broadcast %224 : vector<8x1xf32> to vector<8x256xf32>
    %228 = arith.addf %226, %227 : vector<8x256xf32>
    %229 = vector.shape_cast %228 : vector<8x256xf32> to vector<1x8x256xf32>
    %230 = arith.mulf %141, %229 : vector<1x8x256xf32>
    %c0_75 = arith.constant 0 : index
    %c0_76 = arith.constant 0 : index
    %231 = vector.load %arg11[%c0_75, %c0_76] : memref<8x8xf32, #tpu.memory_space<vmem>>, vector<8x8xf32>
    %c0_77 = arith.constant 0 : index
    %c0_78 = arith.constant 0 : index
    %232 = vector.load %arg12[%c0_77, %c0_78] : memref<8x1xf32, #tpu.memory_space<vmem>>, vector<8x1xf32>
    %c0_79 = arith.constant 0 : index
    %c0_80 = arith.constant 0 : index
    %233 = vector.load %arg13[%c0_79, %c0_80] : memref<49x8xf32, #tpu.memory_space<vmem>>, vector<49x8xf32>
    %c0_81 = arith.constant 0 : index
    %c0_82 = arith.constant 0 : index
    %234 = vector.load %arg14[%c0_81, %c0_82] : memref<49x1xf32, #tpu.memory_space<vmem>>, vector<49x1xf32>
    %cst_83 = arith.constant dense<0.000000e+00> : vector<8xf32>
    %235 = vector.multi_reduction <add>, %233, %cst_83 [0] : vector<49x8xf32> to vector<8xf32>
    %236 = vector.shape_cast %235 : vector<8xf32> to vector<1x8xf32>
    %cst_84 = arith.constant 4.900000e+01 : f32
    %237 = vector.broadcast %cst_84 : f32 to vector<1x8xf32>
    %238 = arith.divf %236, %237 : vector<1x8xf32>
    %239 = vector.broadcast %238 : vector<1x8xf32> to vector<49x8xf32>
    %240 = arith.subf %233, %239 : vector<49x8xf32>
    %cst_85 = arith.constant dense<0.000000e+00> : vector<1xf32>
    %241 = vector.multi_reduction <add>, %234, %cst_85 [0] : vector<49x1xf32> to vector<1xf32>
    %242 = vector.shape_cast %241 : vector<1xf32> to vector<1x1xf32>
    %cst_86 = arith.constant 4.900000e+01 : f32
    %243 = vector.broadcast %cst_86 : f32 to vector<1x1xf32>
    %244 = arith.divf %242, %243 : vector<1x1xf32>
    %245 = vector.broadcast %244 : vector<1x1xf32> to vector<49x1xf32>
    %246 = arith.subf %234, %245 : vector<49x1xf32>
    %cst_87 = arith.constant 0.0204081628 : f32
    %247 = vector.broadcast %cst_87 : f32 to vector<49x1xf32>
    %248 = arith.addf %246, %247 : vector<49x1xf32>
    %249 = vector.shape_cast %51 : vector<1x8x256xf32> to vector<8x256xf32>
    %cst_88 = arith.constant dense<0.000000e+00> : vector<8x256xf32>
    %250 = tpu.matmul %231, %249, %cst_88 {dimension_numbers = #tpu.dot_dimension_numbers<[1], [0], [0], [1], [0, 0, 1, 1], [], []>} : vector<8x8xf32>, vector<8x256xf32>, vector<8x256xf32> -> vector<8x256xf32>
    %251 = vector.broadcast %232 : vector<8x1xf32> to vector<8x256xf32>
    %252 = arith.addf %250, %251 : vector<8x256xf32>
    %cst_89 = arith.constant 0.000000e+00 : f32
    %253 = vector.broadcast %cst_89 : f32 to vector<8x256xf32>
    %254 = arith.maximumf %252, %253 : vector<8x256xf32>
    %cst_90 = arith.constant dense<0.000000e+00> : vector<49x256xf32>
    %255 = tpu.matmul %240, %254, %cst_90 {dimension_numbers = #tpu.dot_dimension_numbers<[1], [0], [0], [1], [0, 0, 1, 1], [], []>} : vector<49x8xf32>, vector<8x256xf32>, vector<49x256xf32> -> vector<49x256xf32>
    %256 = vector.broadcast %248 : vector<49x1xf32> to vector<49x256xf32>
    %257 = arith.addf %255, %256 : vector<49x256xf32>
    %258 = vector.shape_cast %257 : vector<49x256xf32> to vector<1x49x256xf32>
    %cst_91 = arith.constant 0.000000e+00 : f32
    %259 = vector.broadcast %cst_91 : f32 to vector<1x8x128xf32>
    %260 = tpu.concatenate %259, %230, %259 in 2 : vector<1x8x128xf32>, vector<1x8x256xf32>, vector<1x8x128xf32> -> vector<1x8x512xf32>
    %cst_92 = arith.constant 0.000000e+00 : f32
    %261 = vector.broadcast %cst_92 : f32 to vector<1x8x256xf32>
    %262 = vector.extract_strided_slice %260 {offsets = [0, 0, 77], sizes = [1, 8, 256], strides = [1, 1, 1]} : vector<1x8x512xf32> to vector<1x8x256xf32>
    %263 = vector.extract_strided_slice %258 {offsets = [0, 0, 0], sizes = [1, 1, 256], strides = [1, 1, 1]} : vector<1x49x256xf32> to vector<1x1x256xf32>
    %cst_93 = arith.constant 0.000000e+00 : f32
    %264 = vector.broadcast %cst_93 : f32 to vector<1x1x256xf32>
    %265 = arith.select %14, %263, %264 : vector<1x1x256xi1>, vector<1x1x256xf32>
    %266 = vector.broadcast %265 : vector<1x1x256xf32> to vector<1x8x256xf32>
    %267 = arith.mulf %262, %266 : vector<1x8x256xf32>
    %268 = arith.addf %261, %267 : vector<1x8x256xf32>
    %269 = vector.extract_strided_slice %260 {offsets = [0, 0, 78], sizes = [1, 8, 256], strides = [1, 1, 1]} : vector<1x8x512xf32> to vector<1x8x256xf32>
    %270 = vector.extract_strided_slice %258 {offsets = [0, 1, 0], sizes = [1, 1, 256], strides = [1, 1, 1]} : vector<1x49x256xf32> to vector<1x1x256xf32>
    %cst_94 = arith.constant 0.000000e+00 : f32
    %271 = vector.broadcast %cst_94 : f32 to vector<1x1x256xf32>
    %272 = arith.select %21, %270, %271 : vector<1x1x256xi1>, vector<1x1x256xf32>
    %273 = vector.broadcast %272 : vector<1x1x256xf32> to vector<1x8x256xf32>
    %274 = arith.mulf %269, %273 : vector<1x8x256xf32>
    %275 = arith.addf %268, %274 : vector<1x8x256xf32>
    %276 = vector.extract_strided_slice %260 {offsets = [0, 0, 79], sizes = [1, 8, 256], strides = [1, 1, 1]} : vector<1x8x512xf32> to vector<1x8x256xf32>
    %277 = vector.extract_strided_slice %258 {offsets = [0, 2, 0], sizes = [1, 1, 256], strides = [1, 1, 1]} : vector<1x49x256xf32> to vector<1x1x256xf32>
    %cst_95 = arith.constant 0.000000e+00 : f32
    %278 = vector.broadcast %cst_95 : f32 to vector<1x1x256xf32>
    %279 = arith.select %28, %277, %278 : vector<1x1x256xi1>, vector<1x1x256xf32>
    %280 = vector.broadcast %279 : vector<1x1x256xf32> to vector<1x8x256xf32>
    %281 = arith.mulf %276, %280 : vector<1x8x256xf32>
    %282 = arith.addf %275, %281 : vector<1x8x256xf32>
    %283 = vector.extract_strided_slice %260 {offsets = [0, 0, 80], sizes = [1, 8, 256], strides = [1, 1, 1]} : vector<1x8x512xf32> to vector<1x8x256xf32>
    %284 = vector.extract_strided_slice %258 {offsets = [0, 3, 0], sizes = [1, 1, 256], strides = [1, 1, 1]} : vector<1x49x256xf32> to vector<1x1x256xf32>
    %285 = vector.broadcast %284 : vector<1x1x256xf32> to vector<1x8x256xf32>
    %286 = arith.mulf %283, %285 : vector<1x8x256xf32>
    %287 = arith.addf %282, %286 : vector<1x8x256xf32>
    %288 = vector.extract_strided_slice %260 {offsets = [0, 0, 81], sizes = [1, 8, 256], strides = [1, 1, 1]} : vector<1x8x512xf32> to vector<1x8x256xf32>
    %289 = vector.extract_strided_slice %258 {offsets = [0, 4, 0], sizes = [1, 1, 256], strides = [1, 1, 1]} : vector<1x49x256xf32> to vector<1x1x256xf32>
    %cst_96 = arith.constant 0.000000e+00 : f32
    %290 = vector.broadcast %cst_96 : f32 to vector<1x1x256xf32>
    %291 = arith.select %35, %289, %290 : vector<1x1x256xi1>, vector<1x1x256xf32>
    %292 = vector.broadcast %291 : vector<1x1x256xf32> to vector<1x8x256xf32>
    %293 = arith.mulf %288, %292 : vector<1x8x256xf32>
    %294 = arith.addf %287, %293 : vector<1x8x256xf32>
    %295 = vector.extract_strided_slice %260 {offsets = [0, 0, 82], sizes = [1, 8, 256], strides = [1, 1, 1]} : vector<1x8x512xf32> to vector<1x8x256xf32>
    %296 = vector.extract_strided_slice %258 {offsets = [0, 5, 0], sizes = [1, 1, 256], strides = [1, 1, 1]} : vector<1x49x256xf32> to vector<1x1x256xf32>
    %cst_97 = arith.constant 0.000000e+00 : f32
    %297 = vector.broadcast %cst_97 : f32 to vector<1x1x256xf32>
    %298 = arith.select %42, %296, %297 : vector<1x1x256xi1>, vector<1x1x256xf32>
    %299 = vector.broadcast %298 : vector<1x1x256xf32> to vector<1x8x256xf32>
    %300 = arith.mulf %295, %299 : vector<1x8x256xf32>
    %301 = arith.addf %294, %300 : vector<1x8x256xf32>
    %302 = vector.extract_strided_slice %260 {offsets = [0, 0, 83], sizes = [1, 8, 256], strides = [1, 1, 1]} : vector<1x8x512xf32> to vector<1x8x256xf32>
    %303 = vector.extract_strided_slice %258 {offsets = [0, 6, 0], sizes = [1, 1, 256], strides = [1, 1, 1]} : vector<1x49x256xf32> to vector<1x1x256xf32>
    %cst_98 = arith.constant 0.000000e+00 : f32
    %304 = vector.broadcast %cst_98 : f32 to vector<1x1x256xf32>
    %305 = arith.select %49, %303, %304 : vector<1x1x256xi1>, vector<1x1x256xf32>
    %306 = vector.broadcast %305 : vector<1x1x256xf32> to vector<1x8x256xf32>
    %307 = arith.mulf %302, %306 : vector<1x8x256xf32>
    %308 = arith.addf %301, %307 : vector<1x8x256xf32>
    %309 = vector.extract_strided_slice %260 {offsets = [0, 0, 93], sizes = [1, 8, 256], strides = [1, 1, 1]} : vector<1x8x512xf32> to vector<1x8x256xf32>
    %310 = vector.extract_strided_slice %258 {offsets = [0, 7, 0], sizes = [1, 1, 256], strides = [1, 1, 1]} : vector<1x49x256xf32> to vector<1x1x256xf32>
    %cst_99 = arith.constant 0.000000e+00 : f32
    %311 = vector.broadcast %cst_99 : f32 to vector<1x1x256xf32>
    %312 = arith.select %14, %310, %311 : vector<1x1x256xi1>, vector<1x1x256xf32>
    %313 = vector.broadcast %312 : vector<1x1x256xf32> to vector<1x8x256xf32>
    %314 = arith.mulf %309, %313 : vector<1x8x256xf32>
    %315 = arith.addf %308, %314 : vector<1x8x256xf32>
    %316 = vector.extract_strided_slice %260 {offsets = [0, 0, 94], sizes = [1, 8, 256], strides = [1, 1, 1]} : vector<1x8x512xf32> to vector<1x8x256xf32>
    %317 = vector.extract_strided_slice %258 {offsets = [0, 8, 0], sizes = [1, 1, 256], strides = [1, 1, 1]} : vector<1x49x256xf32> to vector<1x1x256xf32>
    %cst_100 = arith.constant 0.000000e+00 : f32
    %318 = vector.broadcast %cst_100 : f32 to vector<1x1x256xf32>
    %319 = arith.select %21, %317, %318 : vector<1x1x256xi1>, vector<1x1x256xf32>
    %320 = vector.broadcast %319 : vector<1x1x256xf32> to vector<1x8x256xf32>
    %321 = arith.mulf %316, %320 : vector<1x8x256xf32>
    %322 = arith.addf %315, %321 : vector<1x8x256xf32>
    %323 = vector.extract_strided_slice %260 {offsets = [0, 0, 95], sizes = [1, 8, 256], strides = [1, 1, 1]} : vector<1x8x512xf32> to vector<1x8x256xf32>
    %324 = vector.extract_strided_slice %258 {offsets = [0, 9, 0], sizes = [1, 1, 256], strides = [1, 1, 1]} : vector<1x49x256xf32> to vector<1x1x256xf32>
    %cst_101 = arith.constant 0.000000e+00 : f32
    %325 = vector.broadcast %cst_101 : f32 to vector<1x1x256xf32>
    %326 = arith.select %28, %324, %325 : vector<1x1x256xi1>, vector<1x1x256xf32>
    %327 = vector.broadcast %326 : vector<1x1x256xf32> to vector<1x8x256xf32>
    %328 = arith.mulf %323, %327 : vector<1x8x256xf32>
    %329 = arith.addf %322, %328 : vector<1x8x256xf32>
    %330 = vector.extract_strided_slice %260 {offsets = [0, 0, 96], sizes = [1, 8, 256], strides = [1, 1, 1]} : vector<1x8x512xf32> to vector<1x8x256xf32>
    %331 = vector.extract_strided_slice %258 {offsets = [0, 10, 0], sizes = [1, 1, 256], strides = [1, 1, 1]} : vector<1x49x256xf32> to vector<1x1x256xf32>
    %332 = vector.broadcast %331 : vector<1x1x256xf32> to vector<1x8x256xf32>
    %333 = arith.mulf %330, %332 : vector<1x8x256xf32>
    %334 = arith.addf %329, %333 : vector<1x8x256xf32>
    %335 = vector.extract_strided_slice %260 {offsets = [0, 0, 97], sizes = [1, 8, 256], strides = [1, 1, 1]} : vector<1x8x512xf32> to vector<1x8x256xf32>
    %336 = vector.extract_strided_slice %258 {offsets = [0, 11, 0], sizes = [1, 1, 256], strides = [1, 1, 1]} : vector<1x49x256xf32> to vector<1x1x256xf32>
    %cst_102 = arith.constant 0.000000e+00 : f32
    %337 = vector.broadcast %cst_102 : f32 to vector<1x1x256xf32>
    %338 = arith.select %35, %336, %337 : vector<1x1x256xi1>, vector<1x1x256xf32>
    %339 = vector.broadcast %338 : vector<1x1x256xf32> to vector<1x8x256xf32>
    %340 = arith.mulf %335, %339 : vector<1x8x256xf32>
    %341 = arith.addf %334, %340 : vector<1x8x256xf32>
    %342 = vector.extract_strided_slice %260 {offsets = [0, 0, 98], sizes = [1, 8, 256], strides = [1, 1, 1]} : vector<1x8x512xf32> to vector<1x8x256xf32>
    %343 = vector.extract_strided_slice %258 {offsets = [0, 12, 0], sizes = [1, 1, 256], strides = [1, 1, 1]} : vector<1x49x256xf32> to vector<1x1x256xf32>
    %cst_103 = arith.constant 0.000000e+00 : f32
    %344 = vector.broadcast %cst_103 : f32 to vector<1x1x256xf32>
    %345 = arith.select %42, %343, %344 : vector<1x1x256xi1>, vector<1x1x256xf32>
    %346 = vector.broadcast %345 : vector<1x1x256xf32> to vector<1x8x256xf32>
    %347 = arith.mulf %342, %346 : vector<1x8x256xf32>
    %348 = arith.addf %341, %347 : vector<1x8x256xf32>
    %349 = vector.extract_strided_slice %260 {offsets = [0, 0, 99], sizes = [1, 8, 256], strides = [1, 1, 1]} : vector<1x8x512xf32> to vector<1x8x256xf32>
    %350 = vector.extract_strided_slice %258 {offsets = [0, 13, 0], sizes = [1, 1, 256], strides = [1, 1, 1]} : vector<1x49x256xf32> to vector<1x1x256xf32>
    %cst_104 = arith.constant 0.000000e+00 : f32
    %351 = vector.broadcast %cst_104 : f32 to vector<1x1x256xf32>
    %352 = arith.select %49, %350, %351 : vector<1x1x256xi1>, vector<1x1x256xf32>
    %353 = vector.broadcast %352 : vector<1x1x256xf32> to vector<1x8x256xf32>
    %354 = arith.mulf %349, %353 : vector<1x8x256xf32>
    %355 = arith.addf %348, %354 : vector<1x8x256xf32>
    %356 = vector.extract_strided_slice %260 {offsets = [0, 0, 109], sizes = [1, 8, 256], strides = [1, 1, 1]} : vector<1x8x512xf32> to vector<1x8x256xf32>
    %357 = vector.extract_strided_slice %258 {offsets = [0, 14, 0], sizes = [1, 1, 256], strides = [1, 1, 1]} : vector<1x49x256xf32> to vector<1x1x256xf32>
    %cst_105 = arith.constant 0.000000e+00 : f32
    %358 = vector.broadcast %cst_105 : f32 to vector<1x1x256xf32>
    %359 = arith.select %14, %357, %358 : vector<1x1x256xi1>, vector<1x1x256xf32>
    %360 = vector.broadcast %359 : vector<1x1x256xf32> to vector<1x8x256xf32>
    %361 = arith.mulf %356, %360 : vector<1x8x256xf32>
    %362 = arith.addf %355, %361 : vector<1x8x256xf32>
    %363 = vector.extract_strided_slice %260 {offsets = [0, 0, 110], sizes = [1, 8, 256], strides = [1, 1, 1]} : vector<1x8x512xf32> to vector<1x8x256xf32>
    %364 = vector.extract_strided_slice %258 {offsets = [0, 15, 0], sizes = [1, 1, 256], strides = [1, 1, 1]} : vector<1x49x256xf32> to vector<1x1x256xf32>
    %cst_106 = arith.constant 0.000000e+00 : f32
    %365 = vector.broadcast %cst_106 : f32 to vector<1x1x256xf32>
    %366 = arith.select %21, %364, %365 : vector<1x1x256xi1>, vector<1x1x256xf32>
    %367 = vector.broadcast %366 : vector<1x1x256xf32> to vector<1x8x256xf32>
    %368 = arith.mulf %363, %367 : vector<1x8x256xf32>
    %369 = arith.addf %362, %368 : vector<1x8x256xf32>
    %370 = vector.extract_strided_slice %260 {offsets = [0, 0, 111], sizes = [1, 8, 256], strides = [1, 1, 1]} : vector<1x8x512xf32> to vector<1x8x256xf32>
    %371 = vector.extract_strided_slice %258 {offsets = [0, 16, 0], sizes = [1, 1, 256], strides = [1, 1, 1]} : vector<1x49x256xf32> to vector<1x1x256xf32>
    %cst_107 = arith.constant 0.000000e+00 : f32
    %372 = vector.broadcast %cst_107 : f32 to vector<1x1x256xf32>
    %373 = arith.select %28, %371, %372 : vector<1x1x256xi1>, vector<1x1x256xf32>
    %374 = vector.broadcast %373 : vector<1x1x256xf32> to vector<1x8x256xf32>
    %375 = arith.mulf %370, %374 : vector<1x8x256xf32>
    %376 = arith.addf %369, %375 : vector<1x8x256xf32>
    %377 = vector.extract_strided_slice %260 {offsets = [0, 0, 112], sizes = [1, 8, 256], strides = [1, 1, 1]} : vector<1x8x512xf32> to vector<1x8x256xf32>
    %378 = vector.extract_strided_slice %258 {offsets = [0, 17, 0], sizes = [1, 1, 256], strides = [1, 1, 1]} : vector<1x49x256xf32> to vector<1x1x256xf32>
    %379 = vector.broadcast %378 : vector<1x1x256xf32> to vector<1x8x256xf32>
    %380 = arith.mulf %377, %379 : vector<1x8x256xf32>
    %381 = arith.addf %376, %380 : vector<1x8x256xf32>
    %382 = vector.extract_strided_slice %260 {offsets = [0, 0, 113], sizes = [1, 8, 256], strides = [1, 1, 1]} : vector<1x8x512xf32> to vector<1x8x256xf32>
    %383 = vector.extract_strided_slice %258 {offsets = [0, 18, 0], sizes = [1, 1, 256], strides = [1, 1, 1]} : vector<1x49x256xf32> to vector<1x1x256xf32>
    %cst_108 = arith.constant 0.000000e+00 : f32
    %384 = vector.broadcast %cst_108 : f32 to vector<1x1x256xf32>
    %385 = arith.select %35, %383, %384 : vector<1x1x256xi1>, vector<1x1x256xf32>
    %386 = vector.broadcast %385 : vector<1x1x256xf32> to vector<1x8x256xf32>
    %387 = arith.mulf %382, %386 : vector<1x8x256xf32>
    %388 = arith.addf %381, %387 : vector<1x8x256xf32>
    %389 = vector.extract_strided_slice %260 {offsets = [0, 0, 114], sizes = [1, 8, 256], strides = [1, 1, 1]} : vector<1x8x512xf32> to vector<1x8x256xf32>
    %390 = vector.extract_strided_slice %258 {offsets = [0, 19, 0], sizes = [1, 1, 256], strides = [1, 1, 1]} : vector<1x49x256xf32> to vector<1x1x256xf32>
    %cst_109 = arith.constant 0.000000e+00 : f32
    %391 = vector.broadcast %cst_109 : f32 to vector<1x1x256xf32>
    %392 = arith.select %42, %390, %391 : vector<1x1x256xi1>, vector<1x1x256xf32>
    %393 = vector.broadcast %392 : vector<1x1x256xf32> to vector<1x8x256xf32>
    %394 = arith.mulf %389, %393 : vector<1x8x256xf32>
    %395 = arith.addf %388, %394 : vector<1x8x256xf32>
    %396 = vector.extract_strided_slice %260 {offsets = [0, 0, 115], sizes = [1, 8, 256], strides = [1, 1, 1]} : vector<1x8x512xf32> to vector<1x8x256xf32>
    %397 = vector.extract_strided_slice %258 {offsets = [0, 20, 0], sizes = [1, 1, 256], strides = [1, 1, 1]} : vector<1x49x256xf32> to vector<1x1x256xf32>
    %cst_110 = arith.constant 0.000000e+00 : f32
    %398 = vector.broadcast %cst_110 : f32 to vector<1x1x256xf32>
    %399 = arith.select %49, %397, %398 : vector<1x1x256xi1>, vector<1x1x256xf32>
    %400 = vector.broadcast %399 : vector<1x1x256xf32> to vector<1x8x256xf32>
    %401 = arith.mulf %396, %400 : vector<1x8x256xf32>
    %402 = arith.addf %395, %401 : vector<1x8x256xf32>
    %403 = vector.extract_strided_slice %260 {offsets = [0, 0, 125], sizes = [1, 8, 256], strides = [1, 1, 1]} : vector<1x8x512xf32> to vector<1x8x256xf32>
    %404 = vector.extract_strided_slice %258 {offsets = [0, 21, 0], sizes = [1, 1, 256], strides = [1, 1, 1]} : vector<1x49x256xf32> to vector<1x1x256xf32>
    %cst_111 = arith.constant 0.000000e+00 : f32
    %405 = vector.broadcast %cst_111 : f32 to vector<1x1x256xf32>
    %406 = arith.select %14, %404, %405 : vector<1x1x256xi1>, vector<1x1x256xf32>
    %407 = vector.broadcast %406 : vector<1x1x256xf32> to vector<1x8x256xf32>
    %408 = arith.mulf %403, %407 : vector<1x8x256xf32>
    %409 = arith.addf %402, %408 : vector<1x8x256xf32>
    %410 = vector.extract_strided_slice %260 {offsets = [0, 0, 126], sizes = [1, 8, 256], strides = [1, 1, 1]} : vector<1x8x512xf32> to vector<1x8x256xf32>
    %411 = vector.extract_strided_slice %258 {offsets = [0, 22, 0], sizes = [1, 1, 256], strides = [1, 1, 1]} : vector<1x49x256xf32> to vector<1x1x256xf32>
    %cst_112 = arith.constant 0.000000e+00 : f32
    %412 = vector.broadcast %cst_112 : f32 to vector<1x1x256xf32>
    %413 = arith.select %21, %411, %412 : vector<1x1x256xi1>, vector<1x1x256xf32>
    %414 = vector.broadcast %413 : vector<1x1x256xf32> to vector<1x8x256xf32>
    %415 = arith.mulf %410, %414 : vector<1x8x256xf32>
    %416 = arith.addf %409, %415 : vector<1x8x256xf32>
    %417 = vector.extract_strided_slice %260 {offsets = [0, 0, 127], sizes = [1, 8, 256], strides = [1, 1, 1]} : vector<1x8x512xf32> to vector<1x8x256xf32>
    %418 = vector.extract_strided_slice %258 {offsets = [0, 23, 0], sizes = [1, 1, 256], strides = [1, 1, 1]} : vector<1x49x256xf32> to vector<1x1x256xf32>
    %cst_113 = arith.constant 0.000000e+00 : f32
    %419 = vector.broadcast %cst_113 : f32 to vector<1x1x256xf32>
    %420 = arith.select %28, %418, %419 : vector<1x1x256xi1>, vector<1x1x256xf32>
    %421 = vector.broadcast %420 : vector<1x1x256xf32> to vector<1x8x256xf32>
    %422 = arith.mulf %417, %421 : vector<1x8x256xf32>
    %423 = arith.addf %416, %422 : vector<1x8x256xf32>
    %424 = vector.extract_strided_slice %260 {offsets = [0, 0, 128], sizes = [1, 8, 256], strides = [1, 1, 1]} : vector<1x8x512xf32> to vector<1x8x256xf32>
    %425 = vector.extract_strided_slice %258 {offsets = [0, 24, 0], sizes = [1, 1, 256], strides = [1, 1, 1]} : vector<1x49x256xf32> to vector<1x1x256xf32>
    %426 = vector.broadcast %425 : vector<1x1x256xf32> to vector<1x8x256xf32>
    %427 = arith.mulf %424, %426 : vector<1x8x256xf32>
    %428 = arith.addf %423, %427 : vector<1x8x256xf32>
    %429 = vector.extract_strided_slice %260 {offsets = [0, 0, 129], sizes = [1, 8, 256], strides = [1, 1, 1]} : vector<1x8x512xf32> to vector<1x8x256xf32>
    %430 = vector.extract_strided_slice %258 {offsets = [0, 25, 0], sizes = [1, 1, 256], strides = [1, 1, 1]} : vector<1x49x256xf32> to vector<1x1x256xf32>
    %cst_114 = arith.constant 0.000000e+00 : f32
    %431 = vector.broadcast %cst_114 : f32 to vector<1x1x256xf32>
    %432 = arith.select %35, %430, %431 : vector<1x1x256xi1>, vector<1x1x256xf32>
    %433 = vector.broadcast %432 : vector<1x1x256xf32> to vector<1x8x256xf32>
    %434 = arith.mulf %429, %433 : vector<1x8x256xf32>
    %435 = arith.addf %428, %434 : vector<1x8x256xf32>
    %436 = vector.extract_strided_slice %260 {offsets = [0, 0, 130], sizes = [1, 8, 256], strides = [1, 1, 1]} : vector<1x8x512xf32> to vector<1x8x256xf32>
    %437 = vector.extract_strided_slice %258 {offsets = [0, 26, 0], sizes = [1, 1, 256], strides = [1, 1, 1]} : vector<1x49x256xf32> to vector<1x1x256xf32>
    %cst_115 = arith.constant 0.000000e+00 : f32
    %438 = vector.broadcast %cst_115 : f32 to vector<1x1x256xf32>
    %439 = arith.select %42, %437, %438 : vector<1x1x256xi1>, vector<1x1x256xf32>
    %440 = vector.broadcast %439 : vector<1x1x256xf32> to vector<1x8x256xf32>
    %441 = arith.mulf %436, %440 : vector<1x8x256xf32>
    %442 = arith.addf %435, %441 : vector<1x8x256xf32>
    %443 = vector.extract_strided_slice %260 {offsets = [0, 0, 131], sizes = [1, 8, 256], strides = [1, 1, 1]} : vector<1x8x512xf32> to vector<1x8x256xf32>
    %444 = vector.extract_strided_slice %258 {offsets = [0, 27, 0], sizes = [1, 1, 256], strides = [1, 1, 1]} : vector<1x49x256xf32> to vector<1x1x256xf32>
    %cst_116 = arith.constant 0.000000e+00 : f32
    %445 = vector.broadcast %cst_116 : f32 to vector<1x1x256xf32>
    %446 = arith.select %49, %444, %445 : vector<1x1x256xi1>, vector<1x1x256xf32>
    %447 = vector.broadcast %446 : vector<1x1x256xf32> to vector<1x8x256xf32>
    %448 = arith.mulf %443, %447 : vector<1x8x256xf32>
    %449 = arith.addf %442, %448 : vector<1x8x256xf32>
    %450 = vector.extract_strided_slice %260 {offsets = [0, 0, 141], sizes = [1, 8, 256], strides = [1, 1, 1]} : vector<1x8x512xf32> to vector<1x8x256xf32>
    %451 = vector.extract_strided_slice %258 {offsets = [0, 28, 0], sizes = [1, 1, 256], strides = [1, 1, 1]} : vector<1x49x256xf32> to vector<1x1x256xf32>
    %cst_117 = arith.constant 0.000000e+00 : f32
    %452 = vector.broadcast %cst_117 : f32 to vector<1x1x256xf32>
    %453 = arith.select %14, %451, %452 : vector<1x1x256xi1>, vector<1x1x256xf32>
    %454 = vector.broadcast %453 : vector<1x1x256xf32> to vector<1x8x256xf32>
    %455 = arith.mulf %450, %454 : vector<1x8x256xf32>
    %456 = arith.addf %449, %455 : vector<1x8x256xf32>
    %457 = vector.extract_strided_slice %260 {offsets = [0, 0, 142], sizes = [1, 8, 256], strides = [1, 1, 1]} : vector<1x8x512xf32> to vector<1x8x256xf32>
    %458 = vector.extract_strided_slice %258 {offsets = [0, 29, 0], sizes = [1, 1, 256], strides = [1, 1, 1]} : vector<1x49x256xf32> to vector<1x1x256xf32>
    %cst_118 = arith.constant 0.000000e+00 : f32
    %459 = vector.broadcast %cst_118 : f32 to vector<1x1x256xf32>
    %460 = arith.select %21, %458, %459 : vector<1x1x256xi1>, vector<1x1x256xf32>
    %461 = vector.broadcast %460 : vector<1x1x256xf32> to vector<1x8x256xf32>
    %462 = arith.mulf %457, %461 : vector<1x8x256xf32>
    %463 = arith.addf %456, %462 : vector<1x8x256xf32>
    %464 = vector.extract_strided_slice %260 {offsets = [0, 0, 143], sizes = [1, 8, 256], strides = [1, 1, 1]} : vector<1x8x512xf32> to vector<1x8x256xf32>
    %465 = vector.extract_strided_slice %258 {offsets = [0, 30, 0], sizes = [1, 1, 256], strides = [1, 1, 1]} : vector<1x49x256xf32> to vector<1x1x256xf32>
    %cst_119 = arith.constant 0.000000e+00 : f32
    %466 = vector.broadcast %cst_119 : f32 to vector<1x1x256xf32>
    %467 = arith.select %28, %465, %466 : vector<1x1x256xi1>, vector<1x1x256xf32>
    %468 = vector.broadcast %467 : vector<1x1x256xf32> to vector<1x8x256xf32>
    %469 = arith.mulf %464, %468 : vector<1x8x256xf32>
    %470 = arith.addf %463, %469 : vector<1x8x256xf32>
    %471 = vector.extract_strided_slice %260 {offsets = [0, 0, 144], sizes = [1, 8, 256], strides = [1, 1, 1]} : vector<1x8x512xf32> to vector<1x8x256xf32>
    %472 = vector.extract_strided_slice %258 {offsets = [0, 31, 0], sizes = [1, 1, 256], strides = [1, 1, 1]} : vector<1x49x256xf32> to vector<1x1x256xf32>
    %473 = vector.broadcast %472 : vector<1x1x256xf32> to vector<1x8x256xf32>
    %474 = arith.mulf %471, %473 : vector<1x8x256xf32>
    %475 = arith.addf %470, %474 : vector<1x8x256xf32>
    %476 = vector.extract_strided_slice %260 {offsets = [0, 0, 145], sizes = [1, 8, 256], strides = [1, 1, 1]} : vector<1x8x512xf32> to vector<1x8x256xf32>
    %477 = vector.extract_strided_slice %258 {offsets = [0, 32, 0], sizes = [1, 1, 256], strides = [1, 1, 1]} : vector<1x49x256xf32> to vector<1x1x256xf32>
    %cst_120 = arith.constant 0.000000e+00 : f32
    %478 = vector.broadcast %cst_120 : f32 to vector<1x1x256xf32>
    %479 = arith.select %35, %477, %478 : vector<1x1x256xi1>, vector<1x1x256xf32>
    %480 = vector.broadcast %479 : vector<1x1x256xf32> to vector<1x8x256xf32>
    %481 = arith.mulf %476, %480 : vector<1x8x256xf32>
    %482 = arith.addf %475, %481 : vector<1x8x256xf32>
    %483 = vector.extract_strided_slice %260 {offsets = [0, 0, 146], sizes = [1, 8, 256], strides = [1, 1, 1]} : vector<1x8x512xf32> to vector<1x8x256xf32>
    %484 = vector.extract_strided_slice %258 {offsets = [0, 33, 0], sizes = [1, 1, 256], strides = [1, 1, 1]} : vector<1x49x256xf32> to vector<1x1x256xf32>
    %cst_121 = arith.constant 0.000000e+00 : f32
    %485 = vector.broadcast %cst_121 : f32 to vector<1x1x256xf32>
    %486 = arith.select %42, %484, %485 : vector<1x1x256xi1>, vector<1x1x256xf32>
    %487 = vector.broadcast %486 : vector<1x1x256xf32> to vector<1x8x256xf32>
    %488 = arith.mulf %483, %487 : vector<1x8x256xf32>
    %489 = arith.addf %482, %488 : vector<1x8x256xf32>
    %490 = vector.extract_strided_slice %260 {offsets = [0, 0, 147], sizes = [1, 8, 256], strides = [1, 1, 1]} : vector<1x8x512xf32> to vector<1x8x256xf32>
    %491 = vector.extract_strided_slice %258 {offsets = [0, 34, 0], sizes = [1, 1, 256], strides = [1, 1, 1]} : vector<1x49x256xf32> to vector<1x1x256xf32>
    %cst_122 = arith.constant 0.000000e+00 : f32
    %492 = vector.broadcast %cst_122 : f32 to vector<1x1x256xf32>
    %493 = arith.select %49, %491, %492 : vector<1x1x256xi1>, vector<1x1x256xf32>
    %494 = vector.broadcast %493 : vector<1x1x256xf32> to vector<1x8x256xf32>
    %495 = arith.mulf %490, %494 : vector<1x8x256xf32>
    %496 = arith.addf %489, %495 : vector<1x8x256xf32>
    %497 = vector.extract_strided_slice %260 {offsets = [0, 0, 157], sizes = [1, 8, 256], strides = [1, 1, 1]} : vector<1x8x512xf32> to vector<1x8x256xf32>
    %498 = vector.extract_strided_slice %258 {offsets = [0, 35, 0], sizes = [1, 1, 256], strides = [1, 1, 1]} : vector<1x49x256xf32> to vector<1x1x256xf32>
    %cst_123 = arith.constant 0.000000e+00 : f32
    %499 = vector.broadcast %cst_123 : f32 to vector<1x1x256xf32>
    %500 = arith.select %14, %498, %499 : vector<1x1x256xi1>, vector<1x1x256xf32>
    %501 = vector.broadcast %500 : vector<1x1x256xf32> to vector<1x8x256xf32>
    %502 = arith.mulf %497, %501 : vector<1x8x256xf32>
    %503 = arith.addf %496, %502 : vector<1x8x256xf32>
    %504 = vector.extract_strided_slice %260 {offsets = [0, 0, 158], sizes = [1, 8, 256], strides = [1, 1, 1]} : vector<1x8x512xf32> to vector<1x8x256xf32>
    %505 = vector.extract_strided_slice %258 {offsets = [0, 36, 0], sizes = [1, 1, 256], strides = [1, 1, 1]} : vector<1x49x256xf32> to vector<1x1x256xf32>
    %cst_124 = arith.constant 0.000000e+00 : f32
    %506 = vector.broadcast %cst_124 : f32 to vector<1x1x256xf32>
    %507 = arith.select %21, %505, %506 : vector<1x1x256xi1>, vector<1x1x256xf32>
    %508 = vector.broadcast %507 : vector<1x1x256xf32> to vector<1x8x256xf32>
    %509 = arith.mulf %504, %508 : vector<1x8x256xf32>
    %510 = arith.addf %503, %509 : vector<1x8x256xf32>
    %511 = vector.extract_strided_slice %260 {offsets = [0, 0, 159], sizes = [1, 8, 256], strides = [1, 1, 1]} : vector<1x8x512xf32> to vector<1x8x256xf32>
    %512 = vector.extract_strided_slice %258 {offsets = [0, 37, 0], sizes = [1, 1, 256], strides = [1, 1, 1]} : vector<1x49x256xf32> to vector<1x1x256xf32>
    %cst_125 = arith.constant 0.000000e+00 : f32
    %513 = vector.broadcast %cst_125 : f32 to vector<1x1x256xf32>
    %514 = arith.select %28, %512, %513 : vector<1x1x256xi1>, vector<1x1x256xf32>
    %515 = vector.broadcast %514 : vector<1x1x256xf32> to vector<1x8x256xf32>
    %516 = arith.mulf %511, %515 : vector<1x8x256xf32>
    %517 = arith.addf %510, %516 : vector<1x8x256xf32>
    %518 = vector.extract_strided_slice %260 {offsets = [0, 0, 160], sizes = [1, 8, 256], strides = [1, 1, 1]} : vector<1x8x512xf32> to vector<1x8x256xf32>
    %519 = vector.extract_strided_slice %258 {offsets = [0, 38, 0], sizes = [1, 1, 256], strides = [1, 1, 1]} : vector<1x49x256xf32> to vector<1x1x256xf32>
    %520 = vector.broadcast %519 : vector<1x1x256xf32> to vector<1x8x256xf32>
    %521 = arith.mulf %518, %520 : vector<1x8x256xf32>
    %522 = arith.addf %517, %521 : vector<1x8x256xf32>
    %523 = vector.extract_strided_slice %260 {offsets = [0, 0, 161], sizes = [1, 8, 256], strides = [1, 1, 1]} : vector<1x8x512xf32> to vector<1x8x256xf32>
    %524 = vector.extract_strided_slice %258 {offsets = [0, 39, 0], sizes = [1, 1, 256], strides = [1, 1, 1]} : vector<1x49x256xf32> to vector<1x1x256xf32>
    %cst_126 = arith.constant 0.000000e+00 : f32
    %525 = vector.broadcast %cst_126 : f32 to vector<1x1x256xf32>
    %526 = arith.select %35, %524, %525 : vector<1x1x256xi1>, vector<1x1x256xf32>
    %527 = vector.broadcast %526 : vector<1x1x256xf32> to vector<1x8x256xf32>
    %528 = arith.mulf %523, %527 : vector<1x8x256xf32>
    %529 = arith.addf %522, %528 : vector<1x8x256xf32>
    %530 = vector.extract_strided_slice %260 {offsets = [0, 0, 162], sizes = [1, 8, 256], strides = [1, 1, 1]} : vector<1x8x512xf32> to vector<1x8x256xf32>
    %531 = vector.extract_strided_slice %258 {offsets = [0, 40, 0], sizes = [1, 1, 256], strides = [1, 1, 1]} : vector<1x49x256xf32> to vector<1x1x256xf32>
    %cst_127 = arith.constant 0.000000e+00 : f32
    %532 = vector.broadcast %cst_127 : f32 to vector<1x1x256xf32>
    %533 = arith.select %42, %531, %532 : vector<1x1x256xi1>, vector<1x1x256xf32>
    %534 = vector.broadcast %533 : vector<1x1x256xf32> to vector<1x8x256xf32>
    %535 = arith.mulf %530, %534 : vector<1x8x256xf32>
    %536 = arith.addf %529, %535 : vector<1x8x256xf32>
    %537 = vector.extract_strided_slice %260 {offsets = [0, 0, 163], sizes = [1, 8, 256], strides = [1, 1, 1]} : vector<1x8x512xf32> to vector<1x8x256xf32>
    %538 = vector.extract_strided_slice %258 {offsets = [0, 41, 0], sizes = [1, 1, 256], strides = [1, 1, 1]} : vector<1x49x256xf32> to vector<1x1x256xf32>
    %cst_128 = arith.constant 0.000000e+00 : f32
    %539 = vector.broadcast %cst_128 : f32 to vector<1x1x256xf32>
    %540 = arith.select %49, %538, %539 : vector<1x1x256xi1>, vector<1x1x256xf32>
    %541 = vector.broadcast %540 : vector<1x1x256xf32> to vector<1x8x256xf32>
    %542 = arith.mulf %537, %541 : vector<1x8x256xf32>
    %543 = arith.addf %536, %542 : vector<1x8x256xf32>
    %544 = vector.extract_strided_slice %260 {offsets = [0, 0, 173], sizes = [1, 8, 256], strides = [1, 1, 1]} : vector<1x8x512xf32> to vector<1x8x256xf32>
    %545 = vector.extract_strided_slice %258 {offsets = [0, 42, 0], sizes = [1, 1, 256], strides = [1, 1, 1]} : vector<1x49x256xf32> to vector<1x1x256xf32>
    %cst_129 = arith.constant 0.000000e+00 : f32
    %546 = vector.broadcast %cst_129 : f32 to vector<1x1x256xf32>
    %547 = arith.select %14, %545, %546 : vector<1x1x256xi1>, vector<1x1x256xf32>
    %548 = vector.broadcast %547 : vector<1x1x256xf32> to vector<1x8x256xf32>
    %549 = arith.mulf %544, %548 : vector<1x8x256xf32>
    %550 = arith.addf %543, %549 : vector<1x8x256xf32>
    %551 = vector.extract_strided_slice %260 {offsets = [0, 0, 174], sizes = [1, 8, 256], strides = [1, 1, 1]} : vector<1x8x512xf32> to vector<1x8x256xf32>
    %552 = vector.extract_strided_slice %258 {offsets = [0, 43, 0], sizes = [1, 1, 256], strides = [1, 1, 1]} : vector<1x49x256xf32> to vector<1x1x256xf32>
    %cst_130 = arith.constant 0.000000e+00 : f32
    %553 = vector.broadcast %cst_130 : f32 to vector<1x1x256xf32>
    %554 = arith.select %21, %552, %553 : vector<1x1x256xi1>, vector<1x1x256xf32>
    %555 = vector.broadcast %554 : vector<1x1x256xf32> to vector<1x8x256xf32>
    %556 = arith.mulf %551, %555 : vector<1x8x256xf32>
    %557 = arith.addf %550, %556 : vector<1x8x256xf32>
    %558 = vector.extract_strided_slice %260 {offsets = [0, 0, 175], sizes = [1, 8, 256], strides = [1, 1, 1]} : vector<1x8x512xf32> to vector<1x8x256xf32>
    %559 = vector.extract_strided_slice %258 {offsets = [0, 44, 0], sizes = [1, 1, 256], strides = [1, 1, 1]} : vector<1x49x256xf32> to vector<1x1x256xf32>
    %cst_131 = arith.constant 0.000000e+00 : f32
    %560 = vector.broadcast %cst_131 : f32 to vector<1x1x256xf32>
    %561 = arith.select %28, %559, %560 : vector<1x1x256xi1>, vector<1x1x256xf32>
    %562 = vector.broadcast %561 : vector<1x1x256xf32> to vector<1x8x256xf32>
    %563 = arith.mulf %558, %562 : vector<1x8x256xf32>
    %564 = arith.addf %557, %563 : vector<1x8x256xf32>
    %565 = vector.extract_strided_slice %260 {offsets = [0, 0, 176], sizes = [1, 8, 256], strides = [1, 1, 1]} : vector<1x8x512xf32> to vector<1x8x256xf32>
    %566 = vector.extract_strided_slice %258 {offsets = [0, 45, 0], sizes = [1, 1, 256], strides = [1, 1, 1]} : vector<1x49x256xf32> to vector<1x1x256xf32>
    %567 = vector.broadcast %566 : vector<1x1x256xf32> to vector<1x8x256xf32>
    %568 = arith.mulf %565, %567 : vector<1x8x256xf32>
    %569 = arith.addf %564, %568 : vector<1x8x256xf32>
    %570 = vector.extract_strided_slice %260 {offsets = [0, 0, 177], sizes = [1, 8, 256], strides = [1, 1, 1]} : vector<1x8x512xf32> to vector<1x8x256xf32>
    %571 = vector.extract_strided_slice %258 {offsets = [0, 46, 0], sizes = [1, 1, 256], strides = [1, 1, 1]} : vector<1x49x256xf32> to vector<1x1x256xf32>
    %cst_132 = arith.constant 0.000000e+00 : f32
    %572 = vector.broadcast %cst_132 : f32 to vector<1x1x256xf32>
    %573 = arith.select %35, %571, %572 : vector<1x1x256xi1>, vector<1x1x256xf32>
    %574 = vector.broadcast %573 : vector<1x1x256xf32> to vector<1x8x256xf32>
    %575 = arith.mulf %570, %574 : vector<1x8x256xf32>
    %576 = arith.addf %569, %575 : vector<1x8x256xf32>
    %577 = vector.extract_strided_slice %260 {offsets = [0, 0, 178], sizes = [1, 8, 256], strides = [1, 1, 1]} : vector<1x8x512xf32> to vector<1x8x256xf32>
    %578 = vector.extract_strided_slice %258 {offsets = [0, 47, 0], sizes = [1, 1, 256], strides = [1, 1, 1]} : vector<1x49x256xf32> to vector<1x1x256xf32>
    %cst_133 = arith.constant 0.000000e+00 : f32
    %579 = vector.broadcast %cst_133 : f32 to vector<1x1x256xf32>
    %580 = arith.select %42, %578, %579 : vector<1x1x256xi1>, vector<1x1x256xf32>
    %581 = vector.broadcast %580 : vector<1x1x256xf32> to vector<1x8x256xf32>
    %582 = arith.mulf %577, %581 : vector<1x8x256xf32>
    %583 = arith.addf %576, %582 : vector<1x8x256xf32>
    %584 = vector.extract_strided_slice %260 {offsets = [0, 0, 179], sizes = [1, 8, 256], strides = [1, 1, 1]} : vector<1x8x512xf32> to vector<1x8x256xf32>
    %585 = vector.extract_strided_slice %258 {offsets = [0, 48, 0], sizes = [1, 1, 256], strides = [1, 1, 1]} : vector<1x49x256xf32> to vector<1x1x256xf32>
    %cst_134 = arith.constant 0.000000e+00 : f32
    %586 = vector.broadcast %cst_134 : f32 to vector<1x1x256xf32>
    %587 = arith.select %49, %585, %586 : vector<1x1x256xi1>, vector<1x1x256xf32>
    %588 = vector.broadcast %587 : vector<1x1x256xf32> to vector<1x8x256xf32>
    %589 = arith.mulf %584, %588 : vector<1x8x256xf32>
    %590 = arith.addf %583, %589 : vector<1x8x256xf32>
    %591 = arith.addf %50, %590 : vector<1x8x256xf32>
    %c0_135 = arith.constant 0 : index
    %c0_136 = arith.constant 0 : index
    %c0_137 = arith.constant 0 : index
    %592 = vector.load %arg15[%c0_135, %c0_136, %c0_137] : memref<1x8x256xf32, #tpu.memory_space<vmem>>, vector<1x8x256xf32>
    tpu.vector_store %arg15[%c0_135, %c0_136, %c0_137], %591 {strides = array<i32>} : memref<1x8x256xf32, #tpu.memory_space<vmem>>, vector<1x8x256xf32>,
    return
  }
  func.func @transform_0(%arg0: i32) -> (i32, i32, i32) {
    %c0_i32 = arith.constant 0 : i32
    %c0_i32_0 = arith.constant 0 : i32
    %c0_i32_1 = arith.constant 0 : i32
    return %arg0, %c0_i32, %c0_i32_0 : i32, i32, i32
  }
  func.func @transform_1(%arg0: i32) -> (i32, i32, i32) {
    %c0_i32 = arith.constant 0 : i32
    %c0_i32_0 = arith.constant 0 : i32
    %c0_i32_1 = arith.constant 0 : i32
    return %arg0, %c0_i32, %c0_i32_0 : i32, i32, i32
  }
  func.func @transform_2(%arg0: i32) -> (i32, i32) {
    %c0_i32 = arith.constant 0 : i32
    %c0_i32_0 = arith.constant 0 : i32
    %c0_i32_1 = arith.constant 0 : i32
    return %c0_i32, %c0_i32_0 : i32, i32
  }
  func.func @transform_3(%arg0: i32) -> (i32, i32) {
    %c0_i32 = arith.constant 0 : i32
    %c0_i32_0 = arith.constant 0 : i32
    %c0_i32_1 = arith.constant 0 : i32
    return %c0_i32, %c0_i32_0 : i32, i32
  }
  func.func @transform_4(%arg0: i32) -> (i32, i32) {
    %c0_i32 = arith.constant 0 : i32
    %c0_i32_0 = arith.constant 0 : i32
    %c0_i32_1 = arith.constant 0 : i32
    return %c0_i32, %c0_i32_0 : i32, i32
  }
  func.func @transform_5(%arg0: i32) -> (i32, i32) {
    %c0_i32 = arith.constant 0 : i32
    %c0_i32_0 = arith.constant 0 : i32
    %c0_i32_1 = arith.constant 0 : i32
    return %c0_i32, %c0_i32_0 : i32, i32
  }
  func.func @transform_6(%arg0: i32) -> (i32, i32) {
    %c0_i32 = arith.constant 0 : i32
    %c0_i32_0 = arith.constant 0 : i32
    %c0_i32_1 = arith.constant 0 : i32
    return %c0_i32, %c0_i32_0 : i32, i32
  }
  func.func @transform_7(%arg0: i32) -> (i32, i32) {
    %c0_i32 = arith.constant 0 : i32
    %c0_i32_0 = arith.constant 0 : i32
    %c0_i32_1 = arith.constant 0 : i32
    return %c0_i32, %c0_i32_0 : i32, i32
  }
  func.func @transform_8(%arg0: i32) -> (i32, i32) {
    %c0_i32 = arith.constant 0 : i32
    %c0_i32_0 = arith.constant 0 : i32
    %c0_i32_1 = arith.constant 0 : i32
    return %c0_i32, %c0_i32_0 : i32, i32
  }
  func.func @transform_9(%arg0: i32) -> (i32, i32) {
    %c0_i32 = arith.constant 0 : i32
    %c0_i32_0 = arith.constant 0 : i32
    %c0_i32_1 = arith.constant 0 : i32
    return %c0_i32, %c0_i32_0 : i32, i32
  }
  func.func @transform_10(%arg0: i32) -> (i32, i32) {
    %c0_i32 = arith.constant 0 : i32
    %c0_i32_0 = arith.constant 0 : i32
    %c0_i32_1 = arith.constant 0 : i32
    return %c0_i32, %c0_i32_0 : i32, i32
  }
  func.func @transform_11(%arg0: i32) -> (i32, i32) {
    %c0_i32 = arith.constant 0 : i32
    %c0_i32_0 = arith.constant 0 : i32
    %c0_i32_1 = arith.constant 0 : i32
    return %c0_i32, %c0_i32_0 : i32, i32
  }
  func.func @transform_12(%arg0: i32) -> (i32, i32) {
    %c0_i32 = arith.constant 0 : i32
    %c0_i32_0 = arith.constant 0 : i32
    %c0_i32_1 = arith.constant 0 : i32
    return %c0_i32, %c0_i32_0 : i32, i32
  }
  func.func @transform_13(%arg0: i32) -> (i32, i32) {
    %c0_i32 = arith.constant 0 : i32
    %c0_i32_0 = arith.constant 0 : i32
    %c0_i32_1 = arith.constant 0 : i32
    return %c0_i32, %c0_i32_0 : i32, i32
  }
  func.func @transform_14(%arg0: i32) -> (i32, i32, i32) {
    %c0_i32 = arith.constant 0 : i32
    %c0_i32_0 = arith.constant 0 : i32
    %c0_i32_1 = arith.constant 0 : i32
    return %arg0, %c0_i32, %c0_i32_0 : i32, i32, i32
  }
}

</mosaic_0001>

<bundles_post_ra>
// kernel: tpu_custom_call.1
= control target key start
LH: loop header
LB: loop body
LE: loop exit
PB: predicated region body
PF: predicated region fallthrough
CT: control target
= control target key end

     0   :  { %s5528_s0 = inlined_call_operand.vmem [shape: f32[2,8,256], index: 0, kind: input, shape index: {}]   ;;  %s5529_s1 = inlined_call_operand.vmem [shape: f32[2,8,256], index: 1, kind: input, shape index: {}]   ;;  %s5530_s2 = inlined_call_operand.vmem [shape: f32[8,72], index: 2, kind: input, shape index: {}]   ;;  %s5531_s3 = inlined_call_operand.vmem [shape: f32[8,1], index: 3, kind: input, shape index: {}]   ;;  %s5532_s4 = inlined_call_operand.vmem [shape: f32[8,72], index: 4, kind: input, shape index: {}]   ;;  %s5533_s5 = inlined_call_operand.vmem [shape: f32[8,1], index: 5, kind: input, shape index: {}]   ;;  %s5534_s6 = inlined_call_operand.vmem [shape: f32[8,72], index: 6, kind: input, shape index: {}]   ;;  %s5535_s7 = inlined_call_operand.vmem [shape: f32[8,1], index: 7, kind: input, shape index: {}]   ;;  %s5536_s8 = inlined_call_operand.vmem [shape: f32[8,72], index: 8, kind: input, shape index: {}]   ;;  %s5537_s9 = inlined_call_operand.vmem [shape: f32[8,1], index: 9, kind: input, shape index: {}]   ;;  %s5538_s10 = inlined_call_operand.vmem [shape: f32[8,8], index: 10, kind: input, shape index: {}]   ;;  %s5539_s11 = inlined_call_operand.vmem [shape: f32[8,1], index: 11, kind: input, shape index: {}]   ;;  %s5540_s12 = inlined_call_operand.vmem [shape: f32[49,8], index: 12, kind: input, shape index: {}]   ;;  %s5541_s13 = inlined_call_operand.vmem [shape: f32[49,1], index: 13, kind: input, shape index: {}]   ;;  %s5542_s14 = inlined_call_operand.hbm [shape: f32[2,8,256], index: 14, kind: output, shape index: {}]  }
   0x1   :  { %5643 = sst [smem:[#allocation26_spill]] %s5528_s0 }
   0x2   :  { %5644 = sst [smem:[#allocation27_spill]] %s5529_s1 }
   0x3   :  { %5645 = sst [smem:[#allocation28_spill]] %s5531_s3 }
   0x4   :  { %19 = vsyncpa [#allocation3], 0 }
   0x5   :  { %21 = vsyncpa [#allocation3 + $0x1], 0  ;;  %s3636_s29 = smov 0   ;;  %s3638_s30 = smov 0  }
   0x6   :  { %s3640_s15 = smov 0   ;;  %s3642_s16 = smov 0  }
   0x7 LB: > { %5646 = sst [smem:[#allocation5_spill]] %s3478_s15  ;;  %s3657_s17 = sadd.s32 4294967295, %s3482_s16   ;;  %s3482_s16 = sphi %s3642_s16, %s5797_s16   ;;  %s3478_s15 = sphi %s3640_s15, %s5799_s15   ;;  %s3474_s30 = sphi %s3638_s30, %s5801_s30   ;;  %s3470_s29 = sphi %s3636_s29, %s5800_s29  }
   0x8   : > { %s3164_s18 = sadd.s32 4294967294, %s3482_s16   ;;  %s3661_s19 = sadd.s32 1, %s3482_s16  }
   0x9   : > { %5647 = sst [smem:[#allocation6_spill]] %s3661_s19  ;;  %s338_s20 = sadd.s32 1, %s3478_s15 }
   0xa   : > { %s335_s21 = ssub.s32 %s3482_s16, %s3661_s19  ;;  %p348_p0 = scmp.ne.s32.totalorder %s3478_s15, %s3474_s30 }
   0xb   : > { %p336_p1 = scmp.eq.s32.totalorder %s335_s21, 0  ;;  %p349_p2 = scmp.eq.s32.totalorder %s3657_s17, 1 }
   0xc   : > { %p354_p3 = scmp.ne.s32.totalorder %s3474_s30, %s3470_s29  ;;  %p355_p4 = scmp.eq.s32.totalorder %s3164_s18, 1 }
   0xd   : > { %s3672_s22 = scalar_select %p336_p1, %s3478_s15, %s338_s20  }
   0xe   : > { %p3674_p5 = por %p349_p2, %p348_p0  ;;  %p3678_p6 = por %p355_p4, %p354_p3 }
   0xf   : > { %5648 = sst [smem:[#allocation7_spill]] %s3672_s22  ;;  %p3167_p7 = scmp.ge.s32.totalorder %s3482_s16, 1 }
  0x10   : > { %p425_p8 = scmp.lt.s32.totalorder %s3482_s16, 3 }
  0x12   : > { %p426_p9 = pnand %p3167_p7, %p425_p8 }
  0x14   : > { %429 = sbr.rel (%p426_p9) target bundleno = 1759 (0x6df), region = 76 }
  0x19   : > { %p476_p10 = scmp.lt.s32.totalorder %s3657_s17, 1  ;;  %v3484_v0 = vmov 0.0   ;;  %s5551_s25 = smov 17   ;;  %v3489_v3 = vmov 0   ;;  %vm5572_vm0 = vcmask 7168   ;;  %v3757_v9 = vld [vmem:[%s5541_s13] sm:$0xff]  ;;  %v486_v56 = vlaneseq }
  0x1a   : > { %565 = vrot.lane.b32.xlu0 %v3484_v0, %s5551_s25  ;;  %s5651_s0 = sld [smem:[#allocation26_spill]]  ;;  %s5543_s21 = smov 15   ;;  %3381 = vset.pattern.permute.xlu1 %v3489_v3  ;;  %v3762_v10 = vld [vmem:[%s5541_s13 + $0x8] sm:$0xff]  ;;  %v1164_v11 = vsel %vm5572_vm0, %v3757_v9, 0.0  ;;  %v3773_v13 = vld [vmem:[%s5541_s13 + $0x10] sm:$0xff]  ;;  %v801_v15 = vld [vmem:[%s5533_s5] sm:$0xff] }
  0x1b   : > { %s3687_s26 = scalar_select %p476_p10, %s3657_s17, 1  ;;  %3392 = vset.pattern.permute.xlu2 %v3489_v3  ;;  %3393 = vset.pattern.permute.xlu0 %v3489_v3  ;;  %v1165_v12 = vsel %vm5572_vm0, %v3762_v10, 0.0  ;;  %v1167_v16 = vsel %vm5572_vm0, %v3773_v13, 0.0  ;;  %v3783_v17 = vld [vmem:[%s5541_s13 + $0x18] sm:$0xff]  ;;  %v3794_v20 = vld [vmem:[%s5541_s13 + $0x20] sm:$0xff]  ;;  %v3801_v23 = vld [vmem:[%s5541_s13 + $0x28] sm:$0xff] }
  0x1c   : > { %s5545_s28 = smov 1   ;;  %s5547_s18 = smov 127   ;;  %v1166_v14 = vadd.f32 %v1165_v12, %v1164_v11  ;;  %v1169_v19 = vsel %vm5572_vm0, %v3783_v17, 0.0  ;;  %v1171_v22 = vsel %vm5572_vm0, %v3794_v20, 0.0  ;;  %v1173_v25 = vsel %vm5572_vm0, %v3801_v23, 0.0  ;;  %v931_v43 = vld [vmem:[%s5535_s7] sm:$0xff] }
  0x1d   : > { %s3250_s27 = sshll.u32 %s3687_s26, 4  ;;  %s5652_s1 = sld [smem:[#allocation27_spill]]  ;;  %v3814_v26 = vld [vmem:[%s5541_s13 + $0x30] sm:$0x1]  ;;  %vm1175_vm1 = vcmask 0   ;;  %v3494_v29 = vmov 49.0  }
  0x1e   : > { %s5653_s3 = sld [smem:[#allocation28_spill]]  ;;  %v1168_v18 = vadd.f32 %v1167_v16, %v1166_v14  ;;  %s5657_s26 = smov 127   ;;  %v1176_v28 = vsel %vm1175_vm1, %v3814_v26, 0.0  ;;  %3414 = vrcp.f32 %v3494_v29  ;;  %v3495_v45 = vmov 16.0   ;;  %v1061_v51 = vld [vmem:[%s5537_s9] sm:$0xff] }
  0x1f   : > { %s5659_s15 = smov 111   ;;  %s5661_s19 = smov 112   ;;  %3416 = vrcp.f32 %v3495_v45  ;;  %v487_v60 = vand.u32 127, %v486_v56  ;;  %vm5571_vm9 = vcmask 908288   ;;  %vm5573_vm10 = vcmask 916480  }
  0x20   : > { %s3695_s20 = scalar_lea.vmem %s5651_s0, %s3250_s27  ;;  %s5656_s0 = smov 1   ;;  %v1170_v21 = vadd.f32 %v1169_v19, %v1168_v18  ;;  %vm5567_vm14 = vcmask 924672   ;;  %vm5570_vm1 = vcmask 1039360  }
  0x21   : > { %v3698_v1 = vld [vmem:[%s3695_s20 + $0x8] sm:$0xff]  ;;  %v3701_v2 = vld [vmem:[%s3695_s20] sm:$0xff] }
  0x22   : > { %569 = vrot.lane.b32.xlu1 %v3698_v1, %s5551_s25  ;;  %584 = vrot.lane.b32.xlu2 %v3701_v2, %s5543_s21  ;;  %v3371_v4 = vpack.i.bf16 %v3701_v2, %v3484_v0  ;;  %v3376_v5 = vpack.i.bf16 %v3698_v1, %v3701_v2  ;;  %v1172_v24 = vadd.f32 %v1171_v22, %v1170_v21 }
  0x23   : > { %567 = vrot.lane.b32.xlu0 %v3701_v2, %s5551_s25  ;;  %s485_s22 = scalar_lea.vmem %s5652_s1, %s3250_s27  ;;  %s5658_s25 = smov 113  }
  0x24   : > { %v670_v6 = vld [vmem:[%s5653_s3] sm:$0xff]  ;;  %v3750_v8 = vld [vmem:[%s485_s22 + $0x8] sm:$0xff]  ;;  %v1174_v27 = vadd.f32 %v1173_v25, %v1172_v24  ;;  %v3415_v33 = vpop.eup %3414  ;;  %s5580_s1 = smov 80   ;;  %s5576_s3 = smov 78  }
  0x25   : > { %v3748_v7 = vld [vmem:[%s485_s22] sm:$0xff]  ;;  %s5660_s22 = smov 16   ;;  %v1150_v35 = vmul.f32 49.0, %v3415_v33  ;;  %vm1154_vm2 = vweird.f32 %v3415_v33  ;;  %v3417_v48 = vpop.eup %3416  ;;  %s5568_s27 = smov 77  }
  0x26   : > { %v1177_v30 = vadd.f32 %v1176_v28, %v1174_v27  ;;  %v3382_v31 = vpack.i.bf16 %v3750_v8, %v3748_v7  ;;  %v492_v53 = vmul.f32 16.0, %v3417_v48  ;;  %vm496_vm3 = vweird.f32 %v3417_v48 }
  0x27   : > { %v1151_v38 = vsub.f32 1.0, %v1150_v35 }
  0x28   : > { %v1178_v32 = vrot.slane %v1177_v30, 4  ;;  %v493_v57 = vsub.f32 1.0, %v492_v53 }
  0x29   : > { %v1152_v40 = vmul.f32 %v3415_v33, %v1151_v38 }
  0x2a   : > { %582 = vrot.lane.b32.xlu1 %v3484_v0, %s5543_s21  ;;  %586 = vrot.lane.b32.xlu2 %v3698_v1, %s5543_s21  ;;  %s5549_s21 = smov 113   ;;  %v1179_v34 = vadd.f32 %v1178_v32, %v1177_v30  ;;  %v494_v61 = vmul.f32 %v3417_v48, %v493_v57 }
  0x2b   : > { %595 = vrot.lane.b32.xlu0 %v3484_v0, %s5545_s28  ;;  %v1153_v44 = vadd.f32 %v3415_v33, %v1152_v40 }
  0x2c   : > { %v1180_v37 = vrot.slane %v1179_v34, 2  ;;  %v495_v3 = vadd.f32 %v3417_v48, %v494_v61 }
  0x2d   : > { %v3838_v47 = vsel %vm1154_vm2, %v3415_v33, %v1153_v44 }
  0x2e   : > { %v1181_v39 = vadd.f32 %v1180_v37, %v1179_v34  ;;  %v497_v11 = vsel %vm496_vm3, %v3417_v48, %v495_v3 }
  0x30   : > { %v1182_v42 = vrot.slane %v1181_v39, 1 }
  0x32   : > { %597 = vrot.lane.b32.xlu1 %v3701_v2, %s5545_s28  ;;  %599 = vrot.lane.b32.xlu2 %v3698_v1, %s5545_s28  ;;  %s5553_s28 = smov 111   ;;  %v1183_v46 = vadd.f32 %v1182_v42, %v1181_v39  ;;  %v5662_v42 = vmov 0 }
  0x33   : > { %608 = vrot.lane.b32.xlu0 %v3701_v2, %s5547_s18 }
  0x34   : > { %v3843_v50 = vmul.f32 %v1183_v46, %v3838_v47 }
  0x36   : > { %v1186_v54 = vsub.f32 %v3762_v10, %v3843_v50  ;;  %v1188_v63 = vsub.f32 %v3783_v17, %v3843_v50  ;;  %v489_v10 = vcvt.s32.f32 %v487_v60  ;;  %v1191_v14 = vsub.f32 %v3814_v26, %v3843_v50 }
  0x38   : > { %v1193_v59 = vadd.f32 0.020408163, %v1186_v54  ;;  %v1198_v21 = vadd.f32 0.020408163, %v1191_v14 }
  0x3a   : > { %610 = vrot.lane.b32.xlu1 %v3698_v1, %s5547_s18  ;;  %612 = vrot.lane.b32.xlu2 %v3484_v0, %s5547_s18  ;;  %s5556_s18 = smov 16  }
  0x3b   : > { %621 = vrot.lane.b32.xlu0 %v3701_v2, %s5549_s21 }
  0x42   : > { %623 = vrot.lane.b32.xlu1 %v3698_v1, %s5549_s21  ;;  %625 = vrot.lane.b32.xlu2 %v3484_v0, %s5549_s21  ;;  %s5560_s21 = smov 112  }
  0x43   : > { %634 = vrot.lane.b32.xlu0 %v3701_v2, %s5553_s28 }
  0x4a   : > { %636 = vrot.lane.b32.xlu1 %v3698_v1, %s5553_s28  ;;  %638 = vrot.lane.b32.xlu2 %v3484_v0, %s5553_s28  ;;  %s5655_s28 = smov 15  }
  0x4b   : > { %3372 = vrot.lane.b32.xlu0 %v3371_v4, %s5556_s18  ;;  %v488_v4 = vadd.s32 128, %v487_v60 }
  0x4d   : > { %v490_v12 = vcvt.s32.f32 %v488_v4  ;;  %v5670_v4 = vmov 0 }
  0x4f   : > { %v499_v17 = vmul.f32 %v497_v11, %v490_v12 }
  0x51   : > { %v501_v24 = vfloor.f32 %v499_v17 }
  0x52   : > { %651 = vrot.lane.b32.xlu1 %v3698_v1, %s5556_s18  ;;  %3377 = vrot.lane.b32.xlu2 %v3376_v5, %s5560_s21  ;;  %s5654_s18 = smov 17  }
  0x53   : > { %662 = vrot.lane.b32.xlu0 %v3484_v0, %s5560_s21  ;;  %v503_v28 = vmul.f32 16.0, %v501_v24  ;;  %s5574_s21 = smov 79  }
  0x55   : > { %v3874_v26 = vsub.f32 %v490_v12, %v503_v28 }
  0x57   : > { %v531_v34 = vadd.f32 1.0, %v3874_v26  ;;  %v523_v54 = vadd.f32 -1.0, %v3874_v26 }
  0x59   : > { %vm533_vm6 = vcmp.ge.f32.partialorder %v531_v34, 0.0  ;;  %vm535_vm7 = vcmp.lt.f32.partialorder %v531_v34, 16.0  ;;  %vm525_vm2 = vcmp.ge.f32.partialorder %v523_v54, 0.0  ;;  %vm527_vm3 = vcmp.lt.f32.partialorder %v523_v54, 16.0 }
  0x5a   : > { %673 = vperm.xlu1 %3381, %v670_v6   ;;  %854 = vrot.lane.b32.xlu2 %v3748_v7, %s5654_s18  ;;  %v1195_v6 = vadd.f32 0.020408163, %v1188_v63  ;;  %vm3883_vm11 = vmand %vm533_vm6, %vm535_vm7  ;;  %vm5565_vm6 = vcmask 130048   ;;  %vm5564_vm7 = vcmask 138240  }
  0x5b   : > { %856 = vrot.lane.b32.xlu0 %v3750_v8, %s5654_s18 }
  0x62   : > { %804 = vperm.xlu1 %3381, %v801_v15   ;;  %866 = vrot.lane.b32.xlu2 %v3750_v8, %s5655_s28  ;;  %v498_v15 = vmul.f32 %v497_v11, %v489_v10 }
  0x63   : > { %874 = vrot.lane.b32.xlu0 %v3748_v7, %s5656_s0 }
  0x64   : > { %v500_v22 = vfloor.f32 %v498_v15  ;;  %v669_v15 = vld [vmem:[%s5530_s2] sm:$0xff] }
  0x66   : > { %v502_v25 = vmul.f32 16.0, %v500_v22 }
  0x6a   : > { %864 = vrot.lane.b32.xlu1 %v3748_v7, %s5655_s28  ;;  %884 = vrot.lane.b32.xlu2 %v3748_v7, %s5657_s26 }
  0x6b   : > { %886 = vrot.lane.b32.xlu0 %v3750_v8, %s5657_s26 }
  0x72   : > { %876 = vrot.lane.b32.xlu1 %v3750_v8, %s5656_s0  ;;  %896 = vrot.lane.b32.xlu2 %v3750_v8, %s5658_s25 }
  0x73   : > { %904 = vrot.lane.b32.xlu0 %v3748_v7, %s5659_s15 }
  0x7a   : > { %894 = vrot.lane.b32.xlu1 %v3748_v7, %s5658_s25  ;;  %3383 = vrot.lane.b32.xlu2 %v3382_v31, %s5660_s22 }
  0x7b   : > { %3388 = vrot.lane.b32.xlu0 %v3382_v31, %s5661_s19  ;;  %v3872_v31 = vsub.f32 %v489_v10, %v502_v25 }
  0x7c   : > { %v3828_v36 = vpop.permute.xlu2 %584 }
  0x7d   : > { %v530_v32 = vadd.f32 1.0, %v3872_v31  ;;  %v522_v38 = vadd.f32 -1.0, %v3872_v31 }
  0x7f   : > { %vm532_vm4 = vcmp.ge.f32.partialorder %v530_v32, 0.0  ;;  %vm534_vm5 = vcmp.lt.f32.partialorder %v530_v32, 16.0  ;;  %vm524_vm12 = vcmp.ge.f32.partialorder %v522_v38, 0.0  ;;  %vm526_vm13 = vcmp.lt.f32.partialorder %v522_v38, 16.0 }
  0x80   : > { %vm3879_vm8 = vmand %vm532_vm4, %vm534_vm5  ;;  %vm5566_vm4 = vcmask 121856  }
  0x81   : > { %v5663_v42 = vsel %vm3879_vm8, 4294967295, %v5662_v42  ;;  %vm3895_vm15 = vmand %vm524_vm12, %vm526_vm13  ;;  %vm5563_vm12 = vcmask 588800   ;;  %vm5562_vm13 = vcmask 64512  }
  0x82   : > { %906 = vrot.lane.b32.xlu1 %v3750_v8, %s5659_s15  ;;  %5664 = vst [vmem:[#allocation8_spill] sm:$0xff] %v5663_v42  ;;  %vm3916_vm5 = vmand %vm525_vm2, %vm527_vm3  ;;  %vm1140_vm2 = vcmask 57344  }
  0x83   : > { %v5671_v4 = vsel %vm3916_vm5, 4294967295, %v5670_v4 }
  0x84   : > { %v3833_v41 = vpop.permute.xlu2 %586  ;;  %5672 = vst [vmem:[#allocation10_spill] sm:$0xff] %v5671_v4 }
  0x85   : > { %v590_v22 = vsel %vm5566_vm4, %v3828_v36, %v3833_v41 }
  0x8a   : > { %934 = vperm.xlu1 %3381, %v931_v43   ;;  %v5665_v43 = vmov 0 }
  0x8b   : > { %v5666_v43 = vsel %vm3883_vm11, 4294967295, %v5665_v43 }
  0x8c   : > { %v3840_v49 = vpop.permute.xlu0 %565  ;;  %v3848_v52 = vpop.permute.xlu2 %599  ;;  %5667 = vst [vmem:[#allocation9_spill] sm:$0xff] %v5666_v43 }
  0x92   : > { %1064 = vperm.xlu1 %3381, %v1061_v51  }
  0x94   : > { %v3852_v55 = vpop.permute.xlu1 %569  ;;  %v3856_v62 = vpop.permute.xlu2 %612 }
  0x95   : > { %v3854_v58 = vpop.permute.xlu0 %567 }
  0x96   : > { %v572_v17 = vsel %vm5564_vm7, %v3840_v49, %v3854_v58 }
  0x9a   : > { %1256 = vperm.xlu1 %3381, %v1193_v59  }
  0x9c   : > { %v3860_v0 = vpop.permute.xlu1 %582  ;;  %v3866_v16 = vpop.permute.xlu2 %625 }
  0x9d   : > { %v3862_v5 = vpop.permute.xlu0 %595 }
  0xa2   : > { %1266 = vperm.xlu1 %3381, %v1195_v6   ;;  %v589_v6 = vsel %vm5566_vm4, %v3860_v0, %v3828_v36 }
  0xa4   : > { %v3868_v18 = vpop.permute.xlu1 %597  ;;  %v3870_v29 = vpop.permute.xlu2 %638 }
  0xa5   : > { %v609_v19 = vpop.permute.xlu0 %608  ;;  %v602_v63 = vsel %vm5572_vm0, %v3862_v5, %v3868_v18 }
  0xaa   : > { %1281 = vperm.xlu1 %3381, %v1198_v21   ;;  %v603_v21 = vsel %vm5572_vm0, %v3868_v18, %v3848_v52  ;;  %v573_v52 = vsel %vm5564_vm7, %v3854_v58, %v3852_v55 }
  0xac   : > { %v611_v27 = vpop.permute.xlu1 %610  ;;  %v3378_v37 = vpop.permute.xlu2 %3377 }
  0xad   : > { %v622_v30 = vpop.permute.xlu0 %621  ;;  %v3380_v39 = vunpack.i.h.bf16 %v3378_v37  ;;  %v3379_v40 = vunpack.i.l.bf16 %v3378_v37  ;;  %v615_v57 = vsel %vm5570_vm1, %v609_v19, %v611_v27  ;;  %v616_v12 = vsel %vm5570_vm1, %v611_v27, %v3856_v62 }
  0xaf   : > { %v665_v48 = vsel %vm5573_vm10, %v3379_v40, %v3380_v39 }
  0xb4   : > { %v624_v33 = vpop.permute.xlu1 %623  ;;  %v855_v24 = vpop.permute.xlu2 %854 }
  0xb5   : > { %v635_v35 = vpop.permute.xlu0 %634  ;;  %v628_v56 = vsel %vm5567_vm14, %v622_v30, %v624_v33  ;;  %v629_v10 = vsel %vm5567_vm14, %v624_v33, %v3866_v16 }
  0xbc   : > { %v637_v44 = vpop.permute.xlu1 %636  ;;  %v867_v41 = vpop.permute.xlu2 %866 }
  0xbd   : > { %v641_v45 = vsel %vm5571_vm9, %v635_v35, %v637_v44  ;;  %v642_v46 = vsel %vm5571_vm9, %v637_v44, %v3870_v29  ;;  %v3373_v51 = vpop.permute.xlu0 %3372 }
  0xbe   : > { %3173 = vmatpush.msk.msra.mxu0 %vm3879_vm8, %v641_v45  ;;  %3180 = vmatpush.msk.msra.mxu1 %vm3883_vm11, %v642_v46  ;;  %v3909_v61 = vunpack.i.l.bf16 %v3373_v51 }
  0xc0   : > { %688 = vmatpush.msra.mxu0 %v665_v48 }
  0xc2   : > { %3174 = vmatpush.msk.msra.mxu0 %vm3895_vm15, %v628_v56  ;;  %v1113_v56 = vld [vmem:[%s5539_s11] sm:$0xff] }
  0xc3   : > { %1201 = vperm.xlu2 %3392, %v1113_v56  }
  0xc4   : > { %v652_v59 = vpop.permute.xlu1 %651  ;;  %3175 = vmatpush.msk.msra.mxu0 %vm3879_vm8, %v615_v57  ;;  %v885_v32 = vpop.permute.xlu2 %884  ;;  %v1185_v57 = vsub.f32 %v3757_v9, %v3843_v50 }
  0xc5   : > { %v3907_v60 = vpop.permute.xlu0 %662 }
  0xc6   : > { %691 = vmatpush.msra.mxu0 %v3701_v2  ;;  %v666_v3 = vsel %vm5573_vm10, %v3380_v39, %v3907_v60  ;;  %v3375_v2 = vunpack.i.h.bf16 %v3373_v51 }
  0xc7   : > { %708 = vmatpush.msra.mxu1 %v666_v3  ;;  %v1192_v3 = vadd.f32 0.020408163, %v1185_v57 }
  0xc8   : > { %3176 = vmatpush.msk.msra.mxu0 %vm3895_vm15, %v602_v63  ;;  %v654_v11 = vsel %vm5565_vm6, %v3909_v61, %v3375_v2  ;;  %v1187_v63 = vsub.f32 %v3773_v13, %v3843_v50 }
  0xc9   : > { %3181 = vmatpush.msk.msra.mxu1 %vm3916_vm5, %v629_v10  ;;  %1251 = vperm.xlu0 %3393, %v1192_v3  }
  0xca   : > { %3177 = vmatpush.msk.msra.mxu0 %vm3879_vm8, %v589_v6 }
  0xcb   : > { %3182 = vmatpush.msk.msra.mxu1 %vm3883_vm11, %v616_v12  ;;  %v1194_v12 = vadd.f32 0.020408163, %v1187_v63 }
  0xcc   : > { %v3935_v14 = vpop.permute.xlu1 %673  ;;  %694 = vmatpush.msra.mxu0 %v654_v11  ;;  %v897_v37 = vpop.permute.xlu2 %896 }
  0xcd   : > { %711 = vmatpush.msra.mxu1 %v3698_v1  ;;  %v3946_v19 = vpop.permute.xlu0 %856  ;;  %v655_v1 = vsel %vm5565_vm6, %v3375_v2, %v652_v59  ;;  %v899_v46 = vsel %vm5567_vm14, %v897_v37, %v3866_v16  ;;  %1261 = vperm.xlu2 %3392, %v1194_v12  }
  0xce   : > { %3178 = vmatpush.msk.msra.mxu0 %vm3895_vm15, %v572_v17  ;;  %v930_v17 = vld [vmem:[%s5534_s6] sm:$0xff] }
  0xcf   : > { %3179 = vmatmul.msk.f32.vlgmr.msra.gmra.mxu0 %vm5563_vm12, %v669_v15  ;;  %3183 = vmatpush.msk.msra.mxu1 %vm3916_vm5, %v603_v21  ;;  %v858_v21 = vsel %vm5564_vm7, %v3840_v49, %v855_v24 }
  0xd1   : > { %3184 = vmatpush.msk.msra.mxu1 %vm3883_vm11, %v590_v22  ;;  %v859_v22 = vsel %vm5564_vm7, %v855_v24, %v3946_v19  ;;  %v1112_v19 = vld [vmem:[%s5538_s10] sm:$0xff] }
  0xd3   : > { %714 = vmatpush.msra.mxu1 %v655_v1  ;;  %v1189_v1 = vsub.f32 %v3794_v20, %v3843_v50  ;;  %v1190_v20 = vsub.f32 %v3801_v23, %v3843_v50  ;;  %v1114_v23 = vld [vmem:[%s5540_s12] sm:$0xff]  ;;  %v4058_v50 = vld [vmem:[%s5540_s12 + $0x8] sm:$0xff] }
  0xd4   : > { %v3962_v25 = vpop.permute.xlu1 %804  ;;  %v3384_v54 = vpop.permute.xlu2 %3383 }
  0xd5   : > { %v875_v18 = vpop.permute.xlu0 %874  ;;  %3185 = vmatpush.msk.msra.mxu1 %vm3916_vm5, %v573_v52  ;;  %v3386_v59 = vunpack.i.h.bf16 %v3384_v54  ;;  %v3385_v2 = vunpack.i.l.bf16 %v3384_v54  ;;  %v1196_v52 = vadd.f32 0.020408163, %v1189_v1  ;;  %v1197_v24 = vadd.f32 0.020408163, %v1190_v20 }
  0xd6   : > { %3186 = vmatmul.msk.f32.vlgmr.msra.gmra.mxu1 %vm5563_vm12, %v669_v15  ;;  %v878_v6 = vsel %vm5572_vm0, %v3862_v5, %v875_v18 }
  0xd7   : > { %v919_v11 = vsel %vm5565_vm6, %v3385_v2, %v3386_v59  ;;  %v918_v15 = vsel %vm5565_vm6, %v3909_v61, %v3385_v2  ;;  %1271 = vperm.xlu2 %3392, %v1196_v52   ;;  %1276 = vperm.xlu0 %3393, %v1197_v24  }
  0xdc   : > { %v865_v36 = vpop.permute.xlu1 %864 }
  0xdd   : > { %v887_v27 = vpop.permute.xlu0 %886  ;;  %v868_v9 = vsel %vm5566_vm4, %v3860_v0, %v865_v36  ;;  %v869_v13 = vsel %vm5566_vm4, %v865_v36, %v867_v41 }
  0xde   : > { %v888_v48 = vsel %vm5570_vm1, %v885_v32, %v887_v27  ;;  %v889_v51 = vsel %vm5570_vm1, %v887_v27, %v3856_v62 }
  0xe4   : > { %v877_v28 = vpop.permute.xlu1 %876 }
  0xe5   : > { %v905_v30 = vpop.permute.xlu0 %904  ;;  %v879_v10 = vsel %vm5572_vm0, %v875_v18, %v877_v28  ;;  %v1129_v28 = vsel %vm5562_vm13, %v1114_v23, 0.0 }
  0xec   : > { %v895_v33 = vpop.permute.xlu1 %894 }
  0xed   : > { %v3389_v34 = vpop.permute.xlu0 %3388  ;;  %v898_v45 = vsel %vm5567_vm14, %v895_v33, %v897_v37 }
  0xee   : > { %v3390_v35 = vunpack.i.l.bf16 %v3389_v34  ;;  %v3391_v38 = vunpack.i.h.bf16 %v3389_v34  ;;  %v4081_v34 = vld [vmem:[%s5540_s12 + $0x18] sm:$0xff] }
  0xef   : > { %v1134_v37 = vsel %vm5562_vm13, %v4081_v34, 0.0 }
  0xf0   : > { %v926_v40 = vsel %vm5573_vm10, %v3390_v35, %v3391_v38  ;;  %v927_v44 = vsel %vm5573_vm10, %v3391_v38, %v3907_v60  ;;  %v4092_v38 = vld [vmem:[%s5540_s12 + $0x20] sm:$0xff] }
  0xf4   : > { %v907_v39 = vpop.permute.xlu1 %906 }
  0xf5   : > { %v908_v55 = vsel %vm5571_vm9, %v905_v30, %v907_v39  ;;  %v909_v58 = vsel %vm5571_vm9, %v907_v39, %v3870_v29  ;;  %v1130_v30 = vsel %vm5562_vm13, %v4058_v50, 0.0 }
  0xf6   : > { %3201 = vmatpush.msk.msrb.mxu0 %vm3879_vm8, %v908_v55  ;;  %3208 = vmatpush.msk.msrb.mxu1 %vm3883_vm11, %v909_v58  ;;  %v1131_v32 = vadd.f32 %v1130_v30, %v1129_v28  ;;  %v1136_v55 = vsel %vm5562_vm13, %v4092_v38, 0.0  ;;  %v4101_v58 = vld [vmem:[%s5540_s12 + $0x28] sm:$0xff] }
  0xf8   : > { %948 = vmatpush.msrb.mxu0 %v926_v40  ;;  %968 = vmatpush.msrb.mxu1 %v927_v44  ;;  %v1138_v44 = vsel %vm5562_vm13, %v4101_v58, 0.0 }
  0xfa   : > { %3202 = vmatpush.msk.msrb.mxu0 %vm3895_vm15, %v898_v45  ;;  %3209 = vmatpush.msk.msrb.mxu1 %vm3916_vm5, %v899_v46  ;;  %v4112_v45 = vld [vmem:[%s5540_s12 + $0x30] sm:$0x1] }
  0xfc   : > { %3203 = vmatpush.msk.msrb.mxu0 %vm3879_vm8, %v888_v48  ;;  %3210 = vmatpush.msk.msrb.mxu1 %vm3883_vm11, %v889_v51  ;;  %v1141_v48 = vsel %vm1140_vm2, %v4112_v45, 0.0  ;;  %v935_v3 = vpop.permute.xlu1 %934 }
  0xfe   : > { %951 = vmatpush.msrb.mxu0 %v3748_v7  ;;  %971 = vmatpush.msrb.mxu1 %v3750_v8 }
 0x100   : > { %3204 = vmatpush.msk.msrb.mxu0 %vm3895_vm15, %v878_v6  ;;  %3211 = vmatpush.msk.msrb.mxu1 %vm3916_vm5, %v879_v10 }
 0x102   : > { %3205 = vmatpush.msk.msrb.mxu0 %vm3879_vm8, %v868_v9  ;;  %3212 = vmatpush.msk.msrb.mxu1 %vm3883_vm11, %v869_v13 }
 0x104   : > { %954 = vmatpush.msrb.mxu0 %v918_v15  ;;  %974 = vmatpush.msrb.mxu1 %v919_v11 }
 0x106   : > { %3206 = vmatpush.msk.msrb.mxu0 %vm3895_vm15, %v858_v21  ;;  %3213 = vmatpush.msk.msrb.mxu1 %vm3916_vm5, %v859_v22 }
 0x107   : > { %3207 = vmatmul.msk.f32.vlgmr.msrb.gmra.mxu0 %vm5563_vm12, %v930_v17  ;;  %3214 = vmatmul.msk.f32.vlgmr.msrb.gmra.mxu1 %vm5563_vm12, %v930_v17 }
 0x108   : > { %1222 = vmatpush.msra.mxu0 %v3748_v7  ;;  %1242 = vmatpush.msra.mxu1 %v3750_v8 }
 0x10f   : > { %3229 = vmatmul.msk.f32.vlgmr.msra.gmra.mxu0 %vm5562_vm13, %v1112_v19  ;;  %3230 = vmatmul.msk.f32.vlgmr.msra.gmra.mxu1 %vm5562_vm13, %v1112_v19 }
 0x11d   : > { %v1202_v17 = vpop.permute.xlu2 %1201 }
 0x127   : > { %v4187_v30 = vpop.permute.xlu2 %1261 }
 0x13b   : > { %v4185_v28 = vpop.permute.xlu0 %1251 }
 0x14c   : > { %v697_v18 = vpop.f32.mrf.mxu0 }
 0x14d   : > { %v698_v7 = vadd.f32 %v697_v18, %v3935_v14 }
 0x14f   : > { %v4045_v8 = vmax.f32 %v698_v7, 0.0  ;;  %v4165_v7 = vpop.permute.xlu1 %1064 }
 0x151   : > { %734 = vrot.lane.b32.xlu1 %v4045_v8, %s5655_s28  ;;  %724 = vrot.lane.b32.xlu2 %v4045_v8, %s5654_s18 }
 0x153   : > { %v717_v36 = vpop.f32.mrf.mxu1 }
 0x154   : > { %v718_v41 = vadd.f32 %v717_v36, %v3935_v14  ;;  %v4072_v14 = vld [vmem:[%s5540_s12 + $0x10] sm:$0xff] }
 0x155   : > { %v1132_v33 = vsel %vm5562_vm13, %v4072_v14, 0.0 }
 0x156   : > { %v4060_v27 = vmax.f32 %v718_v41, 0.0  ;;  %v1133_v35 = vadd.f32 %v1132_v33, %v1131_v32  ;;  %v4191_v32 = vpop.permute.xlu0 %1276  ;;  %v4193_v33 = vpop.permute.xlu2 %1271 }
 0x157   : > { %v4177_v41 = vpop.permute.xlu1 %1256  ;;  %5674 = vst [vmem:[#allocation12_spill] sm:$0xff] %v4191_v32 }
 0x158   : > { %726 = vrot.lane.b32.xlu0 %v4060_v27, %s5654_s18  ;;  %v1135_v39 = vadd.f32 %v1134_v37, %v1133_v35  ;;  %v3394_v54 = vpack.i.bf16 %v4060_v27, %v4045_v8 }
 0x159   : > { %746 = vrot.lane.b32.xlu1 %v4060_v27, %s5656_s0  ;;  %736 = vrot.lane.b32.xlu2 %v4060_v27, %s5655_s28 }
 0x15a   : > { %v1137_v40 = vadd.f32 %v1136_v55, %v1135_v39 }
 0x15c   : > { %v1139_v46 = vadd.f32 %v1138_v44, %v1137_v40 }
 0x15e   : > { %v1142_v51 = vadd.f32 %v1141_v48, %v1139_v46 }
 0x160   : > { %744 = vrot.lane.b32.xlu0 %v4045_v8, %s5656_s0  ;;  %v1143_v56 = vrot.slane %v1142_v51, 4 }
 0x161   : > { %764 = vrot.lane.b32.xlu1 %v4045_v8, %s5658_s25  ;;  %754 = vrot.lane.b32.xlu2 %v4045_v8, %s5657_s26 }
 0x162   : > { %v1144_v57 = vadd.f32 %v1143_v56, %v1142_v51 }
 0x164   : > { %v1145_v59 = vrot.slane %v1144_v57, 2 }
 0x166   : > { %v1146_v63 = vadd.f32 %v1145_v59, %v1144_v57 }
 0x168   : > { %756 = vrot.lane.b32.xlu0 %v4060_v27, %s5657_s26  ;;  %v1147_v2 = vrot.slane %v1146_v63, 1 }
 0x169   : > { %776 = vrot.lane.b32.xlu1 %v4060_v27, %s5659_s15  ;;  %766 = vrot.lane.b32.xlu2 %v4060_v27, %s5658_s25 }
 0x16a   : > { %v1148_v15 = vadd.f32 %v1147_v2, %v1146_v63 }
 0x16c   : > { %v4134_v21 = vmul.f32 %v3838_v47, %v1148_v15 }
 0x16e   : > { %v1157_v18 = vsub.f32 %v1114_v23, %v4134_v21  ;;  %v1158_v47 = vsub.f32 %v4058_v50, %v4134_v21  ;;  %v1159_v36 = vsub.f32 %v4072_v14, %v4134_v21  ;;  %v4183_v50 = vpop.permute.xlu1 %1266 }
 0x170   : > { %774 = vrot.lane.b32.xlu0 %v4045_v8, %s5659_s15 }
 0x171   : > { %3395 = vrot.lane.b32.xlu2 %v3394_v54, %s5660_s22 }
 0x176   : > { %v4189_v14 = vpop.permute.xlu1 %1281 }
 0x177   : > { %5673 = vst [vmem:[#allocation11_spill] sm:$0xff] %v4189_v14 }
 0x178   : > { %3400 = vrot.lane.b32.xlu0 %v3394_v54, %s5661_s19 }
 0x184   : > { %v957_v6 = vpop.f32.mrf.mxu0  ;;  %v977_v10 = vpop.f32.mrf.mxu1 }
 0x185   : > { %v958_v9 = vadd.f32 %v957_v6, %v935_v3  ;;  %v978_v13 = vadd.f32 %v977_v10, %v935_v3 }
 0x187   : > { %v4123_v11 = vmax.f32 %v958_v9, 0.0  ;;  %v4125_v12 = vmax.f32 %v978_v13, 0.0 }
 0x189   : > { %986 = vrot.lane.b32.xlu0 %v4125_v12, %s5654_s18  ;;  %994 = vrot.lane.b32.xlu1 %v4123_v11, %s5655_s28  ;;  %v3409_v23 = vpack.i.bf16 %v4125_v12, %v4123_v11 }
 0x18a   : > { %984 = vrot.lane.b32.xlu2 %v4123_v11, %s5654_s18 }
 0x18c   : > { %v1224_v22 = vpop.f32.mrf.mxu0  ;;  %v1244_v1 = vpop.f32.mrf.mxu1 }
 0x18d   : > { %v4136_v52 = vadd.f32 %v1224_v22, %v1202_v17  ;;  %v4138_v19 = vadd.f32 %v1244_v1, %v1202_v17 }
 0x18f   : > { %v1247_v20 = vmax.f32 %v4136_v52, 0.0  ;;  %v1248_v24 = vmax.f32 %v4138_v19, 0.0 }
 0x191   : > { %1320 = vmatpush.msrb.mxu0 %v1247_v20  ;;  %1358 = vmatpush.msrb.mxu1 %v1248_v24 }
 0x192   : > { %1004 = vrot.lane.b32.xlu0 %v4123_v11, %s5656_s0  ;;  %1006 = vrot.lane.b32.xlu1 %v4125_v12, %s5656_s0 }
 0x193   : > { %996 = vrot.lane.b32.xlu2 %v4125_v12, %s5655_s28  ;;  %3231 = vmatmul.msk.f32.vlgmr.msrb.gmra.mxu0 %vm5562_vm13, %v1157_v18 }
 0x194   : > { %3238 = vmatmul.msk.f32.vlgmr.msrb.gmra.mxu1 %vm5562_vm13, %v1157_v18 }
 0x19a   : > { %1016 = vrot.lane.b32.xlu0 %v4125_v12, %s5657_s26  ;;  %1024 = vrot.lane.b32.xlu1 %v4123_v11, %s5658_s25 }
 0x19b   : > { %1014 = vrot.lane.b32.xlu2 %v4123_v11, %s5657_s26  ;;  %3232 = vmatmul.msk.f32.gmra.mxu0 %vm5562_vm13, %v1158_v47 }
 0x19c   : > { %3239 = vmatmul.msk.f32.gmra.mxu1 %vm5562_vm13, %v1158_v47 }
 0x1a2   : > { %1034 = vrot.lane.b32.xlu0 %v4123_v11, %s5659_s15  ;;  %1036 = vrot.lane.b32.xlu1 %v4125_v12, %s5659_s15 }
 0x1a3   : > { %1026 = vrot.lane.b32.xlu2 %v4125_v12, %s5658_s25  ;;  %3233 = vmatmul.msk.f32.gmra.mxu0 %vm5562_vm13, %v1159_v36 }
 0x1a4   : > { %3240 = vmatmul.msk.f32.gmra.mxu1 %vm5562_vm13, %v1159_v36 }
 0x1aa   : > { %3410 = vrot.lane.b32.xlu0 %v3409_v23, %s5661_s19 }
 0x1ab   : > { %3405 = vrot.lane.b32.xlu2 %v3409_v23, %s5660_s22  ;;  %v725_v37 = vpop.permute.xlu2 %724 }
 0x1b3   : > { %v737_v46 = vpop.permute.xlu2 %736 }
 0x1bb   : > { %v755_v56 = vpop.permute.xlu2 %754 }
 0x1c3   : > { %v735_v35 = vpop.permute.xlu1 %734  ;;  %v767_v63 = vpop.permute.xlu2 %766 }
 0x1c4   : > { %v769_v15 = vsel %vm5567_vm14, %v767_v63, %v3866_v16 }
 0x1ca   : > { %v727_v39 = vpop.permute.xlu0 %726 }
 0x1cb   : > { %v747_v55 = vpop.permute.xlu1 %746  ;;  %v3396_v1 = vpop.permute.xlu2 %3395 }
 0x1cc   : > { %v3398_v18 = vunpack.i.h.bf16 %v3396_v1  ;;  %v3397_v47 = vunpack.i.l.bf16 %v3396_v1 }
 0x1d2   : > { %v745_v40 = vpop.permute.xlu0 %744 }
 0x1d3   : > { %v765_v44 = vpop.permute.xlu1 %764  ;;  %v748_v36 = vsel %vm5572_vm0, %v3862_v5, %v745_v40  ;;  %v749_v23 = vsel %vm5572_vm0, %v745_v40, %v747_v55  ;;  %v789_v55 = vsel %vm5565_vm6, %v3397_v47, %v3398_v18 }
 0x1d4   : > { %v768_v13 = vsel %vm5567_vm14, %v765_v44, %v767_v63  ;;  %v738_v44 = vsel %vm5566_vm4, %v3860_v0, %v735_v35 }
 0x1da   : > { %v757_v48 = vpop.permute.xlu0 %756 }
 0x1db   : > { %v777_v51 = vpop.permute.xlu1 %776  ;;  %v758_v17 = vsel %vm5570_vm1, %v755_v56, %v757_v48  ;;  %v759_v22 = vsel %vm5570_vm1, %v757_v48, %v3856_v62 }
 0x1dc   : > { %v779_v54 = vsel %vm5571_vm9, %v777_v51, %v3870_v29 }
 0x1dd   : > { %3194 = vmatpush.msk.msra.mxu3 %vm3883_vm11, %v779_v54 }
 0x1e2   : > { %v775_v57 = vpop.permute.xlu0 %774 }
 0x1e3   : > { %v778_v59 = vsel %vm5571_vm9, %v775_v57, %v777_v51  ;;  %v729_v51 = vsel %vm5564_vm7, %v725_v37, %v727_v39 }
 0x1e4   : > { %3187 = vmatpush.msk.msra.mxu2 %vm3879_vm8, %v778_v59  ;;  %v4248_v54 = vpop.permute.xlu2 %984 }
 0x1ea   : > { %v3401_v3 = vpop.permute.xlu0 %3400 }
 0x1eb   : > { %v3403_v2 = vunpack.i.h.bf16 %v3401_v3  ;;  %v3402_v6 = vunpack.i.l.bf16 %v3401_v3  ;;  %v506_v3 = vadd.f32 -3.0, %v3872_v31 }
 0x1ed   : > { %v796_v10 = vsel %vm5573_vm10, %v3402_v6, %v3403_v2  ;;  %v797_v9 = vsel %vm5573_vm10, %v3403_v2, %v3907_v60  ;;  %v4260_v59 = vpop.permute.xlu2 %996  ;;  %v507_v2 = vadd.f32 -3.0, %v3874_v26 }
 0x1ee   : > { %818 = vmatpush.msra.mxu2 %v796_v10  ;;  %838 = vmatpush.msra.mxu3 %v797_v9 }
 0x1f0   : > { %3188 = vmatpush.msk.msra.mxu2 %vm3895_vm15, %v768_v13  ;;  %3195 = vmatpush.msk.msra.mxu3 %vm3916_vm5, %v769_v15 }
 0x1f2   : > { %3189 = vmatpush.msk.msra.mxu2 %vm3879_vm8, %v758_v17  ;;  %3196 = vmatpush.msk.msra.mxu3 %vm3883_vm11, %v759_v22 }
 0x1f4   : > { %821 = vmatpush.msra.mxu2 %v4045_v8  ;;  %841 = vmatpush.msra.mxu3 %v4060_v27  ;;  %v739_v8 = vsel %vm5566_vm4, %v735_v35, %v737_v46  ;;  %v788_v27 = vsel %vm5565_vm6, %v3909_v61, %v3397_v47  ;;  %v800_v35 = vld [vmem:[%s5532_s4] sm:$0xff]  ;;  %v728_v46 = vsel %vm5564_vm7, %v3840_v49, %v725_v37  ;;  %v514_v37 = vadd.f32 -2.0, %v3872_v31 }
 0x1f5   : > { %v1015_v9 = vpop.permute.xlu2 %1014  ;;  %vm510_vm7 = vcmp.lt.f32.partialorder %v506_v3, 16.0 }
 0x1f6   : > { %3190 = vmatpush.msk.msra.mxu2 %vm3895_vm15, %v748_v36  ;;  %3197 = vmatpush.msk.msra.mxu3 %vm3916_vm5, %v749_v23  ;;  %vm516_vm3 = vcmp.ge.f32.partialorder %v514_v37, 0.0  ;;  %vm518_vm2 = vcmp.lt.f32.partialorder %v514_v37, 16.0 }
 0x1f7   : > { %vm4267_vm13 = vmand %vm516_vm3, %vm518_vm2  ;;  %vm509_vm3 = vcmp.ge.f32.partialorder %v507_v2, 0.0  ;;  %vm511_vm2 = vcmp.lt.f32.partialorder %v507_v2, 16.0 }
 0x1f8   : > { %3191 = vmatpush.msk.msra.mxu2 %vm3879_vm8, %v738_v44  ;;  %3198 = vmatpush.msk.msra.mxu3 %vm3883_vm11, %v739_v8  ;;  %v5677_v8 = vmov 0  ;;  %vm4292_vm4 = vmand %vm509_vm3, %vm511_vm2 }
 0x1fa   : > { %824 = vmatpush.msra.mxu2 %v788_v27  ;;  %844 = vmatpush.msra.mxu3 %v789_v55  ;;  %v5679_v27 = vmov 0  ;;  %v515_v55 = vadd.f32 -2.0, %v3874_v26 }
 0x1fb   : > { %v4238_v40 = vpop.permute.xlu0 %986  ;;  %v4240_v48 = vpop.permute.xlu1 %994  ;;  %v5680_v27 = vsel %vm4292_vm4, 4294967295, %v5679_v27 }
 0x1fc   : > { %3192 = vmatpush.msk.msra.mxu2 %vm3895_vm15, %v728_v46  ;;  %3199 = vmatpush.msk.msra.mxu3 %vm3916_vm5, %v729_v51  ;;  %5681 = vst [vmem:[#allocation13_spill] sm:$0xff] %v5680_v27 }
 0x1fd   : > { %3193 = vmatmul.msk.f32.vlgmr.msra.gmra.mxu2 %vm5563_vm12, %v800_v35  ;;  %3200 = vmatmul.msk.f32.vlgmr.msra.gmra.mxu3 %vm5563_vm12, %v800_v35  ;;  %vm508_vm12 = vcmp.ge.f32.partialorder %v506_v3, 0.0  ;;  %v1027_v51 = vpop.permute.xlu2 %1026 }
 0x1fe   : > { %vm4286_vm6 = vmand %vm508_vm12, %vm510_vm7  ;;  %vm517_vm7 = vcmp.ge.f32.partialorder %v515_v55, 0.0  ;;  %vm519_vm12 = vcmp.lt.f32.partialorder %v515_v55, 16.0  ;;  %v1029_v55 = vsel %vm5567_vm14, %v1027_v51, %v3866_v16 }
 0x1ff   : > { %v5678_v8 = vsel %vm4286_vm6, 4294967295, %v5677_v8  ;;  %vm4317_vm3 = vmand %vm517_vm7, %vm519_vm12 }
 0x204   : > { %v4256_v56 = vpop.permute.xlu0 %1004  ;;  %v4258_v57 = vpop.permute.xlu1 %1006 }
 0x20c   : > { %v4263_v39 = vpop.permute.xlu0 %1016  ;;  %v1025_v63 = vpop.permute.xlu1 %1024 }
 0x20d   : > { %v1019_v16 = vsel %vm5570_vm1, %v4263_v39, %v3856_v62 }
 0x210   : > { %v1322_v6 = vpop.f32.mrf.mxu0 }
 0x211   : > { %v4272_v13 = vadd.f32 %v1322_v6, %v4185_v28  ;;  %v1360_v15 = vpop.f32.mrf.mxu1 }
 0x212   : > { %v4275_v17 = vadd.f32 %v1360_v15, %v4185_v28 }
 0x213   : > { %v1473_v22 = vperm.slane %v4272_v13, 3  ;;  %v1402_v1 = vsel %vm4267_vm13, %v4272_v13, 0.0 }
 0x214   : > { %v1035_v18 = vpop.permute.xlu0 %1034  ;;  %v1037_v47 = vpop.permute.xlu1 %1036  ;;  %v1474_v36 = vperm.slane %v4275_v17, 3  ;;  %v1404_v23 = vperm.slane %v1402_v1, 1  ;;  %v4309_v35 = vsel %vm4292_vm4, %v4275_v17, 0.0  ;;  %v1438_v46 = vsel %vm3916_vm5, %v4275_v17, 0.0 }
 0x215   : > { %1477 = vrot.lane.b32.xlu2 %v1473_v22, %s5580_s1  ;;  %v1038_v28 = vsel %vm5571_vm9, %v1035_v18, %v1037_v47  ;;  %v1039_v44 = vsel %vm5571_vm9, %v1037_v47, %v3870_v29  ;;  %v4304_v29 = vsel %vm4286_vm6, %v4272_v13, 0.0  ;;  %v1384_v2 = vperm.slane %v4309_v35, 0 }
 0x216   : > { %1479 = vrot.lane.b32.xlu0 %v1474_v36, %s5580_s1  ;;  %1408 = vrot.lane.b32.xlu1 %v1404_v23, %s5576_s3  ;;  %v1383_v37 = vperm.slane %v4304_v29, 0  ;;  %v1440_v6 = vperm.slane %v1438_v46, 2  ;;  %v5682_v1 = vmov 0  ;;  %v538_v18 = vadd.f32 2.0, %v3872_v31  ;;  %s3501_s1 = smov 82  }
 0x217   : > { %3215 = vmatpush.msk.msrb.mxu2 %vm3879_vm8, %v1038_v28  ;;  %3222 = vmatpush.msk.msrb.mxu3 %vm3883_vm11, %v1039_v44  ;;  %v5683_v1 = vsel %vm4317_vm3, 4294967295, %v5682_v1  ;;  %v1403_v23 = vsel %vm4317_vm3, %v4275_v17, 0.0  ;;  %v539_v28 = vadd.f32 2.0, %v3874_v26  ;;  %v1028_v44 = vsel %vm5567_vm14, %v1025_v63, %v1027_v51 }
 0x218   : > { %v1437_v46 = vsel %vm3895_vm15, %v4272_v13, 0.0  ;;  %vm540_vm2 = vcmp.ge.f32.partialorder %v538_v18, 0.0  ;;  %v1018_v63 = vsel %vm5570_vm1, %v1015_v9, %v4263_v39  ;;  %v1405_v51 = vperm.slane %v1403_v23, 1 }
 0x219   : > { %vm542_vm7 = vcmp.lt.f32.partialorder %v538_v18, 16.0  ;;  %vm541_vm12 = vcmp.ge.f32.partialorder %v539_v28, 0.0  ;;  %vm543_vm14 = vcmp.lt.f32.partialorder %v539_v28, 16.0  ;;  %v547_v9 = vadd.f32 3.0, %v3874_v26 }
 0x21a   : > { %vm4358_vm1 = vmand %vm540_vm2, %vm542_vm7  ;;  %v546_v26 = vadd.f32 3.0, %v3872_v31  ;;  %v1009_v18 = vsel %vm5572_vm0, %v4256_v56, %v4258_v57  ;;  %vm5688_vm2 = vcmask 121856   ;;  %v5696_v28 = vmov 0 }
 0x21b   : > { %vm4364_vm9 = vmand %vm541_vm12, %vm543_vm14  ;;  %v1543_v31 = vsel %vm4358_vm1, %v4272_v13, 0.0  ;;  %vm551_vm12 = vcmp.lt.f32.partialorder %v547_v9, 16.0  ;;  %vm5690_vm14 = vcmask 130048  }
 0x21c   : > { %v3411_v3 = vpop.permute.xlu0 %3410  ;;  %vm5689_vm7 = vmmov %vm5688_vm2 }
 0x21d   : > { %v3413_v15 = vunpack.i.h.bf16 %v3411_v3  ;;  %v3412_v22 = vunpack.i.l.bf16 %v3411_v3  ;;  %1387 = vrot.lane.b32.xlu2 %v1383_v37, %s5568_s27  ;;  %v1439_v37 = vperm.slane %v1437_v46, 2  ;;  %v1325_v46 = vpop.f32.mrf.mxu0 }
 0x21e   : > { %1389 = vrot.lane.b32.xlu0 %v1384_v2, %s5568_s27  ;;  %1445 = vrot.lane.b32.xlu1 %v1440_v6, %s5574_s21  ;;  %v3406_v2 = vpop.permute.xlu2 %3405  ;;  %s3500_s27 = smov 81   ;;  %v1326_v52 = vadd.f32 %v1325_v46, %v4177_v41 }
 0x21f   : > { %v1056_v47 = vsel %vm5573_vm10, %v3412_v22, %v3413_v15  ;;  %v1057_v36 = vsel %vm5573_vm10, %v3413_v15, %v3907_v60  ;;  %v1507_v60 = vsel %vm3879_vm8, %v4272_v13, 0.0  ;;  %v3408_v6 = vunpack.i.h.bf16 %v3406_v2 }
 0x220   : > { %1078 = vmatpush.msrb.mxu2 %v1056_v47  ;;  %1098 = vmatpush.msrb.mxu3 %v1057_v36  ;;  %v1509_v3 = vperm.slane %v1507_v60, 4  ;;  %v3407_v15 = vunpack.i.l.bf16 %v3406_v2  ;;  %v1008_v22 = vsel %vm5572_vm0, %v3862_v5, %v4256_v56  ;;  %v998_v5 = vsel %vm5688_vm2, %v3860_v0, %v4240_v48  ;;  %vm5691_vm2 = vmmov %vm5690_vm14  ;;  %v1060_v36 = vld [vmem:[%s5536_s8] sm:$0xff] }
 0x221   : > { %v1544_v56 = vsel %vm4364_vm9, %v4275_v17, 0.0  ;;  %vm548_vm0 = vcmp.ge.f32.partialorder %v546_v26, 0.0  ;;  %vm550_vm10 = vcmp.lt.f32.partialorder %v546_v26, 16.0  ;;  %v1545_v47 = vperm.slane %v1543_v31, 5 }
 0x222   : > { %3216 = vmatpush.msk.msrb.mxu2 %vm3895_vm15, %v1028_v44  ;;  %3223 = vmatpush.msk.msrb.mxu3 %vm3916_vm5, %v1029_v55  ;;  %v1048_v0 = vsel %vm5690_vm14, %v3909_v61, %v3407_v15  ;;  %v1049_v57 = vsel %vm5691_vm2, %v3407_v15, %v3408_v6  ;;  %vm5695_vm14 = vcmask 138240   ;;  %vm4414_vm2 = vmand %vm548_vm0, %vm550_vm10  ;;  %v1160_v60 = vsub.f32 %v4081_v34, %v4134_v21 }
 0x223   : > { %v988_v61 = vsel %vm5695_vm14, %v3840_v49, %v4248_v54  ;;  %v5697_v28 = vsel %vm4414_vm2, 4294967295, %v5696_v28  ;;  %v1579_v55 = vsel %vm4414_vm2, %v4272_v13, 0.0  ;;  %vm5702_vm0 = vcmask 64512  }
 0x224   : > { %3217 = vmatpush.msk.msrb.mxu2 %vm3879_vm8, %v1018_v63  ;;  %3224 = vmatpush.msk.msrb.mxu3 %vm3883_vm11, %v1019_v16  ;;  %5698 = vst [vmem:[#allocation14_spill] sm:$0xff] %v5697_v28  ;;  %vm5703_vm10 = vmmov %vm5702_vm0  ;;  %v4446_v19 = vsel %vm4267_vm13, %v1326_v52, 0.0  ;;  %v1616_v13 = vperm.slane %v4309_v35, 7  ;;  %v1719_v63 = vperm.slane %v1326_v52, 2  ;;  %v1683_v2 = vsel %vm3895_vm15, %v1326_v52, 0.0 }
 0x225   : > { %1410 = vrot.lane.b32.xlu2 %v1405_v51, %s5576_s3  ;;  %s5586_s3 = smov 93   ;;  %v1650_v34 = vperm.slane %v4446_v19, 0  ;;  %v1162_v51 = vsub.f32 %v4101_v58, %v4134_v21  ;;  %v1685_v26 = vperm.slane %v1683_v2, 1  ;;  %v1163_v6 = vsub.f32 %v4112_v45, %v4134_v21 }
 0x226   : > { %1443 = vrot.lane.b32.xlu0 %v1439_v37, %s5574_s21  ;;  %1513 = vrot.lane.b32.xlu1 %v1509_v3, %s3500_s27  ;;  %s5588_s21 = smov 96   ;;  %v1753_v3 = vsel %vm3879_vm8, %v1326_v52, 0.0  ;;  %v1825_v31 = vsel %vm4414_vm2, %v1326_v52, 0.0 }
 0x227   : > { %1081 = vmatpush.msrb.mxu2 %v4123_v11  ;;  %1101 = vmatpush.msrb.mxu3 %v4125_v12  ;;  %v1508_v11 = vsel %vm3883_vm11, %v4275_v17, 0.0  ;;  %v999_v12 = vsel %vm5689_vm7, %v4240_v48, %v4260_v59  ;;  %v1546_v59 = vperm.slane %v1544_v56, 5  ;;  %vm5692_vm7 = vcmp.ge.f32.partialorder %v547_v9, 0.0 }
 0x228   : > { %v1510_v48 = vperm.slane %v1508_v11, 4  ;;  %vm4405_vm4 = vmand %vm5692_vm7, %vm551_vm12  ;;  %vm5700_vm7 = vcmask 588800   ;;  %v1755_v9 = vperm.slane %v1753_v3, 3  ;;  %v1827_v11 = vperm.slane %v1825_v31, 5 }
 0x229   : > { %3218 = vmatpush.msk.msrb.mxu2 %vm3895_vm15, %v1008_v22  ;;  %3225 = vmatpush.msk.msrb.mxu3 %vm3916_vm5, %v1009_v18  ;;  %vm5699_vm12 = vmmov %vm5695_vm14  ;;  %v1580_v49 = vsel %vm4405_vm4, %v4275_v17, 0.0  ;;  %v1161_v17 = vsub.f32 %v4092_v38, %v4134_v21  ;;  %v1789_v18 = vsel %vm4358_vm1, %v1326_v52, 0.0 }
 0x22a   : > { %v989_v44 = vsel %vm5699_vm12, %v4248_v54, %v4238_v40  ;;  %vm5701_vm6 = vmmov %vm5700_vm7  ;;  %v1582_v40 = vperm.slane %v1580_v49, 6  ;;  %v1581_v54 = vperm.slane %v1579_v55, 6  ;;  %v1791_v21 = vperm.slane %v1789_v18, 4 }
 0x22b   : > { %3219 = vmatpush.msk.msrb.mxu2 %vm3879_vm8, %v998_v5  ;;  %3226 = vmatpush.msk.msrb.mxu3 %vm3883_vm11, %v999_v12  ;;  %vm5705_vm14 = vmmov %vm5702_vm0 }
 0x22c   : > { %vm5706_vm12 = vmmov %vm5702_vm0 }
 0x22d   : > { %1084 = vmatpush.msrb.mxu2 %v1048_v0  ;;  %1104 = vmatpush.msrb.mxu3 %v1049_v57 }
 0x22e   : > { %1549 = vrot.lane.b32.xlu0 %v1545_v47, %s3501_s1  ;;  %1515 = vrot.lane.b32.xlu2 %v1510_v48, %s3500_s27  ;;  %s5584_s27 = smov 94  }
 0x22f   : > { %1551 = vrot.lane.b32.xlu1 %v1546_v59, %s3501_s1  ;;  %3220 = vmatpush.msk.msrb.mxu2 %vm3895_vm15, %v988_v61  ;;  %s3502_s1 = smov 83  }
 0x230   : > { %3227 = vmatpush.msk.msrb.mxu3 %vm3916_vm5, %v989_v44  ;;  %3221 = vmatmul.msk.f32.vlgmr.msrb.gmra.mxu2 %vm5700_vm7, %v1060_v36  ;;  %vm5707_vm7 = vmmov %vm5702_vm0  ;;  %v1895_v44 = vperm.slane %v4446_v19, 7 }
 0x231   : > { %3228 = vmatmul.msk.f32.vlgmr.msrb.gmra.mxu3 %vm5701_vm6, %v1060_v36  ;;  %3253 = vmatpush.msra.mxu2 %v1247_v20  ;;  %v1615_v20 = vperm.slane %v4304_v29, 7  ;;  %vm5704_vm6 = vmmov %vm5702_vm0  ;;  %v1328_v36 = vpop.f32.mrf.mxu0 }
 0x232   : > { %3254 = vmatpush.msra.mxu3 %v1248_v24  ;;  %v1363_v24 = vpop.f32.mrf.mxu1  ;;  %v1329_v55 = vadd.f32 %v1328_v36, %v4187_v30 }
 0x233   : > { %v1364_v29 = vadd.f32 %v1363_v24, %v4177_v41 }
 0x234   : > { %v1993_v19 = vsel %vm3879_vm8, %v1329_v55, 0.0  ;;  %v2028_v24 = vsel %vm4358_vm1, %v1329_v55, 0.0 }
 0x235   : > { %v1684_v35 = vsel %vm3916_vm5, %v1364_v29, 0.0  ;;  %v1649_v38 = vsel %vm4317_vm3, %v1364_v29, 0.0  ;;  %v1720_v16 = vperm.slane %v1364_v29, 2  ;;  %v1754_v58 = vsel %vm3883_vm11, %v1364_v29, 0.0 }
 0x236   : > { %1587 = vrot.lane.b32.xlu0 %v1582_v40, %s3502_s1  ;;  %1585 = vrot.lane.b32.xlu2 %v1581_v54, %s3502_s1  ;;  %v1686_v41 = vperm.slane %v1684_v35, 1  ;;  %v1651_v37 = vperm.slane %v1649_v38, 0  ;;  %s5590_s1 = smov 95   ;;  %v1756_v15 = vperm.slane %v1754_v58, 3  ;;  %v1790_v22 = vsel %vm4364_vm9, %v1364_v29, 0.0 }
 0x237   : > { %1619 = vrot.lane.b32.xlu1 %v1615_v20, %s5586_s3  ;;  %v1792_v45 = vperm.slane %v1790_v22, 4  ;;  %v1826_v12 = vsel %vm4405_vm4, %v1364_v29, 0.0  ;;  %v1896_v61 = vperm.slane %v1649_v38, 7  ;;  %v1927_v40 = vsel %vm3895_vm15, %v1329_v55, 0.0 }
 0x238   : > { %3234 = vmatmul.msk.f32.vlgmr.msra.gmra.mxu2 %vm5702_vm0, %v1160_v60  ;;  %v1828_v57 = vperm.slane %v1826_v12, 5  ;;  %v1961_v54 = vperm.slane %v1329_v55, 1  ;;  %v2134_v58 = vsel %vm4267_vm13, %v1329_v55, 0.0 }
 0x239   : > { %3241 = vmatmul.msk.f32.vlgmr.msra.gmra.mxu3 %vm5703_vm10, %v1160_v60  ;;  %vm5708_vm10 = vmmov %vm5702_vm0 }
 0x23a   : > { %v1366_v48 = vpop.f32.mrf.mxu1 }
 0x23b   : > { %v1367_v59 = vadd.f32 %v1366_v48, %v4187_v30 }
 0x23d   : > { %v1962_v49 = vperm.slane %v1367_v59, 1  ;;  %v1928_v46 = vsel %vm3916_vm5, %v1367_v59, 0.0  ;;  %v1994_v20 = vsel %vm3883_vm11, %v1367_v59, 0.0  ;;  %v2029_v35 = vsel %vm4364_vm9, %v1367_v59, 0.0 }
 0x23e   : > { %1654 = vrot.lane.b32.xlu0 %v1650_v34, %s5584_s27  ;;  %1621 = vrot.lane.b32.xlu2 %v1616_v13, %s5586_s3  ;;  %s3508_s3 = smov 98   ;;  %v1930_v60 = vperm.slane %v1928_v46, 0  ;;  %v1996_v34 = vperm.slane %v1994_v20, 2  ;;  %v1995_v13 = vperm.slane %v1993_v19, 2  ;;  %v2065_v38 = vsel %vm4405_vm4, %v1367_v59, 0.0 }
 0x23f   : > { %1723 = vrot.lane.b32.xlu1 %v1719_v63, %s5588_s21  ;;  %v2064_v63 = vsel %vm4414_vm2, %v1329_v55, 0.0  ;;  %v2135_v31 = vsel %vm4317_vm3, %v1367_v59, 0.0 }
 0x240   : > { %3235 = vmatmul.msk.f32.gmra.mxu2 %vm5704_vm6, %v1161_v17  ;;  %vm5709_vm6 = vnez %v5678_v8 }
 0x241   : > { %3242 = vmatmul.msk.f32.gmra.mxu3 %vm5705_vm14, %v1161_v17  ;;  %v1861_v5 = vsel %vm5709_vm6, %v1326_v52, 0.0  ;;  %vm5710_vm14 = vnez %v5680_v27  ;;  %v1929_v52 = vperm.slane %v1927_v40, 0  ;;  %v2030_v17 = vperm.slane %v2028_v24, 3 }
 0x242   : > { %v1862_v56 = vsel %vm5710_vm14, %v1364_v29, 0.0  ;;  %v1863_v0 = vperm.slane %v1861_v5, 6  ;;  %v2101_v3 = vsel %vm5710_vm14, %v1367_v59, 0.0  ;;  %v2100_v2 = vsel %vm5709_vm6, %v1329_v55, 0.0 }
 0x243   : > { %v1864_v47 = vperm.slane %v1862_v56, 6 }
 0x246   : > { %1691 = vrot.lane.b32.xlu0 %v1686_v41, %s5590_s1  ;;  %1725 = vrot.lane.b32.xlu2 %v1720_v16, %s5588_s21  ;;  %s5592_s21 = smov 109   ;;  %v2066_v41 = vperm.slane %v2064_v63, 4  ;;  %v2031_v16 = vperm.slane %v2029_v35, 3 }
 0x247   : > { %1656 = vrot.lane.b32.xlu1 %v1651_v37, %s5584_s27  ;;  %s3507_s27 = smov 97  }
 0x248   : > { %3236 = vmatmul.msk.f32.gmra.mxu2 %vm5706_vm12, %v1162_v51  ;;  %vm5610_vm12 = vcmask 637952  }
 0x249   : > { %3243 = vmatmul.msk.f32.gmra.mxu3 %vm5707_vm7, %v1162_v51  ;;  %v2067_v51 = vperm.slane %v2065_v38, 4  ;;  %vm5611_vm7 = vcmask 646144  }
 0x24e   : > { %1759 = vrot.lane.b32.xlu0 %v1755_v9, %s3507_s27  ;;  %1689 = vrot.lane.b32.xlu2 %v1685_v26, %s5590_s1  ;;  %s3513_s1 = smov 115   ;;  %v2103_v9 = vperm.slane %v2101_v3, 5  ;;  %v2102_v26 = vperm.slane %v2100_v2, 5 }
 0x24f   : > { %1761 = vrot.lane.b32.xlu1 %v1756_v15, %s3507_s27  ;;  %s3509_s27 = smov 99  }
 0x250   : > { %3237 = vmatmul.msk.f32.gmra.mxu2 %vm5702_vm0, %v1163_v6  ;;  %vm1517_vm0 = vcmask 662528  }
 0x251   : > { %3244 = vmatmul.msk.f32.gmra.mxu3 %vm5708_vm10, %v1163_v6  ;;  %v2136_v6 = vperm.slane %v2134_v58, 6  ;;  %vm5612_vm10 = vcmask 654336  }
 0x256   : > { %1797 = vrot.lane.b32.xlu0 %v1792_v45, %s3508_s3  ;;  %1795 = vrot.lane.b32.xlu2 %v1791_v21, %s3508_s3  ;;  %s5598_s3 = smov 110   ;;  %v2168_v45 = vperm.slane %v1927_v40, 7  ;;  %v2137_v21 = vperm.slane %v2135_v31, 6 }
 0x257   : > { %1831 = vrot.lane.b32.xlu1 %v1827_v11, %s3509_s27  ;;  %v2169_v11 = vperm.slane %v1928_v46, 7 }
 0x25e   : > { %1867 = vrot.lane.b32.xlu0 %v1863_v0, %s5592_s21  ;;  %1833 = vrot.lane.b32.xlu2 %v1828_v57, %s3509_s27  ;;  %s3512_s27 = smov 114  }
 0x25f   : > { %1869 = vrot.lane.b32.xlu1 %v1864_v47, %s5592_s21  ;;  %s5596_s21 = smov 122  }
 0x266   : > { %1901 = vrot.lane.b32.xlu0 %v1896_v61, %s5598_s3  ;;  %1899 = vrot.lane.b32.xlu2 %v1895_v44, %s5598_s3 }
 0x267   : > { %1967 = vrot.lane.b32.xlu1 %v1962_v49, %s5661_s19 }
 0x26e   : > { %1965 = vrot.lane.b32.xlu0 %v1961_v54, %s5661_s19  ;;  %1935 = vrot.lane.b32.xlu2 %v1930_v60, %s5659_s15 }
 0x26f   : > { %1933 = vrot.lane.b32.xlu1 %v1929_v52, %s5659_s15  ;;  %v4507_v30 = vpop.permute.xlu2 %1477 }
 0x270   : > { %v1486_v57 = vmul.f32 0.0, %v4507_v30 }
 0x276   : > { %2001 = vrot.lane.b32.xlu0 %v1996_v34, %s5658_s25  ;;  %1999 = vrot.lane.b32.xlu2 %v1995_v13, %s5658_s25  ;;  %s5594_s25 = smov 125  }
 0x277   : > { %2034 = vrot.lane.b32.xlu1 %v2030_v17, %s3512_s27  ;;  %v4517_v29 = vpop.permute.xlu2 %1387 }
 0x27e   : > { %2070 = vrot.lane.b32.xlu0 %v2066_v41, %s3513_s1  ;;  %2036 = vrot.lane.b32.xlu2 %v2031_v16, %s3512_s27  ;;  %s5606_s27 = smov 124  }
 0x27f   : > { %2072 = vrot.lane.b32.xlu1 %v2067_v51, %s3513_s1  ;;  %v4525_v37 = vpop.permute.xlu2 %1410  ;;  %s3515_s1 = smov 126  }
 0x280   : > { %v827_v38 = vpop.f32.mrf.mxu2  ;;  %v847_v3 = vpop.f32.mrf.mxu3 }
 0x281   : > { %v828_v58 = vadd.f32 %v827_v38, %v3962_v25 }
 0x286   : > { %2108 = vrot.lane.b32.xlu0 %v2103_v9, %s5594_s25  ;;  %2106 = vrot.lane.b32.xlu2 %v2102_v26, %s5594_s25 }
 0x287   : > { %2140 = vrot.lane.b32.xlu1 %v2136_v6, %s3515_s1 }
 0x288   : > { %v4536_v15 = vpop.permute.xlu0 %1479  ;;  %v4538_v22 = vpop.permute.xlu2 %1515 }
 0x289   : > { %v4540_v18 = vpop.permute.xlu1 %1408 }
 0x28a   : > { %v1417_v0 = vmul.f32 0.0, %v4540_v18 }
 0x28e   : > { %2172 = vrot.lane.b32.xlu0 %v2168_v45, %s5657_s26  ;;  %2142 = vrot.lane.b32.xlu2 %v2137_v21, %s3515_s1 }
 0x28f   : > { %2174 = vrot.lane.b32.xlu1 %v2169_v11, %s5657_s26  ;;  %v850_v11 = vmax.f32 %v828_v58, 0.0 }
 0x290   : > { %v4547_v5 = vpop.permute.xlu0 %1389  ;;  %v4549_v12 = vpop.permute.xlu2 %1585 }
 0x291   : > { %v4551_v56 = vpop.permute.xlu1 %1445  ;;  %v1594_v44 = vmul.f32 0.0, %v4549_v12 }
 0x296   : > { %1423 = vrot.lane.b32.xlu0 %v1417_v0, %s5657_s26 }
 0x297   : > { %1492 = vrot.lane.b32.xlu1 %v1486_v57, %s5594_s25  ;;  %s5602_s25 = smov 123  }
 0x298   : > { %v4557_v47 = vpop.permute.xlu0 %1443  ;;  %v4559_v48 = vpop.permute.xlu2 %1621 }
 0x299   : > { %v1452_v59 = vmul.f32 0.0, %v4557_v47  ;;  %v4562_v36 = vpop.permute.xlu1 %1513 }
 0x29a   : > { %v1522_v61 = vmul.f32 0.0, %v4562_v36  ;;  %v1518_v58 = vsel %vm1517_vm0, %v4562_v36, %v4538_v22  ;;  %vm1553_vm0 = vcmask 670720  }
 0x29b   : > { %1458 = vrot.lane.b32.xlu2 %v1452_v59, %s3515_s1  ;;  %v848_v59 = vadd.f32 %v847_v3, %v3962_v25 }
 0x29e   : > { %1528 = vrot.lane.b32.xlu0 %v1522_v61, %s5606_s27  ;;  %v1413_v61 = vsel %vm5610_vm12, %v4540_v18, %v4525_v37  ;;  %s5714_s27 = smov 96   ;;  %vm5618_vm12 = vcmask 760832  }
 0x29f   : > { %1600 = vrot.lane.b32.xlu1 %v1594_v44, %s5596_s21  ;;  %s5600_s21 = smov 107  }
 0x2a0   : > { %v4569_v49 = vpop.permute.xlu0 %1549  ;;  %v4571_v55 = vpop.permute.xlu2 %1725 }
 0x2a1   : > { %v1558_v46 = vmul.f32 0.0, %v4569_v49  ;;  %v4574_v40 = vpop.permute.xlu1 %1551 }
 0x2a3   : > { %1564 = vrot.lane.b32.xlu2 %v1558_v46, %s5602_s25  ;;  %s5712_s25 = smov 95  }
 0x2a8   : > { %v4577_v54 = vpop.permute.xlu0 %1587  ;;  %v4579_v60 = vpop.permute.xlu2 %1689 }
 0x2a9   : > { %v1698_v52 = vmul.f32 0.0, %v4579_v60  ;;  %v4582_v20 = vpop.permute.xlu1 %1619 }
 0x2aa   : > { %v1628_v19 = vmul.f32 0.0, %v4582_v20 }
 0x2ab   : > { %1704 = vrot.lane.b32.xlu1 %v1698_v52, %s5598_s3  ;;  %s5711_s3 = smov 109  }
 0x2ac   : > { %1634 = vrot.lane.b32.xlu0 %v1628_v19, %s5661_s19 }
 0x2b0   : > { %v4587_v24 = vpop.permute.xlu0 %1654  ;;  %v4589_v34 = vpop.permute.xlu2 %1795 }
 0x2b1   : > { %v1663_v13 = vmul.f32 0.0, %v4587_v24  ;;  %v1804_v17 = vmul.f32 0.0, %v4589_v34  ;;  %v4593_v63 = vpop.permute.xlu1 %1723 }
 0x2b2   : > { %v1732_v35 = vmul.f32 0.0, %v4593_v63 }
 0x2b3   : > { %1669 = vrot.lane.b32.xlu2 %v1663_v13, %s5659_s15  ;;  %1810 = vrot.lane.b32.xlu1 %v1804_v17, %s5600_s21  ;;  %v1087_v2 = vpop.f32.mrf.mxu2  ;;  %s5604_s21 = smov 108   ;;  %v851_v17 = vmax.f32 %v848_v59, 0.0 }
 0x2b4   : > { %1738 = vrot.lane.b32.xlu0 %v1732_v35, %s5711_s3  ;;  %v1088_v6 = vadd.f32 %v1087_v2, %v4165_v7  ;;  %v1107_v57 = vpop.f32.mrf.mxu3 }
 0x2b5   : > { %v1108_v46 = vadd.f32 %v1107_v57, %v4165_v7  ;;  %v1448_v7 = vsel %vm5611_vm7, %v4557_v47, %v4551_v56  ;;  %vm1589_vm7 = vcmask 678912  }
 0x2b6   : > { %v4617_v0 = vmul.f32 %v1088_v6, %v850_v11  ;;  %v1554_v11 = vsel %vm1553_vm0, %v4569_v49, %v4574_v40  ;;  %vm5613_vm0 = vcmask 769024  }
 0x2b7   : > { %v4632_v25 = vmul.f32 %v1108_v46, %v851_v17 }
 0x2b8   : > { %v4599_v41 = vpop.permute.xlu0 %1691  ;;  %v4601_v16 = vpop.permute.xlu2 %1833  ;;  %v1418_v19 = vmul.f32 %v1413_v61, %v4617_v0  ;;  %v1453_v2 = vmul.f32 %v1448_v7, %v4617_v0  ;;  %v1523_v47 = vmul.f32 %v1518_v58, %v4617_v0  ;;  %v1559_v46 = vmul.f32 %v1554_v11, %v4617_v0 }
 0x2b9   : > { %v4603_v51 = vpop.permute.xlu1 %1656  ;;  %5713 = vst [vmem:[#allocation15_spill] sm:$0xff] %v4632_v25  ;;  %v1454_v35 = vmul.f32 %v4551_v56, %v4632_v25  ;;  %v1419_v56 = vmul.f32 %v4525_v37, %v4632_v25  ;;  %v1482_v37 = vsel %vm5612_vm10, %v4507_v30, %v4536_v15  ;;  %v1560_v57 = vmul.f32 %v4574_v40, %v4632_v25 }
 0x2ba   : > { %v1487_v61 = vmul.f32 %v1482_v37, %v4617_v0  ;;  %v1596_v17 = vmul.f32 %v4577_v54, %v4632_v25  ;;  %vm5614_vm10 = vcmask 785408  }
 0x2c0   : > { %v4606_v9 = vpop.permute.xlu0 %1759  ;;  %v4608_v26 = vpop.permute.xlu2 %1899 }
 0x2c1   : > { %v1768_v31 = vmul.f32 0.0, %v4606_v9  ;;  %v1907_v45 = vmul.f32 0.0, %v4608_v26  ;;  %v4613_v21 = vpop.permute.xlu1 %1761 }
 0x2c3   : > { %1774 = vrot.lane.b32.xlu2 %v1768_v31, %s5604_s21  ;;  %1913 = vrot.lane.b32.xlu1 %v1907_v45, %s5712_s25  ;;  %s5608_s21 = smov 106   ;;  %v1488_v31 = vmul.f32 %v4536_v15, %v4632_v25  ;;  %v1624_v15 = vsel %vm5618_vm12, %v4582_v20, %v4559_v48  ;;  %v1659_v20 = vsel %vm5613_vm0, %v4587_v24, %v4603_v51  ;;  %vm1763_vm0 = vcmask 793600  }
 0x2c4   : > { %v1629_v40 = vmul.f32 %v1624_v15, %v4617_v0  ;;  %v1630_v24 = vmul.f32 %v4559_v48, %v4632_v25  ;;  %v1764_v37 = vsel %vm1763_vm0, %v4606_v9, %v4613_v21  ;;  %vm1799_vm0 = vcmask 801792  }
 0x2c5   : > { %vm1498_vm12 = vcmask 1022976  }
 0x2c8   : > { %v4623_v44 = vpop.permute.xlu0 %1797  ;;  %v4657_v45 = vpop.permute.xlu2 %1935 }
 0x2c9   : > { %v4626_v52 = vpop.permute.xlu1 %1831 }
 0x2ca   : > { %v1840_v13 = vmul.f32 0.0, %v4626_v52 }
 0x2cb   : > { %1425 = vrot.lane.b32.xlu1 %v1418_v19, %s5657_s26  ;;  %v1524_v19 = vmul.f32 %v4538_v22, %v4632_v25  ;;  %v1590_v22 = vsel %vm1589_vm7, %v4549_v12, %v4577_v54  ;;  %v1728_v12 = vsel %vm5614_vm10, %v4593_v63, %v4571_v55  ;;  %vm5615_vm7 = vcmask 777216  }
 0x2cc   : > { %1846 = vrot.lane.b32.xlu0 %v1840_v13, %s5608_s21  ;;  %s5715_s21 = smov 124   ;;  %v1733_v54 = vmul.f32 %v1728_v12, %v4617_v0  ;;  %v1694_v48 = vsel %vm5615_vm7, %v4579_v60, %v4599_v41  ;;  %vm1835_vm10 = vcmask 809984   ;;  %vm5726_vm7 = vcmask 916480  }
 0x2cd   : > { %v1699_v11 = vmul.f32 %v1694_v48, %v4617_v0  ;;  %v1836_v60 = vsel %vm1835_vm10, %v4626_v52, %v4601_v16  ;;  %vm5616_vm10 = vcmask 891904   ;;  %v1800_v52 = vsel %vm1799_vm0, %v4589_v34, %v4623_v44 }
 0x2ce   : > { %v1841_v15 = vmul.f32 %v1836_v60, %v4617_v0  ;;  %vm5617_vm0 = vcmask 900096  }
 0x2d0   : > { %v4634_v18 = vpop.permute.xlu0 %1867  ;;  %v4678_v30 = vpop.permute.xlu2 %1999 }
 0x2d1   : > { %v1875_v38 = vmul.f32 0.0, %v4634_v18  ;;  %v4642_v3 = vpop.permute.xlu1 %1869 }
 0x2d3   : > { %1881 = vrot.lane.b32.xlu2 %v1875_v38, %s5714_s27  ;;  %1462 = vrot.lane.b32.xlu1 %v1454_v35, %s3515_s1  ;;  %v1595_v35 = vmul.f32 %v1590_v22, %v4617_v0  ;;  %v1665_v38 = vmul.f32 %v4603_v51, %v4632_v25  ;;  %v1877_v22 = vmul.f32 %v4642_v3, %v4632_v25 }
 0x2d4   : > { %1460 = vrot.lane.b32.xlu0 %v1453_v2, %s3515_s1  ;;  %s5716_s1 = smov 125   ;;  %v1664_v2 = vmul.f32 %v1659_v20, %v4617_v0  ;;  %v1805_v20 = vmul.f32 %v1800_v52, %v4617_v0 }
 0x2d8   : > { %v4662_v36 = vpop.permute.xlu0 %1901  ;;  %v4698_v7 = vpop.permute.xlu2 %2036 }
 0x2d9   : > { %v4653_v6 = vpop.permute.xlu1 %1967 }
 0x2db   : > { %1427 = vrot.lane.b32.xlu2 %v1419_v56, %s5657_s26  ;;  %1530 = vrot.lane.b32.xlu1 %v1523_v47, %s5715_s21  ;;  %s5717_s26 = smov 123   ;;  %v1700_v56 = vmul.f32 %v4599_v41, %v4632_v25 }
 0x2dc   : > { %1496 = vrot.lane.b32.xlu0 %v1488_v31, %s5716_s1 }
 0x2e0   : > { %v4683_v49 = vpop.permute.xlu0 %1965  ;;  %v4719_v51 = vpop.permute.xlu2 %2106 }
 0x2e1   : > { %v4671_v59 = vpop.permute.xlu1 %1933 }
 0x2e2   : > { %v1941_v48 = vmul.f32 0.0, %v4671_v59 }
 0x2e3   : > { %1494 = vrot.lane.b32.xlu2 %v1487_v61, %s5716_s1  ;;  %1568 = vrot.lane.b32.xlu1 %v1560_v57, %s5717_s26  ;;  %s5718_s1 = smov 122   ;;  %v1770_v57 = vmul.f32 %v4613_v21, %v4632_v25  ;;  %v1769_v61 = vmul.f32 %v1764_v37, %v4617_v0  ;;  %v1734_v21 = vmul.f32 %v4571_v55, %v4632_v25 }
 0x2e4   : > { %1566 = vrot.lane.b32.xlu0 %v1559_v46, %s5717_s26  ;;  %s5722_s26 = smov 107   ;;  %v1871_v55 = vsel %vm5616_vm10, %v4634_v18, %v4642_v3  ;;  %v1975_v18 = vmul.f32 %v4653_v6, %v4632_v25  ;;  %v1909_v3 = vmul.f32 %v4662_v36, %v4632_v25  ;;  %vm2038_vm10 = vcmask 932864  }
 0x2e8   : > { %v4706_v58 = vpop.permute.xlu0 %2001  ;;  %v4739_v46 = vpop.permute.xlu2 %2142 }
 0x2e9   : > { %v4688_v13 = vpop.permute.xlu1 %2034  ;;  %v2009_v52 = vmul.f32 %v4706_v58, %v4632_v25 }
 0x2eb   : > { %1532 = vrot.lane.b32.xlu2 %v1524_v19, %s5715_s21  ;;  %1636 = vrot.lane.b32.xlu1 %v1629_v40, %s5661_s19  ;;  %v1806_v40 = vmul.f32 %v4623_v44, %v4632_v25  ;;  %s5721_s21 = smov 106   ;;  %v1842_v44 = vmul.f32 %v4601_v16, %v4632_v25  ;;  %v1903_v16 = vsel %vm5617_vm0, %v4608_v26, %v4662_v36  ;;  %v1973_v36 = vmul.f32 0.0, %v4683_v49 }
 0x2ec   : > { %1604 = vrot.lane.b32.xlu0 %v1596_v17, %s5718_s1  ;;  %v1969_v26 = vsel %vm5726_vm7, %v4683_v49, %v4653_v6  ;;  %v1943_v6 = vmul.f32 %v4657_v45, %v4632_v25  ;;  %v2114_v49 = vmul.f32 0.0, %v4719_v51  ;;  %vm5732_vm7 = vcmask 908288  }
 0x2ed   : > { %v1974_v60 = vmul.f32 %v1969_v26, %v4617_v0  ;;  %vm2074_vm0 = vcmask 941056  }
 0x2f0   : > { %v4725_v31 = vpop.permute.xlu0 %2070 }
 0x2f1   : > { %v4708_v47 = vpop.permute.xlu1 %2072  ;;  %v2079_v26 = vmul.f32 0.0, %v4725_v31 }
 0x2f3   : > { %1602 = vrot.lane.b32.xlu2 %v1595_v35, %s5718_s1  ;;  %1673 = vrot.lane.b32.xlu1 %v1665_v38, %s5659_s15  ;;  %v1876_v38 = vmul.f32 %v1871_v55, %v4617_v0  ;;  %s5724_s1 = smov 94  }
 0x2f4   : > { %1671 = vrot.lane.b32.xlu0 %v1664_v2, %s5659_s15  ;;  %s5719_s15 = smov 110  }
 0x2f5   : > { %v4755_v19 = vpop.permute.xlu2 %1458 }
 0x2f8   : > { %v4746_v41 = vpop.permute.xlu0 %2108 }
 0x2f9   : > { %v4728_v63 = vpop.permute.xlu1 %2140 }
 0x2fb   : > { %1638 = vrot.lane.b32.xlu2 %v1630_v24, %s5661_s19  ;;  %1740 = vrot.lane.b32.xlu1 %v1733_v54, %s5711_s3  ;;  %s5720_s19 = smov 108   ;;  %v2007_v24 = vmul.f32 0.0, %v4678_v30 }
 0x2fc   : > { %1708 = vrot.lane.b32.xlu0 %v1700_v56, %s5719_s15  ;;  %v1908_v56 = vmul.f32 %v1903_v16, %v4617_v0 }
 0x2fd   : > { %v4776_v34 = vpop.permute.xlu2 %1564 }
 0x300   : > { %v4765_v17 = vpop.permute.xlu0 %2172 }
 0x301   : > { %v4748_v9 = vpop.permute.xlu1 %2174 }
 0x303   : > { %1706 = vrot.lane.b32.xlu2 %v1699_v11, %s5719_s15  ;;  %1778 = vrot.lane.b32.xlu1 %v1770_v57, %s5720_s19  ;;  %s5729_s15 = smov 80  }
 0x304   : > { %1776 = vrot.lane.b32.xlu0 %v1769_v61, %s5720_s19  ;;  %v2081_v61 = vmul.f32 %v4708_v47, %v4632_v25  ;;  %s3524_s19 = smov 91  }
 0x308   : > { %v4784_v2 = vpop.permute.xlu0 %1423 }
 0x309   : > { %v4770_v35 = vpop.permute.xlu1 %1492 }
 0x30b   : > { %1742 = vrot.lane.b32.xlu2 %v1734_v21, %s5711_s3  ;;  %1848 = vrot.lane.b32.xlu1 %v1841_v15, %s5721_s21  ;;  %s5723_s3 = smov 93  }
 0x30c   : > { %1814 = vrot.lane.b32.xlu0 %v1806_v40, %s5722_s26 }
 0x30d   : > { %v4791_v54 = vpop.permute.xlu2 %1669 }
 0x310   : > { %v4803_v11 = vpop.permute.xlu0 %1528 }
 0x311   : > { %v4786_v12 = vpop.permute.xlu1 %1600 }
 0x313   : > { %1812 = vrot.lane.b32.xlu2 %v1805_v20, %s5722_s26  ;;  %1885 = vrot.lane.b32.xlu1 %v1877_v22, %s5714_s27  ;;  %s5734_s26 = smov 79  }
 0x314   : > { %1883 = vrot.lane.b32.xlu0 %v1876_v38, %s5714_s27  ;;  %s3522_s27 = smov 92   ;;  %v2045_v38 = vmul.f32 %v4698_v7, %v4632_v25 }
 0x31b   : > { %1850 = vrot.lane.b32.xlu2 %v1842_v44, %s5721_s21  ;;  %1983 = vrot.lane.b32.xlu1 %v1975_v18, %s5723_s3  ;;  %v2182_v44 = vmul.f32 %v4748_v9, %v4632_v25  ;;  %v2043_v18 = vmul.f32 0.0, %v4688_v13  ;;  %s5731_s21 = smov 78  }
 0x31c   : > { %1917 = vrot.lane.b32.xlu0 %v1909_v3, %s5712_s25 }
 0x31d   : > { %v4799_v37 = vpop.permute.xlu1 %1704  ;;  %v4806_v57 = vpop.permute.xlu2 %1774 }
 0x31e   : > { %5725 = vst [vmem:[#allocation16_spill] sm:$0xff] %v4806_v57  ;;  %v4817_v21 = vpop.permute.xlu0 %1634 }
 0x323   : > { %1915 = vrot.lane.b32.xlu2 %v1908_v56, %s5712_s25  ;;  %2013 = vrot.lane.b32.xlu1 %v2007_v24, %s3522_s27  ;;  %s3523_s25 = smov 90   ;;  %v1937_v24 = vsel %vm5732_vm7, %v4671_v59, %v4657_v45  ;;  %v2039_v45 = vsel %vm2038_vm10, %v4688_v13, %v4698_v7  ;;  %vm1464_vm7 = vcmask 1031168   ;;  %vm5735_vm10 = vcmask 924672  }
 0x324   : > { %1947 = vrot.lane.b32.xlu0 %v1941_v48, %s5724_s1  ;;  %v1942_v48 = vmul.f32 %v1937_v24, %v4617_v0  ;;  %v2144_v13 = vsel %vm1464_vm7, %v4728_v63, %v4739_v46 }
 0x325   : > { %v4820_v15 = vpop.permute.xlu1 %1810  ;;  %v2149_v24 = vmul.f32 %v2144_v13, %v4617_v0 }
 0x326   : > { %5727 = vst [vmem:[#allocation17_spill] sm:$0xff] %v4820_v15  ;;  %v4836_v22 = vpop.permute.xlu0 %1738 }
 0x32b   : > { %1979 = vrot.lane.b32.xlu2 %v1973_v36, %s5723_s3  ;;  %2089 = vrot.lane.b32.xlu1 %v2081_v61, %s3523_s25  ;;  %v2116_v36 = vmul.f32 %v4746_v41, %v4632_v25 }
 0x32c   : > { %1981 = vrot.lane.b32.xlu0 %v1974_v60, %s5723_s3  ;;  %s3525_s3 = smov 2  }
 0x32d   : > { %v4822_v40 = vpop.permute.xlu2 %1881 }
 0x32e   : > { %5728 = vst [vmem:[#allocation18_spill] sm:$0xff] %v4822_v40 }
 0x333   : > { %1951 = vrot.lane.b32.xlu2 %v1943_v6, %s5724_s1  ;;  %2120 = vrot.lane.b32.xlu1 %v2114_v49, %s5729_s15  ;;  %v2150_v6 = vmul.f32 %v4739_v46, %v4632_v25  ;;  %v2044_v49 = vmul.f32 %v2039_v45, %v4617_v0 }
 0x334   : > { %2017 = vrot.lane.b32.xlu0 %v2009_v52, %s3522_s27  ;;  %v2148_v52 = vmul.f32 0.0, %v4728_v63 }
 0x335   : > { %v4832_v55 = vpop.permute.xlu1 %1913  ;;  %v4834_v20 = vpop.permute.xlu2 %1427 }
 0x336   : > { %5730 = vst [vmem:[#allocation19_spill] sm:$0xff] %v4832_v55 }
 0x33b   : > { %2053 = vrot.lane.b32.xlu2 %v2045_v38, %s3524_s19  ;;  %2190 = vrot.lane.b32.xlu1 %v2182_v44, %s5731_s21 }
 0x33c   : > { %2049 = vrot.lane.b32.xlu0 %v2043_v18, %s3524_s19  ;;  %v2075_v18 = vsel %vm2074_vm0, %v4725_v31, %v4708_v47  ;;  %v2003_v47 = vsel %vm5735_vm10, %v4678_v30, %v4706_v58  ;;  %vm5736_vm0 = vcmask 1039360   ;;  %vm5635_vm10 = vcmask 629760  }
 0x33d   : > { %v4844_v3 = vpop.permute.xlu2 %1494  ;;  %v4846_v16 = vpop.permute.xlu1 %1425 }
 0x33e   : > { %v4851_v56 = vpop.permute.xlu0 %1846 }
 0x33f   : > { %5733 = vst [vmem:[#allocation20_spill] sm:$0xff] %v4851_v56 }
 0x343   : > { %2085 = vrot.lane.b32.xlu2 %v2079_v26, %s3523_s25  ;;  %1949 = vrot.lane.b32.xlu1 %v1942_v48, %s5724_s1  ;;  %v2180_v48 = vmul.f32 0.0, %v4765_v17  ;;  %v1331_v26 = vpop.f32.mrf.mxu2  ;;  %s3528_s1 = smov 14  }
 0x344   : > { %2124 = vrot.lane.b32.xlu0 %v2116_v36, %s5729_s15  ;;  %v2080_v36 = vmul.f32 %v2075_v18, %v4617_v0  ;;  %v4892_v63 = vadd.f32 %v1331_v26, %v4183_v50 }
 0x345   : > { %v4860_v61 = vpop.permute.xlu2 %1532  ;;  %v4862_v60 = vpop.permute.xlu1 %1462 }
 0x346   : > { %v4866_v59 = vpop.permute.xlu0 %1460  ;;  %v2217_v18 = vsel %vm3879_vm8, %v4892_v63, 0.0  ;;  %v2200_v28 = vperm.slane %v4892_v63, 0 }
 0x34b   : > { %2158 = vrot.lane.b32.xlu2 %v2150_v6, %s5734_s26  ;;  %2051 = vrot.lane.b32.xlu1 %v2044_v49, %s3524_s19  ;;  %v2176_v6 = vsel %vm5736_vm0, %v4765_v17, %v4748_v9  ;;  %v2008_v49 = vmul.f32 %v2003_v47, %v4617_v0  ;;  %v2110_v9 = vsel %vm1498_vm12, %v4719_v51, %v4746_v41  ;;  %s3533_s19 = smov 30  }
 0x34c   : > { %2154 = vrot.lane.b32.xlu0 %v2148_v52, %s5734_s26  ;;  %v2431_v52 = vperm.slane %v4892_v63, 7  ;;  %v2181_v13 = vmul.f32 %v2176_v6, %v4617_v0  ;;  %v2115_v26 = vmul.f32 %v2110_v9, %v4617_v0 }
 0x34d   : > { %v4874_v38 = vpop.permute.xlu2 %1602  ;;  %v4876_v44 = vpop.permute.xlu1 %1530 }
 0x34e   : > { %v4881_v7 = vpop.permute.xlu0 %1496 }
 0x353   : > { %2186 = vrot.lane.b32.xlu2 %v2180_v48, %s5731_s21  ;;  %2156 = vrot.lane.b32.xlu1 %v2149_v24, %s5734_s26  ;;  %v1369_v24 = vpop.f32.mrf.mxu3  ;;  %v2252_v48 = vsel %vm4358_vm1, %v4892_v63, 0.0  ;;  %s3535_s26 = smov 76  }
 0x354   : > { %2087 = vrot.lane.b32.xlu0 %v2080_v36, %s3523_s25  ;;  %v2219_v36 = vperm.slane %v2217_v18, 1  ;;  %v4929_v47 = vadd.f32 %v1369_v24, %v4183_v50  ;;  %v2254_v6 = vperm.slane %v2252_v48, 2  ;;  %s3529_s25 = smov 19  }
 0x355   : > { %v4894_v46 = vpop.permute.xlu2 %1638  ;;  %v4896_v45 = vpop.permute.xlu1 %1568 }
 0x356   : > { %v4901_v31 = vpop.permute.xlu0 %1566  ;;  %v2289_v50 = vsel %vm4405_vm4, %v4929_v47, 0.0  ;;  %v2432_v9 = vperm.slane %v4929_v47, 7 }
 0x357   : > { %v2291_v24 = vperm.slane %v2289_v50, 3  ;;  %v2324_v50 = vsel %vm5709_vm6, %v4892_v63, 0.0 }
 0x35b   : > { %2015 = vrot.lane.b32.xlu2 %v2008_v49, %s3522_s27  ;;  %2435 = vrot.lane.b32.xlu1 %v2431_v52, %s5660_s22  ;;  %v2253_v52 = vsel %vm4364_vm9, %v4929_v47, 0.0  ;;  %s3526_s27 = smov 3  }
 0x35c   : > { %2188 = vrot.lane.b32.xlu0 %v2181_v13, %s5731_s21  ;;  %v1398_v13 = vmul.f32 %v4547_v5, %v4632_v25  ;;  %v2255_v18 = vperm.slane %v2253_v52, 2  ;;  %v2218_v52 = vsel %vm3883_vm11, %v4929_v47, 0.0  ;;  %s3534_s21 = smov 61  }
 0x35d   : > { %v4912_v30 = vpop.permute.xlu2 %1706  ;;  %v4914_v58 = vpop.permute.xlu1 %1636 }
 0x35e   : > { %v4919_v17 = vpop.permute.xlu0 %1604  ;;  %v1436_v48 = vadd.f32 %v4834_v20, %v1398_v13 }
 0x363   : > { %2122 = vrot.lane.b32.xlu2 %v2115_v26, %s5729_s15  ;;  %2223 = vrot.lane.b32.xlu1 %v2219_v36, %s5656_s0  ;;  %v1472_v26 = vadd.f32 %v4862_v60, %v1436_v48  ;;  %s3532_s15 = smov 31  }
 0x364   : > { %2258 = vrot.lane.b32.xlu0 %v2254_v6, %s3525_s3 }
 0x365   : > { %v4933_v51 = vpop.permute.xlu2 %1742  ;;  %v4935_v41 = vpop.permute.xlu1 %1673  ;;  %v1506_v13 = vadd.f32 %v4881_v7, %v1472_v26 }
 0x366   : > { %v4937_v49 = vpop.permute.xlu0 %1671 }
 0x367   : > { %v1542_v32 = vadd.f32 %v4860_v61, %v1506_v13  ;;  %v1372_v13 = vpop.f32.mrf.mxu3 }
 0x369   : > { %v1578_v55 = vadd.f32 %v4896_v45, %v1542_v32  ;;  %v2397_v32 = vsel %vm3916_vm5, %v4929_v47, 0.0 }
 0x36a   : > { %v2399_v15 = vperm.slane %v2397_v32, 6 }
 0x36b   : > { %2437 = vrot.lane.b32.xlu2 %v2432_v9, %s5660_s22  ;;  %2260 = vrot.lane.b32.xlu1 %v2255_v18, %s3525_s3  ;;  %v2360_v9 = vsel %vm4267_vm13, %v4892_v63, 0.0  ;;  %v2220_v18 = vperm.slane %v2218_v52, 1  ;;  %s3527_s22 = smov 13   ;;  %v2288_v52 = vsel %vm4414_vm2, %v4892_v63, 0.0  ;;  %s3536_s3 = smov 75  }
 0x36c   : > { %2296 = vrot.lane.b32.xlu0 %v2291_v24, %s3526_s27  ;;  %v2326_v24 = vperm.slane %v2324_v50, 4  ;;  %v2362_v48 = vperm.slane %v2360_v9, 5  ;;  %v2361_v50 = vsel %vm4317_vm3, %v4929_v47, 0.0  ;;  %v1614_v9 = vadd.f32 %v4919_v17, %v1578_v55 }
 0x36d   : > { %v4952_v36 = vpop.permute.xlu2 %1812  ;;  %v4954_v6 = vpop.permute.xlu1 %1740 }
 0x36e   : > { %5737 = vst [vmem:[#allocation21_spill] sm:$0xff] %v4952_v36  ;;  %v4956_v14 = vpop.permute.xlu0 %1708  ;;  %v1647_v36 = vadd.f32 %v4894_v46, %v1614_v9 }
 0x370   : > { %v1682_v57 = vadd.f32 %v4935_v41, %v1647_v36 }
 0x372   : > { %v1718_v36 = vadd.f32 %v4956_v14, %v1682_v57 }
 0x373   : > { %2225 = vrot.lane.b32.xlu2 %v2220_v18, %s5656_s0  ;;  %2330 = vrot.lane.b32.xlu1 %v2326_v24, %s3527_s22  ;;  %v2290_v18 = vperm.slane %v2288_v52, 3  ;;  %v2363_v24 = vperm.slane %v2361_v50, 5  ;;  %v2325_v52 = vsel %vm5710_vm14, %v4929_v47, 0.0  ;;  %s5741_s0 = smov 77  }
 0x374   : > { %2366 = vrot.lane.b32.xlu0 %v2362_v48, %s3528_s1  ;;  %v4989_v48 = vadd.f32 %v1372_v13, %v4193_v33  ;;  %v2201_v13 = vperm.slane %v4929_v47, 0  ;;  %v2327_v9 = vperm.slane %v2325_v52, 4 }
 0x375   : > { %v4972_v40 = vpop.permute.xlu2 %1850  ;;  %v4974_v26 = vpop.permute.xlu1 %1778 }
 0x376   : > { %v4976_v56 = vpop.permute.xlu0 %1776  ;;  %v5007_v50 = vsel %vm3883_vm11, %v4989_v48, 0.0 }
 0x377   : > { %5738 = vst [vmem:[#allocation22_spill] sm:$0xff] %v4976_v56  ;;  %v2467_v32 = vperm.slane %v5007_v50, 0 }
 0x378   : > { %5740 = vst [vmem:[#allocation24_spill] sm:$0xff] %v5007_v50 }
 0x37b   : > { %2294 = vrot.lane.b32.xlu2 %v2290_v18, %s3526_s27  ;;  %2368 = vrot.lane.b32.xlu1 %v2363_v24, %s3528_s1  ;;  %v2203_v24 = vmul.f32 %v2201_v13, %v4632_v25  ;;  %s3537_s27 = smov 64   ;;  %s3539_s1 = smov 63  }
 0x37c   : > { %2404 = vrot.lane.b32.xlu0 %v2399_v15, %s5655_s28  ;;  %v1334_v15 = vpop.f32.mrf.mxu2 }
 0x37d   : > { %v4995_v55 = vpop.permute.xlu2 %1915  ;;  %v4997_v56 = vpop.permute.xlu1 %1848  ;;  %v5013_v18 = vadd.f32 %v1334_v15, %v4193_v33  ;;  %v2396_v33 = vsel %vm3895_vm15, %v4892_v63, 0.0  ;;  %v1430_v63 = vsel %vm5736_vm0, %v4846_v16, %v4834_v20 }
 0x37e   : > { %5739 = vst [vmem:[#allocation23_spill] sm:$0xff] %v4995_v55  ;;  %v4999_v4 = vpop.permute.xlu0 %1814  ;;  %v1752_v55 = vadd.f32 %v4933_v51, %v1718_v36  ;;  %v2398_v36 = vperm.slane %v2396_v33, 6  ;;  %v1396_v33 = vmul.f32 0.0, %v4517_v29 }
 0x37f   : > { %v2535_v13 = vsel %vm4414_vm2, %v5013_v18, 0.0 }
 0x380   : > { %v1788_v47 = vadd.f32 %v4974_v26, %v1752_v55  ;;  %v5037_v55 = vsel %vm3879_vm8, %v5013_v18, 0.0 }
 0x381   : > { %5742 = vst [vmem:[#allocation25_spill] sm:$0xff] %v5037_v55 }
 0x382   : > { %v1824_v15 = vadd.f32 %v4999_v4, %v1788_v47  ;;  %v1429_v47 = vsel %vm5736_vm0, %v4784_v2, %v4846_v16  ;;  %v1392_v2 = vsel %vm5635_vm10, %v4517_v29, %v4547_v5  ;;  %v1466_v29 = vsel %vm1464_vm7, %v4866_v59, %v4862_v60 }
 0x383   : > { %2332 = vrot.lane.b32.xlu2 %v2327_v9, %s3527_s22  ;;  %2472 = vrot.lane.b32.xlu1 %v2467_v32, %s5654_s18  ;;  %v2537_v9 = vperm.slane %v2535_v13, 2  ;;  %v2466_v32 = vperm.slane %v5037_v55, 0  ;;  %v1434_v50 = vadd.f32 %v1429_v47, %v1396_v33  ;;  %v2500_v55 = vsel %vm4364_vm9, %v4989_v48, 0.0  ;;  %s3538_s22 = smov 74  }
 0x384   : > { %2208 = vrot.lane.b32.xlu0 %v2203_v24, %s5741_s0  ;;  %v1860_v24 = vadd.f32 %v4972_v40, %v1824_v15  ;;  %v2202_v5 = vmul.f32 %v2200_v28, %v4617_v0  ;;  %vm1534_vm0 = vcmask 1014784   ;;  %v1500_v47 = vsel %vm1498_vm12, %v4844_v3, %v4881_v7 }
 0x385   : > { %v5021_v43 = vpop.permute.xlu2 %1979  ;;  %v5023_v57 = vpop.permute.xlu1 %1885  ;;  %v2502_v33 = vperm.slane %v2500_v55, 1  ;;  %vm1570_vm10 = vcmask 1006592   ;;  %v1499_v60 = vsel %vm1498_vm12, %v4770_v35, %v4844_v3  ;;  %vm1606_vm12 = vcmask 998400  }
 0x386   : > { %v5025_v52 = vpop.permute.xlu0 %1883  ;;  %v1894_v13 = vadd.f32 %v5023_v57, %v1860_v24  ;;  %v1397_v24 = vmul.f32 %v1392_v2, %v4617_v0  ;;  %v1571_v35 = vsel %vm1570_vm10, %v4776_v34, %v4901_v31  ;;  %v2571_v2 = vsel %vm5709_vm6, %v5013_v18, 0.0 }
 0x388   : > { %v1435_v16 = vadd.f32 %v1430_v63, %v1397_v24  ;;  %v1536_v63 = vsel %vm1534_vm0, %v4876_v44, %v4860_v61  ;;  %v1607_v61 = vsel %vm1606_vm12, %v4786_v12, %v4874_v38  ;;  %v2536_v12 = vsel %vm4405_vm4, %v4989_v48, 0.0 }
 0x38b   : > { %2402 = vrot.lane.b32.xlu2 %v2398_v36, %s5655_s28  ;;  %2541 = vrot.lane.b32.xlu1 %v2537_v9, %s3529_s25  ;;  %v2572_v36 = vsel %vm5710_vm14, %v4989_v48, 0.0  ;;  %v1465_v9 = vsel %vm1464_vm7, %v4755_v19, %v4866_v59  ;;  %s3531_s28 = smov 18   ;;  %vm5743_vm7 = vcmask 916480  }
 0x38c   : > { %2470 = vrot.lane.b32.xlu0 %v2466_v32, %s5654_s18  ;;  %v2574_v20 = vperm.slane %v2572_v36, 3  ;;  %v1470_v19 = vadd.f32 %v1465_v9, %v1434_v50  ;;  %s5641_s18 = smov 29   ;;  %v1572_v9 = vsel %vm1570_vm10, %v4901_v31, %v4896_v45  ;;  %vm5744_vm10 = vcmask 908288  }
 0x38d   : > { %v5050_v42 = vpop.permute.xlu2 %1951  ;;  %v5052_v15 = vpop.permute.xlu1 %1983 }
 0x38e   : > { %v5066_v32 = vpop.permute.xlu0 %1917  ;;  %v1504_v59 = vadd.f32 %v1499_v60, %v1470_v19  ;;  %v2608_v60 = vsel %vm4317_vm3, %v4989_v48, 0.0 }
 0x38f   : > { %v1926_v27 = vadd.f32 %v5066_v32, %v1894_v13  ;;  %v1471_v13 = vadd.f32 %v1466_v29, %v1435_v16  ;;  %v2573_v16 = vperm.slane %v2571_v2, 3  ;;  %v2607_v2 = vsel %vm4267_vm13, %v5013_v18, 0.0 }
 0x391   : > { %v1960_v25 = vadd.f32 %v5050_v42, %v1926_v27  ;;  %v1535_v27 = vsel %vm1534_vm0, %v4803_v11, %v4876_v44  ;;  %v1505_v7 = vadd.f32 %v1500_v47, %v1471_v13  ;;  %v2643_v11 = vsel %vm3895_vm15, %v5013_v18, 0.0 }
 0x392   : > { %v1540_v36 = vadd.f32 %v1535_v27, %v1504_v59  ;;  %v1640_v44 = vsel %vm5743_vm7, %v4817_v21, %v4914_v58  ;;  %vm5745_vm0 = vcmask 760832  }
 0x393   : > { %2206 = vrot.lane.b32.xlu2 %v2202_v5, %s5741_s0  ;;  %2579 = vrot.lane.b32.xlu1 %v2574_v20, %s5641_s18  ;;  %v5084_v28 = vadd.f32 %v5052_v15, %v1960_v25  ;;  %v2499_v25 = vsel %vm4358_vm1, %v5013_v18, 0.0  ;;  %v1541_v24 = vadd.f32 %v1536_v63, %v1505_v7  ;;  %v2645_v5 = vperm.slane %v2643_v11, 5  ;;  %v5751_v63 = vld [vmem:[#allocation22_spill] sm:$0xff]  ;;  %s3540_s0 = smov 62  }
 0x394   : > { %2507 = vrot.lane.b32.xlu0 %v2502_v33, %s3531_s28  ;;  %v2501_v34 = vperm.slane %v2499_v25, 1  ;;  %v1576_v29 = vadd.f32 %v1571_v35, %v1540_v36  ;;  %v1608_v20 = vsel %vm1606_vm12, %v4874_v38, %v4919_v17  ;;  %v1675_v33 = vsel %vm5744_vm10, %v4791_v54, %v4937_v49  ;;  %vm5746_vm12 = vmmov %vm5743_vm7 }
 0x395   : > { %v5092_v50 = vpop.permute.xlu2 %2053  ;;  %v5094_v55 = vpop.permute.xlu1 %2013  ;;  %v1577_v19 = vadd.f32 %v1572_v9, %v1541_v24  ;;  %v1641_v54 = vsel %vm5746_vm12, %v4914_v58, %v4894_v46  ;;  %vm5747_vm7 = vmmov %vm5744_vm10  ;;  %v2538_v25 = vperm.slane %v2536_v12, 2  ;;  %vm5748_vm10 = vcmask 900096   ;;  %v5752_v9 = vld [vmem:[#allocation16_spill] sm:$0xff] }
 0x396   : > { %v5102_v3 = vpop.permute.xlu0 %1947  ;;  %v1612_v45 = vadd.f32 %v1607_v61, %v1576_v29  ;;  %v1676_v27 = vsel %vm5747_vm7, %v4937_v49, %v4935_v41  ;;  %v2610_v35 = vperm.slane %v2608_v60, 4  ;;  %vm5749_vm11 = vmmov %vm5748_vm10  ;;  %vm5750_vm12 = vcmask 891904   ;;  %v5754_v61 = vld [vmem:[#allocation21_spill] sm:$0xff] }
 0x397   : > { %v1613_v31 = vadd.f32 %v1608_v20, %v1577_v19  ;;  %v1711_v46 = vsel %vm5749_vm11, %v4799_v37, %v4912_v30  ;;  %v1745_v58 = vsel %vm5750_vm12, %v4836_v22, %v4954_v6  ;;  %vm1816_vm11 = vcmask 875520   ;;  %vm5753_vm7 = vmmov %vm5750_vm12 }
 0x398   : > { %v1645_v38 = vadd.f32 %v1640_v44, %v1612_v45  ;;  %v1746_v24 = vsel %vm5753_vm7, %v4954_v6, %v4933_v51  ;;  %v1818_v44 = vsel %vm1816_vm11, %v5754_v61, %v4999_v4  ;;  %v5755_v51 = vld [vmem:[#allocation17_spill] sm:$0xff]  ;;  %v5757_v4 = vld [vmem:[#allocation18_spill] sm:$0xff]  ;;  %vm2019_vm7 = vcmask 752640  }
 0x399   : > { %v1646_v59 = vadd.f32 %v1641_v54, %v1613_v31  ;;  %v1817_v6 = vsel %vm1816_vm11, %v5755_v51, %v5754_v61  ;;  %v5756_v31 = vld [vmem:[#allocation20_spill] sm:$0xff]  ;;  %vm5762_vm11 = vcmask 777216  }
 0x39a   : > { %v1680_v7 = vadd.f32 %v1675_v33, %v1645_v38 }
 0x39b   : > { %2505 = vrot.lane.b32.xlu2 %v2501_v34, %s3531_s28  ;;  %2649 = vrot.lane.b32.xlu1 %v2645_v5, %s3532_s15  ;;  %v1681_v11 = vadd.f32 %v1676_v27, %v1646_v59  ;;  %v2609_v5 = vperm.slane %v2607_v2, 4  ;;  %s3542_s28 = smov 58  }
 0x39c   : > { %2577 = vrot.lane.b32.xlu0 %v2573_v16, %s5641_s18  ;;  %v1716_v41 = vadd.f32 %v1711_v46, %v1680_v7  ;;  %v2644_v7 = vsel %vm3916_vm5, %v4989_v48, 0.0  ;;  %s3554_s18 = smov 50  }
 0x39d   : > { %v5125_v47 = vpop.permute.xlu2 %2085  ;;  %v5127_v17 = vpop.permute.xlu1 %2089 }
 0x39e   : > { %v5132_v13 = vpop.permute.xlu0 %1981  ;;  %v1750_v34 = vadd.f32 %v1745_v58, %v1716_v41  ;;  %v2646_v58 = vperm.slane %v2644_v7, 5  ;;  %v5761_v41 = vld [vmem:[#allocation23_spill] sm:$0xff] }
 0x39f   : > { %v5140_v21 = vsel %vm5745_vm0, %v5132_v13, %v5052_v15  ;;  %v1712_v15 = vsel %vm5748_vm10, %v4912_v30, %v4956_v14  ;;  %vm1780_vm0 = vcmask 883712   ;;  %vm1852_vm10 = vcmask 867328  }
 0x3a0   : > { %v1717_v49 = vadd.f32 %v1712_v15, %v1681_v11  ;;  %v1781_v37 = vsel %vm1780_vm0, %v5752_v9, %v5751_v63  ;;  %v1782_v29 = vsel %vm1780_vm0, %v5751_v63, %v4974_v26  ;;  %v1853_v26 = vsel %vm1852_vm10, %v5756_v31, %v4997_v56  ;;  %v5763_v63 = vld [vmem:[#allocation19_spill] sm:$0xff] }
 0x3a1   : > { %v1786_v16 = vadd.f32 %v1781_v37, %v1750_v34  ;;  %vm5758_vm0 = vcmask 785408   ;;  %v1854_v15 = vsel %vm1852_vm10, %v4997_v56, %v4972_v40  ;;  %vm5765_vm10 = vcmask 769024  }
 0x3a2   : > { %v1751_v20 = vadd.f32 %v1746_v24, %v1717_v49  ;;  %v1887_v54 = vsel %vm5758_vm0, %v5757_v4, %v5025_v52  ;;  %vm5760_vm12 = vmmov %vm5758_vm0  ;;  %v1920_v49 = vsel %vm5762_vm11, %v5761_v41, %v5066_v32 }
 0x3a3   : > { %2543 = vrot.lane.b32.xlu2 %v2538_v25, %s3529_s25  ;;  %v1822_v33 = vadd.f32 %v1817_v6, %v1786_v16  ;;  %vm5764_vm0 = vmmov %vm5762_vm11  ;;  %vm5767_vm11 = vcmask 760832   ;;  %s3541_s25 = smov 60  }
 0x3a4   : > { %2615 = vrot.lane.b32.xlu0 %v2610_v35, %s3533_s19  ;;  %v1787_v45 = vadd.f32 %v1782_v29, %v1751_v20  ;;  %v1888_v35 = vsel %vm5760_vm12, %v5025_v52, %v5023_v57  ;;  %v1919_v9 = vsel %vm5764_vm0, %v5763_v63, %v5761_v41  ;;  %vm5766_vm12 = vmmov %vm5765_vm10  ;;  %v1985_v16 = vsel %vm5767_vm11, %v5021_v43, %v5132_v13 }
 0x3a5   : > { %v5162_v36 = vpop.permute.xlu2 %2158  ;;  %v2121_v14 = vpop.permute.xlu1 %2120  ;;  %v1858_v25 = vadd.f32 %v1853_v26, %v1822_v33  ;;  %vm5768_vm0 = vcmask 654336   ;;  %vm5770_vm11 = vcmask 646144  }
 0x3a6   : > { %v2018_v30 = vpop.permute.xlu0 %2017  ;;  %v1823_v12 = vadd.f32 %v1818_v44, %v1787_v45  ;;  %vm5771_vm3 = vmmov %vm5770_vm11 }
 0x3a7   : > { %v2027_v22 = vadd.f32 %v2018_v30, %v5084_v28  ;;  %v1892_v46 = vadd.f32 %v1887_v54, %v1858_v25 }
 0x3a8   : > { %v1859_v11 = vadd.f32 %v1854_v15, %v1823_v12 }
 0x3a9   : > { %v2063_v19 = vadd.f32 %v5092_v50, %v2027_v22  ;;  %v1924_v37 = vadd.f32 %v1919_v9, %v1892_v46 }
 0x3aa   : > { %v1893_v2 = vadd.f32 %v1888_v35, %v1859_v11 }
 0x3ab   : > { %2613 = vrot.lane.b32.xlu2 %v2609_v5, %s3533_s19  ;;  %v2099_v28 = vadd.f32 %v5127_v17, %v2063_v19 }
 0x3ac   : > { %v1925_v40 = vadd.f32 %v1920_v49, %v1893_v2 }
 0x3ad   : > { %v5187_v38 = vpop.permute.xlu2 %2186  ;;  %v5189_v60 = vpop.permute.xlu1 %2190 }
 0x3ae   : > { %v2050_v27 = vpop.permute.xlu0 %2049 }
 0x3b3   : > { %2651 = vrot.lane.b32.xlu2 %v2646_v58, %s3532_s15 }
 0x3b5   : > { %v2016_v56 = vpop.permute.xlu2 %2015  ;;  %v1950_v34 = vpop.permute.xlu1 %1949 }
 0x3b6   : > { %v2020_v57 = vsel %vm2019_vm7, %v5094_v55, %v2016_v56  ;;  %v2021_v52 = vsel %vm2019_vm7, %v2016_v56, %v2018_v30  ;;  %v1953_v22 = vsel %vm5765_vm10, %v5102_v3, %v1950_v34  ;;  %v1954_v32 = vsel %vm5766_vm12, %v1950_v34, %v5050_v42  ;;  %v2125_v24 = vpop.permute.xlu0 %2124  ;;  %vm5769_vm10 = vmmov %vm5768_vm0 }
 0x3b7   : > { %v1958_v29 = vadd.f32 %v1953_v22, %v1924_v37  ;;  %v1959_v5 = vadd.f32 %v1954_v32, %v1925_v40  ;;  %v2133_v20 = vadd.f32 %v2125_v24, %v2099_v28  ;;  %vm2055_vm7 = vcmask 744448  }
 0x3b8   : > { %vm2091_vm12 = vcmask 736256  }
 0x3b9   : > { %v1990_v19 = vadd.f32 %v1985_v16, %v1958_v29  ;;  %v1991_v61 = vadd.f32 %v5140_v21, %v1959_v5  ;;  %v2167_v55 = vadd.f32 %v5162_v36, %v2133_v20 }
 0x3bb   : > { %v2025_v30 = vadd.f32 %v2020_v57, %v1990_v19  ;;  %v2026_v44 = vadd.f32 %v2021_v52, %v1991_v61  ;;  %v5221_v3 = vadd.f32 %v5189_v60, %v2167_v55 }
 0x3bd   : > { %v2123_v42 = vpop.permute.xlu2 %2122  ;;  %v2052_v45 = vpop.permute.xlu1 %2051 }
 0x3be   : > { %v2126_v51 = vsel %vm5768_vm0, %v2121_v14, %v2123_v42  ;;  %v2127_v28 = vsel %vm5769_vm10, %v2123_v42, %v2125_v24  ;;  %v2056_v6 = vsel %vm2055_vm7, %v2050_v27, %v2052_v45  ;;  %v2057_v43 = vsel %vm2055_vm7, %v2052_v45, %v5092_v50  ;;  %v2155_v13 = vpop.permute.xlu0 %2154 }
 0x3bf   : > { %v2061_v31 = vadd.f32 %v2056_v6, %v2025_v30  ;;  %v2062_v21 = vadd.f32 %v2057_v43, %v2026_v44  ;;  %vm2298_vm0 = vcmask 23552   ;;  %vm2262_vm10 = vcmask 15360  }
 0x3c5   : > { %v5226_v26 = vpop.permute.xlu2 %2437  ;;  %v2157_v33 = vpop.permute.xlu1 %2156 }
 0x3c6   : > { %v2445_v12 = vmul.f32 0.0, %v5226_v26  ;;  %v2160_v4 = vsel %vm5770_vm11, %v2155_v13, %v2157_v33  ;;  %v2161_v54 = vsel %vm5771_vm3, %v2157_v33, %v5162_v36  ;;  %v2088_v14 = vpop.permute.xlu0 %2087  ;;  %vm5772_vm3 = vcmask 637952  }
 0x3c7   : > { %v2092_v7 = vsel %vm2091_vm12, %v5125_v47, %v2088_v14  ;;  %v2093_v27 = vsel %vm2091_vm12, %v2088_v14, %v5127_v17  ;;  %vm5773_vm7 = vmmov %vm5772_vm3  ;;  %vm5775_vm12 = vcmask 121856   ;;  %vm5776_vm11 = vcmask 629760  }
 0x3c8   : > { %v2097_v50 = vadd.f32 %v2092_v7, %v2061_v31  ;;  %v2098_v25 = vadd.f32 %v2093_v27, %v2062_v21  ;;  %2453 = vrot.lane.b32.xlu2 %v2445_v12, %s3534_s21 }
 0x3ca   : > { %v2131_v15 = vadd.f32 %v2126_v51, %v2097_v50  ;;  %v2132_v35 = vadd.f32 %v2127_v28, %v2098_v25  ;;  %v5774_v28 = vld [vmem:[#allocation15_spill] sm:$0xff] }
 0x3cc   : > { %v2165_v11 = vadd.f32 %v2160_v4, %v2131_v15  ;;  %v2166_v46 = vadd.f32 %v2161_v54, %v2132_v35 }
 0x3cd   : > { %v5235_v58 = vpop.permute.xlu2 %2225  ;;  %v5237_v41 = vpop.permute.xlu1 %2435 }
 0x3ce   : > { %v2233_v36 = vmul.f32 0.0, %v5235_v58  ;;  %v2443_v47 = vmul.f32 %v5237_v41, %v4617_v0  ;;  %v2189_v49 = vpop.permute.xlu0 %2188 }
 0x3cf   : > { %v2192_v17 = vsel %vm5772_vm3, %v5187_v38, %v2189_v49  ;;  %v2193_v2 = vsel %vm5773_vm7, %v2189_v49, %v5189_v60  ;;  %vm2370_vm3 = vcmask 113664   ;;  %vm5777_vm7 = vcmask 130048  }
 0x3d0   : > { %v2197_v63 = vadd.f32 %v2192_v17, %v2165_v11  ;;  %v2198_v9 = vadd.f32 %v2193_v2, %v2166_v46  ;;  %2241 = vrot.lane.b32.xlu2 %v2233_v36, %s3535_s26  ;;  %2449 = vrot.lane.b32.xlu0 %v2443_v47, %s3534_s21  ;;  %v2439_v50 = vsel %vm5777_vm7, %v5237_v41, %v5226_v26  ;;  %vm5638_vm7 = vcmask 236544  }
 0x3d1   : > { %v2444_v15 = vmul.f32 %v2439_v50, %v5774_v28 }
 0x3d5   : > { %v2295_v40 = vpop.permute.xlu2 %2294  ;;  %v5248_v56 = vpop.permute.xlu1 %2223 }
 0x3d6   : > { %v2231_v37 = vmul.f32 %v5248_v56, %v4617_v0  ;;  %v2259_v34 = vpop.permute.xlu0 %2258  ;;  %v2303_v20 = vmul.f32 %v2295_v40, %v4617_v0 }
 0x3d7   : > { %v2267_v57 = vmul.f32 %v2259_v34, %v4617_v0 }
 0x3d8   : > { %2237 = vrot.lane.b32.xlu0 %v2231_v37, %s3535_s26 }
 0x3d9   : > { %2273 = vrot.lane.b32.xlu2 %v2267_v57, %s3536_s3 }
 0x3dd   : > { %v5255_v38 = vpop.permute.xlu2 %2332  ;;  %v2261_v60 = vpop.permute.xlu1 %2260 }
 0x3de   : > { %v2341_v52 = vmul.f32 0.0, %v5255_v38  ;;  %v2269_v22 = vmul.f32 0.0, %v2261_v60  ;;  %v2297_v32 = vpop.permute.xlu0 %2296  ;;  %v2263_v13 = vsel %vm2262_vm10, %v2259_v34, %v2261_v60  ;;  %vm2334_vm10 = vcmask 105472  }
 0x3df   : > { %v2305_v24 = vmul.f32 0.0, %v2297_v32  ;;  %v2299_v55 = vsel %vm2298_vm0, %v2295_v40, %v2297_v32  ;;  %v2268_v12 = vmul.f32 %v2263_v13, %v5774_v28  ;;  %vm5778_vm0 = vcmask 7168  }
 0x3e0   : > { %2277 = vrot.lane.b32.xlu1 %v2269_v22, %s3536_s3  ;;  %v2304_v6 = vmul.f32 %v2299_v55, %v5774_v28  ;;  %v2227_v26 = vsel %vm5778_vm0, %v5248_v56, %v5235_v58  ;;  %vm2545_vm0 = vcmask 154624  }
 0x3e1   : > { %2349 = vrot.lane.b32.xlu2 %v2341_v52, %s3537_s27  ;;  %2313 = vrot.lane.b32.xlu0 %v2305_v24, %s3538_s22  ;;  %v2232_v36 = vmul.f32 %v2227_v26, %v5774_v28 }
 0x3e5   : > { %v2403_v29 = vpop.permute.xlu2 %2402  ;;  %v2331_v5 = vpop.permute.xlu1 %2330 }
 0x3e6   : > { %v2339_v16 = vmul.f32 %v2331_v5, %v4617_v0  ;;  %v2367_v19 = vpop.permute.xlu0 %2366  ;;  %v2410_v21 = vmul.f32 %v2403_v29, %v4617_v0  ;;  %v2335_v2 = vsel %vm2334_vm10, %v2331_v5, %v5255_v38  ;;  %vm5640_vm10 = vcmask 252928  }
 0x3e7   : > { %v2375_v61 = vmul.f32 %v2367_v19, %v4617_v0 }
 0x3e8   : > { %2309 = vrot.lane.b32.xlu1 %v2303_v20, %s3538_s22 }
 0x3e9   : > { %2381 = vrot.lane.b32.xlu2 %v2375_v61, %s3539_s1  ;;  %2345 = vrot.lane.b32.xlu0 %v2339_v16, %s3537_s27 }
 0x3ed   : > { %v2207_v30 = vpop.permute.xlu2 %2206  ;;  %v2369_v44 = vpop.permute.xlu1 %2368 }
 0x3ee   : > { %v5265_v42 = vadd.f32 %v2207_v30, %v2197_v63  ;;  %v2377_v45 = vmul.f32 0.0, %v2369_v44  ;;  %v2405_v51 = vpop.permute.xlu0 %2404  ;;  %v2371_v25 = vsel %vm2370_vm3, %v2367_v19, %v2369_v44  ;;  %vm5779_vm3 = vcmask 138240  }
 0x3ef   : > { %v2412_v43 = vmul.f32 0.0, %v2405_v51  ;;  %v2406_v31 = vsel %vm5775_vm12, %v2403_v29, %v2405_v51  ;;  %v2376_v11 = vmul.f32 %v2371_v25, %v5774_v28  ;;  %vm2509_vm12 = vcmask 146432  }
 0x3f0   : > { %2385 = vrot.lane.b32.xlu1 %v2377_v45, %s3539_s1  ;;  %v2411_v4 = vmul.f32 %v2406_v31, %v5774_v28  ;;  %v2680_v25 = vperm.slane %v4989_v48, 6 }
 0x3f1   : > { %2311 = vrot.lane.b32.xlu2 %v2304_v6, %s3538_s22  ;;  %2420 = vrot.lane.b32.xlu0 %v2412_v43, %s3540_s0  ;;  %s3547_s22 = smov 32  }
 0x3f5   : > { %v2506_v27 = vpop.permute.xlu2 %2505  ;;  %v2473_v46 = vpop.permute.xlu1 %2472 }
 0x3f6   : > { %v2209_v33 = vpop.permute.xlu0 %2208  ;;  %v2480_v57 = vmul.f32 0.0, %v2473_v46  ;;  %v2514_v29 = vmul.f32 %v2506_v27, %v4617_v0 }
 0x3f7   : > { %v2210_v54 = vsel %vm5776_vm11, %v2207_v30, %v2209_v33  ;;  %v5275_v14 = vadd.f32 %v2209_v33, %v5221_v3  ;;  %vm5639_vm11 = vcmask 244736   ;;  %v2679_v33 = vperm.slane %v5013_v18, 6 }
 0x3f8   : > { %v5277_v7 = vadd.f32 %v2210_v54, %v2198_v9  ;;  %2416 = vrot.lane.b32.xlu1 %v2410_v21, %s3540_s0  ;;  %v2340_v9 = vmul.f32 %v2335_v2, %v5774_v28 }
 0x3f9   : > { %2418 = vrot.lane.b32.xlu2 %v2411_v4, %s3540_s0  ;;  %2275 = vrot.lane.b32.xlu0 %v2268_v12, %s3536_s3  ;;  %s3545_s3 = smov 47   ;;  %s3549_s0 = smov 33  }
 0x3fd   : > { %v2544_v41 = vpop.permute.xlu2 %2543  ;;  %v2542_v63 = vpop.permute.xlu1 %2541 }
 0x3fe   : > { %v2471_v35 = vpop.permute.xlu0 %2470  ;;  %v2552_v49 = vmul.f32 0.0, %v2544_v41  ;;  %v2550_v40 = vmul.f32 %v2542_v63, %v4617_v0  ;;  %v2546_v13 = vsel %vm2545_vm0, %v2542_v63, %v2544_v41  ;;  %vm2279_vm0 = vcmask 613376  }
 0x3ff   : > { %v2478_v3 = vmul.f32 %v2471_v35, %v4617_v0  ;;  %v2474_v32 = vsel %vm5779_vm3, %v2471_v35, %v2473_v46  ;;  %v2551_v21 = vmul.f32 %v2546_v13, %v5774_v28  ;;  %vm2422_vm3 = vcmask 506880  }
 0x400   : > { %2451 = vrot.lane.b32.xlu1 %v2444_v15, %s3534_s21  ;;  %s3543_s21 = smov 59   ;;  %v2479_v5 = vmul.f32 %v2474_v32, %v5774_v28 }
 0x401   : > { %2484 = vrot.lane.b32.xlu2 %v2478_v3, %s3541_s25  ;;  %2383 = vrot.lane.b32.xlu0 %v2376_v11, %s3539_s1  ;;  %s3548_s1 = smov 45  }
 0x405   : > { %v2614_v37 = vpop.permute.xlu2 %2613  ;;  %v2580_v16 = vpop.permute.xlu1 %2579 }
 0x406   : > { %v2508_v47 = vpop.permute.xlu0 %2507  ;;  %v2588_v55 = vmul.f32 0.0, %v2580_v16  ;;  %v2622_v6 = vmul.f32 %v2614_v37, %v4617_v0 }
 0x407   : > { %v2516_v17 = vmul.f32 0.0, %v2508_v47  ;;  %v2510_v34 = vsel %vm2509_vm12, %v2506_v27, %v2508_v47  ;;  %vm2315_vm12 = vcmask 605184  }
 0x408   : > { %2239 = vrot.lane.b32.xlu1 %v2232_v36, %s3535_s26  ;;  %s3544_s26 = smov 48   ;;  %v2515_v60 = vmul.f32 %v2510_v34, %v5774_v28 }
 0x409   : > { %2560 = vrot.lane.b32.xlu2 %v2552_v49, %s3542_s28  ;;  %2524 = vrot.lane.b32.xlu0 %v2516_v17, %s3543_s21 }
 0x40d   : > { %v2652_v22 = vpop.permute.xlu2 %2651  ;;  %v2650_v51 = vpop.permute.xlu1 %2649 }
 0x40e   : > { %v2578_v58 = vpop.permute.xlu0 %2577  ;;  %v2660_v30 = vmul.f32 0.0, %v2652_v22  ;;  %v2658_v43 = vmul.f32 %v2650_v51, %v4617_v0  ;;  %v2654_v12 = vsel %vm5640_vm10, %v2650_v51, %v2652_v22  ;;  %vm2526_vm10 = vcmask 482304  }
 0x40f   : > { %v2586_v56 = vmul.f32 %v2578_v58, %v4617_v0  ;;  %v2582_v61 = vsel %vm5638_vm7, %v2578_v58, %v2580_v16  ;;  %v2659_v54 = vmul.f32 %v2654_v12, %v5774_v28  ;;  %vm2387_vm7 = vcmask 515072  }
 0x410   : > { %2347 = vrot.lane.b32.xlu1 %v2340_v9, %s3537_s27  ;;  %v2587_v44 = vmul.f32 %v2582_v61, %v5774_v28  ;;  %s3546_s27 = smov 46  }
 0x411   : > { %2592 = vrot.lane.b32.xlu2 %v2586_v56, %s3544_s26  ;;  %2556 = vrot.lane.b32.xlu0 %v2550_v40, %s3542_s28 }
 0x416   : > { %v2616_v38 = vpop.permute.xlu0 %2615 }
 0x417   : > { %v2624_v52 = vmul.f32 0.0, %v2616_v38  ;;  %v2618_v24 = vsel %vm5639_vm11, %v2614_v37, %v2616_v38  ;;  %vm2243_vm11 = vcmask 621568  }
 0x418   : > { %2488 = vrot.lane.b32.xlu1 %v2480_v57, %s3541_s25  ;;  %v2623_v20 = vmul.f32 %v2618_v24, %v5774_v28 }
 0x419   : > { %2522 = vrot.lane.b32.xlu2 %v2515_v60, %s3543_s21  ;;  %2632 = vrot.lane.b32.xlu0 %v2624_v52, %s3545_s3 }
 0x420   : > { %2520 = vrot.lane.b32.xlu1 %v2514_v29, %s3543_s21  ;;  %s3552_s21 = smov 35  }
 0x421   : > { %2630 = vrot.lane.b32.xlu2 %v2623_v20, %s3545_s3  ;;  %2486 = vrot.lane.b32.xlu0 %v2479_v5, %s3541_s25  ;;  %s3550_s25 = smov 44  }
 0x422   : > { %v5312_v19 = vpop.permute.xlu2 %2453 }
 0x428   : > { %2596 = vrot.lane.b32.xlu1 %v2588_v55, %s3544_s26 }
 0x429   : > { %2668 = vrot.lane.b32.xlu2 %v2660_v30, %s3546_s27  ;;  %2594 = vrot.lane.b32.xlu0 %v2587_v44, %s3544_s26 }
 0x42a   : > { %v5319_v45 = vpop.permute.xlu2 %2241 }
 0x430   : > { %2628 = vrot.lane.b32.xlu1 %v2622_v6, %s3545_s3 }
 0x431   : > { %2664 = vrot.lane.b32.xlu0 %v2658_v43, %s3546_s27 }
 0x433   : > { %v2274_v31 = vpop.permute.xlu2 %2273 }
 0x438   : > { %2558 = vrot.lane.b32.xlu1 %v2551_v21, %s3542_s28  ;;  %s3551_s28 = smov 34  }
 0x439   : > { %2683 = vrot.lane.b32.xlu0 %v2679_v33, %s3547_s22 }
 0x43b   : > { %v5330_v4 = vpop.permute.xlu2 %2349 }
 0x440   : > { %2666 = vrot.lane.b32.xlu1 %v2659_v54, %s3546_s27 }
 0x442   : > { %v2450_v27 = vpop.permute.xlu0 %2449 }
 0x443   : > { %v2382_v50 = vpop.permute.xlu2 %2381 }
 0x448   : > { %2685 = vrot.lane.b32.xlu1 %v2680_v25, %s3547_s22 }
 0x44a   : > { %v2238_v18 = vpop.permute.xlu0 %2237 }
 0x44b   : > { %v2249_v15 = vadd.f32 %v2238_v18, %v5265_v42  ;;  %v2312_v35 = vpop.permute.xlu2 %2311 }
 0x44d   : > { %v2285_v11 = vadd.f32 %v2274_v31, %v2249_v15 }
 0x452   : > { %v2278_v3 = vpop.permute.xlu1 %2277 }
 0x453   : > { %v2419_v46 = vpop.permute.xlu2 %2418  ;;  %v2314_v26 = vpop.permute.xlu0 %2313 }
 0x454   : > { %v2317_v41 = vsel %vm2315_vm12, %v2312_v35, %v2314_v26 }
 0x45a   : > { %v2310_v36 = vpop.permute.xlu1 %2309 }
 0x45b   : > { %v2316_v47 = vsel %vm2315_vm12, %v2310_v36, %v2312_v35  ;;  %v2321_v49 = vadd.f32 %v2310_v36, %v2285_v11  ;;  %v2346_v17 = vpop.permute.xlu0 %2345  ;;  %v5337_v2 = vpop.permute.xlu2 %2484  ;;  %vm2455_vm12 = vcmask 498688  }
 0x45d   : > { %v2357_v63 = vadd.f32 %v2346_v17, %v2321_v49 }
 0x45f   : > { %v2393_v48 = vadd.f32 %v2382_v50, %v2357_v63 }
 0x462   : > { %v2386_v9 = vpop.permute.xlu1 %2385 }
 0x463   : > { %v2421_v58 = vpop.permute.xlu0 %2420  ;;  %v5339_v42 = vpop.permute.xlu2 %2560 }
 0x464   : > { %v2424_v40 = vsel %vm2422_vm3, %v2419_v46, %v2421_v58 }
 0x46a   : > { %v2417_v56 = vpop.permute.xlu1 %2416 }
 0x46b   : > { %v2423_v37 = vsel %vm2422_vm3, %v2417_v56, %v2419_v46  ;;  %v2428_v34 = vadd.f32 %v2417_v56, %v2393_v48  ;;  %v2276_v57 = vpop.permute.xlu0 %2275  ;;  %v2593_v32 = vpop.permute.xlu2 %2592  ;;  %vm2351_vm3 = vcmask 523264  }
 0x46c   : > { %v2280_v38 = vsel %vm2279_vm0, %v2274_v31, %v2276_v57  ;;  %v2281_v60 = vsel %vm2279_vm0, %v2276_v57, %v2278_v3  ;;  %vm2598_vm0 = vcmask 392192  }
 0x46d   : > { %v2461_v52 = vadd.f32 %v2450_v27, %v2428_v34 }
 0x46f   : > { %v2496_v22 = vadd.f32 %v5337_v2, %v2461_v52 }
 0x472   : > { %v2452_v24 = vpop.permute.xlu1 %2451 }
 0x473   : > { %v2456_v29 = vsel %vm2455_vm12, %v2450_v27, %v2452_v24  ;;  %v2384_v5 = vpop.permute.xlu0 %2383  ;;  %v2523_v55 = vpop.permute.xlu2 %2522 }
 0x474   : > { %v2388_v20 = vsel %vm2387_vm7, %v2382_v50, %v2384_v5  ;;  %v2389_v16 = vsel %vm2387_vm7, %v2384_v5, %v2386_v9  ;;  %vm2490_vm7 = vcmask 490496  }
 0x47a   : > { %v2240_v61 = vpop.permute.xlu1 %2239 }
 0x47b   : > { %v2244_v30 = vsel %vm2243_vm11, %v2238_v18, %v2240_v61  ;;  %v2245_v44 = vsel %vm2243_vm11, %v2240_v61, %v5319_v45  ;;  %v2525_v51 = vpop.permute.xlu0 %2524  ;;  %vm2634_vm11 = vcmask 384000  }
 0x47c   : > { %v2250_v6 = vadd.f32 %v2244_v30, %v5277_v7  ;;  %v2251_v43 = vadd.f32 %v2245_v44, %v5275_v14  ;;  %v2528_v13 = vsel %vm2526_vm10, %v2523_v55, %v2525_v51  ;;  %v2457_v14 = vsel %vm2455_vm12, %v2452_v24, %v5312_v19 }
 0x47d   : > { %vm2670_vm12 = vcmask 375808  }
 0x47e   : > { %v2286_v31 = vadd.f32 %v2280_v38, %v2250_v6  ;;  %v2287_v21 = vadd.f32 %v2281_v60, %v2251_v43 }
 0x480   : > { %v2323_v33 = vadd.f32 %v2317_v41, %v2287_v21  ;;  %v2322_v12 = vadd.f32 %v2316_v47, %v2286_v31  ;;  %v2631_v41 = vpop.permute.xlu2 %2630 }
 0x482   : > { %v2348_v54 = vpop.permute.xlu1 %2347 }
 0x483   : > { %v2352_v27 = vsel %vm2351_vm3, %v2346_v17, %v2348_v54  ;;  %v2353_v50 = vsel %vm2351_vm3, %v2348_v54, %v5330_v4  ;;  %v2557_v25 = vpop.permute.xlu0 %2556  ;;  %vm2687_vm3 = vcmask 261120  }
 0x484   : > { %v2358_v18 = vadd.f32 %v2352_v27, %v2322_v12  ;;  %v2359_v15 = vadd.f32 %v2353_v50, %v2323_v33  ;;  %v5780_v27 = vld [vmem:[#allocation25_spill] sm:$0xff] }
 0x485   : > { %v2713_v50 = vperm.slane %v5780_v27, 7 }
 0x486   : > { %v2394_v45 = vadd.f32 %v2388_v20, %v2358_v18  ;;  %v2395_v35 = vadd.f32 %v2389_v16, %v2359_v15 }
 0x488   : > { %v2429_v11 = vadd.f32 %v2423_v37, %v2394_v45  ;;  %v2430_v7 = vadd.f32 %v2424_v40, %v2395_v35  ;;  %v2669_v31 = vpop.permute.xlu2 %2668  ;;  %v5781_v35 = vld [vmem:[#allocation24_spill] sm:$0xff] }
 0x48a   : > { %v2489_v3 = vpop.permute.xlu1 %2488  ;;  %v2462_v46 = vadd.f32 %v2456_v29, %v2429_v11  ;;  %v2463_v26 = vadd.f32 %v2457_v14, %v2430_v7  ;;  %v2714_v11 = vperm.slane %v5781_v35, 7 }
 0x48b   : > { %v2633_v36 = vpop.permute.xlu0 %2632 }
 0x48c   : > { %v2636_v47 = vsel %vm2634_vm11, %v2631_v41, %v2633_v36 }
 0x492   : > { %v2521_v4 = vpop.permute.xlu1 %2520 }
 0x493   : > { %v2527_v49 = vsel %vm2526_vm10, %v2521_v4, %v2523_v55  ;;  %v2532_v17 = vadd.f32 %v2521_v4, %v2496_v22  ;;  %v2487_v63 = vpop.permute.xlu0 %2486  ;;  %vm2562_vm10 = vcmask 474112   ;;  %v1375_v4 = vpop.f32.mrf.mxu3 }
 0x494   : > { %v2491_v48 = vsel %vm2490_vm7, %v5337_v2, %v2487_v63  ;;  %v2492_v9 = vsel %vm2490_vm7, %v2487_v63, %v2489_v3  ;;  %v1337_v3 = vpop.f32.mrf.mxu2  ;;  %vm2810_vm7 = vcmask 343040  }
 0x495   : > { %v2568_v58 = vadd.f32 %v2557_v25, %v2532_v17  ;;  %v2497_v40 = vadd.f32 %v2491_v48, %v2462_v46  ;;  %v2498_v19 = vadd.f32 %v2492_v9, %v2463_v26 }
 0x497   : > { %v2604_v56 = vadd.f32 %v2593_v32, %v2568_v58  ;;  %v2534_v37 = vadd.f32 %v2528_v13, %v2498_v19  ;;  %v2533_v34 = vadd.f32 %v2527_v49, %v2497_v40 }
 0x49a   : > { %v2597_v57 = vpop.permute.xlu1 %2596 }
 0x49b   : > { %v2595_v38 = vpop.permute.xlu0 %2594 }
 0x49c   : > { %v2599_v60 = vsel %vm2598_vm0, %v2593_v32, %v2595_v38  ;;  %v2600_v52 = vsel %vm2598_vm0, %v2595_v38, %v2597_v57 }
 0x4a2   : > { %v2629_v24 = vpop.permute.xlu1 %2628 }
 0x4a3   : > { %v2635_v22 = vsel %vm2634_vm11, %v2629_v24, %v2631_v41  ;;  %v2640_v29 = vadd.f32 %v2629_v24, %v2604_v56  ;;  %v2665_v5 = vpop.permute.xlu0 %2664  ;;  %v5782_v41 = vld [vmem:[#allocation12_spill] sm:$0xff] }
 0x4a4   : > { %v1338_v36 = vadd.f32 %v1337_v3, %v5782_v41  ;;  %v1376_v17 = vadd.f32 %v1375_v4, %v5782_v41 }
 0x4a5   : > { %v2676_v2 = vadd.f32 %v2665_v5, %v2640_v29 }
 0x4a6   : > { %v2784_v63 = vsel %vm4405_vm4, %v1376_v17, 0.0  ;;  %v2853_v62 = vsel %vm4267_vm13, %v1338_v36, 0.0  ;;  %v2888_v58 = vsel %vm3916_vm5, %v1376_v17, 0.0  ;;  %vm2721_vm13 = vcmask 269312  }
 0x4a7   : > { %v2786_v48 = vperm.slane %v2784_v63, 1  ;;  %v2855_v9 = vperm.slane %v2853_v62, 3  ;;  %v2922_v8 = vperm.slane %v1376_v17, 5  ;;  %vm2793_vm5 = vcmask 285696  }
 0x4aa   : > { %v2559_v20 = vpop.permute.xlu1 %2558 }
 0x4ab   : > { %v2563_v16 = vsel %vm2562_vm10, %v2557_v25, %v2559_v20  ;;  %v2564_v61 = vsel %vm2562_vm10, %v2559_v20, %v5339_v42  ;;  %v2684_v55 = vpop.permute.xlu0 %2683  ;;  %v2783_v20 = vsel %vm4414_vm2, %v1338_v36, 0.0 }
 0x4ac   : > { %v2569_v30 = vadd.f32 %v2563_v16, %v2533_v34  ;;  %v2570_v44 = vadd.f32 %v2564_v61, %v2534_v37  ;;  %v2692_v51 = vmul.f32 %v2684_v55, %v4617_v0  ;;  %v2890_v34 = vperm.slane %v2888_v58, 4 }
 0x4ad   : > { %v2785_v61 = vperm.slane %v2783_v20, 1 }
 0x4ae   : > { %v2605_v6 = vadd.f32 %v2599_v60, %v2569_v30  ;;  %v2606_v32 = vadd.f32 %v2600_v52, %v2570_v44  ;;  %2698 = vrot.lane.b32.xlu2 %v2692_v51, %s3548_s1  ;;  %v2953_v60 = vsel %vm3879_vm8, %v1338_v36, 0.0  ;;  %v2820_v44 = vsel %vm5710_vm14, %v1376_v17, 0.0 }
 0x4af   : > { %v2819_v51 = vsel %vm5709_vm6, %v1338_v36, 0.0  ;;  %v2822_v39 = vperm.slane %v2820_v44, 2  ;;  %vm5786_vm8 = vnez %v5683_v1  ;;  %vm2997_vm6 = vcmask 408576  }
 0x4b0   : > { %v2642_v43 = vadd.f32 %v2636_v47, %v2606_v32  ;;  %v2641_v13 = vadd.f32 %v2635_v22, %v2605_v6  ;;  %v5374_v47 = vsel %vm4358_vm1, %v1338_v36, 0.0  ;;  %vm2704_vm1 = vcmask 367616  }
 0x4b1   : > { %v2749_v49 = vperm.slane %v5374_v47, 0  ;;  %v2955_v22 = vperm.slane %v2953_v60, 6  ;;  %v2821_v6 = vperm.slane %v2819_v51, 2  ;;  %v2887_v32 = vsel %vm3895_vm15, %v1338_v36, 0.0 }
 0x4b2   : > { %v2667_v21 = vpop.permute.xlu1 %2666  ;;  %v2989_v1 = vperm.slane %v5374_v47, 7  ;;  %vm2738_vm15 = vcmask 359424   ;;  %vm3033_vm14 = vcmask 416768  }
 0x4b3   : > { %v2671_v33 = vsel %vm2670_vm12, %v2665_v5, %v2667_v21  ;;  %v2672_v12 = vsel %vm2670_vm12, %v2667_v21, %v2669_v31  ;;  %v2748_v5 = vsel %vm4364_vm9, %v1376_v17, 0.0  ;;  %v2921_v21 = vperm.slane %v1338_v36, 5 }
 0x4b4   : > { %v2677_v42 = vadd.f32 %v2671_v33, %v2641_v13  ;;  %v2678_v54 = vadd.f32 %v2672_v12, %v2642_v43  ;;  %v2990_v16 = vperm.slane %v2748_v5, 7  ;;  %v2854_v43 = vsel %vm5786_vm8, %v1376_v17, 0.0  ;;  %v1378_v33 = vpop.f32.mrf.mxu3  ;;  %v5787_v12 = vld [vmem:[#allocation9_spill] sm:$0xff] }
 0x4b5   : > { %v2889_v13 = vperm.slane %v2887_v32, 4  ;;  %v2856_v31 = vperm.slane %v2854_v43, 3  ;;  %vm5788_vm9 = vnez %v5787_v12 }
 0x4b6   : > { %2717 = vrot.lane.b32.xlu2 %v2713_v50, %s3549_s0  ;;  %v2954_v53 = vsel %vm5788_vm9, %v1376_v17, 0.0  ;;  %vm3014_vm9 = vcmask 220160  }
 0x4b7   : > { %v2956_v50 = vperm.slane %v2954_v53, 6 }
 0x4ba   : > { %v2686_v25 = vpop.permute.xlu1 %2685 }
 0x4bb   : > { %v2688_v18 = vsel %vm2687_vm3, %v2684_v55, %v2686_v25  ;;  %v2694_v15 = vmul.f32 0.0, %v2686_v25  ;;  %v2750_v55 = vperm.slane %v2748_v5, 0 }
 0x4bc   : > { %v2693_v45 = vmul.f32 %v2688_v18, %v5774_v28 }
 0x4bd   : > { %2702 = vrot.lane.b32.xlu1 %v2694_v15, %s3548_s1 }
 0x4be   : > { %2700 = vrot.lane.b32.xlu0 %v2693_v45, %s3548_s1 }
 0x4c6   : > { %2719 = vrot.lane.b32.xlu0 %v2714_v11, %s3549_s0  ;;  %s3553_s0 = smov 49  }
 0x508   : > { %v2699_v7 = vpop.permute.xlu2 %2698 }
 0x509   : > { %v5367_v14 = vadd.f32 %v2699_v7, %v2676_v2 }
 0x510   : > { %v2718_v46 = vpop.permute.xlu2 %2717 }
 0x511   : > { %v2726_v26 = vmul.f32 %v2718_v46, %v4617_v0 }
 0x513   : > { %2732 = vrot.lane.b32.xlu1 %v2726_v26, %s3550_s25 }
 0x51b   : > { %2753 = vrot.lane.b32.xlu1 %v2749_v49, %s3551_s28 }
 0x523   : > { %2791 = vrot.lane.b32.xlu1 %v2786_v48, %s3552_s21 }
 0x52b   : > { %2859 = vrot.lane.b32.xlu1 %v2855_v9, %s3546_s27 }
 0x52f   : > { %v2703_v40 = vpop.permute.xlu1 %2702 }
 0x530   : > { %v2701_v19 = vpop.permute.xlu0 %2700 }
 0x531   : > { %v2705_v56 = vsel %vm2704_vm1, %v2699_v7, %v2701_v19  ;;  %v2706_v37 = vsel %vm2704_vm1, %v2701_v19, %v2703_v40 }
 0x532   : > { %v5389_v57 = vadd.f32 %v2705_v56, %v2677_v42  ;;  %v5391_v38 = vadd.f32 %v2706_v37, %v2678_v54  ;;  %v1340_v42 = vpop.f32.mrf.mxu2  ;;  %v5789_v54 = vld [vmem:[#allocation11_spill] sm:$0xff] }
 0x533   : > { %2895 = vrot.lane.b32.xlu1 %v2890_v34, %s3545_s3  ;;  %v1379_v27 = vadd.f32 %v1378_v33, %v5789_v54  ;;  %v1341_v25 = vadd.f32 %v1340_v42, %v5789_v54 }
 0x535   : > { %v3024_v18 = vsel %vm4405_vm4, %v1379_v27, 0.0  ;;  %v3023_v15 = vsel %vm4414_vm2, %v1341_v25, 0.0  ;;  %vm2757_vm4 = vcmask 277504   ;;  %vm2963_vm2 = vcmask 400384  }
 0x536   : > { %v3026_v45 = vperm.slane %v3024_v18, 0  ;;  %v3025_v35 = vperm.slane %v3023_v15, 0 }
 0x538   : > { %v2720_v52 = vpop.permute.xlu0 %2719 }
 0x539   : > { %v2722_v59 = vsel %vm2721_vm13, %v2718_v46, %v2720_v52  ;;  %v2728_v24 = vmul.f32 0.0, %v2720_v52  ;;  %vm2980_vm13 = vcmask 228352  }
 0x53a   : > { %v2727_v29 = vmul.f32 %v2722_v59, %v5774_v28 }
 0x53b   : > { %2959 = vrot.lane.b32.xlu1 %v2955_v22, %s3553_s0  ;;  %2736 = vrot.lane.b32.xlu0 %v2728_v24, %s3550_s25 }
 0x53c   : > { %2734 = vrot.lane.b32.xlu2 %v2727_v29, %s3550_s25 }
 0x543   : > { %2995 = vrot.lane.b32.xlu1 %v2990_v16, %s3554_s18  ;;  %2789 = vrot.lane.b32.xlu0 %v2785_v61, %s3552_s21 }
 0x544   : > { %2755 = vrot.lane.b32.xlu2 %v2750_v55, %s3551_s28  ;;  %s3252_s28 = sshll.u32 %s3657_s17, 4 }
 0x54b   : > { %2827 = vrot.lane.b32.xlu0 %v2822_v39, %s3548_s1 }
 0x54c   : > { %2825 = vrot.lane.b32.xlu2 %v2821_v6, %s3548_s1  ;;  %s473_s1 = sand.u32 1, %s3474_s30  }
 0x54d   : > { %s3168_s25 = sshll.u32 %s473_s1, 4  ;;  %s3077_s17 = scalar_lea.sflag [#allocation3], %s473_s1 }
 0x553   : > { %2893 = vrot.lane.b32.xlu0 %v2889_v13, %s3545_s3  ;;  %s3557_s3 = smov 42  }
 0x554   : > { %2861 = vrot.lane.b32.xlu2 %v2856_v31, %s3546_s27  ;;  %s3559_s27 = smov 27  }
 0x55b   : > { %2927 = vrot.lane.b32.xlu0 %v2922_v8, %s3544_s26 }
 0x55c   : > { %2925 = vrot.lane.b32.xlu2 %v2921_v21, %s3544_s26  ;;  %s3555_s26 = smov 51  }
 0x563   : > { %2993 = vrot.lane.b32.xlu0 %v2989_v1, %s3554_s18  ;;  %s3556_s18 = smov 43  }
 0x564   : > { %2961 = vrot.lane.b32.xlu2 %v2956_v50, %s3553_s0 }
 0x56b   : > { %3031 = vrot.lane.b32.xlu0 %v3026_v45, %s3555_s26 }
 0x56c   : > { %3029 = vrot.lane.b32.xlu2 %v3025_v35, %s3555_s26 }
 0x585   : > { %v2733_v11 = vpop.permute.xlu1 %2732 }
 0x586   : > { %v5433_v7 = vadd.f32 %v2733_v11, %v5367_v14 }
 0x58d   : > { %v2754_v3 = vpop.permute.xlu1 %2753 }
 0x58e   : > { %v2762_v46 = vmul.f32 %v2754_v3, %v4617_v0 }
 0x590   : > { %2768 = vrot.lane.b32.xlu1 %v2762_v46, %s3556_s18 }
 0x595   : > { %v2792_v14 = vpop.permute.xlu1 %2791 }
 0x596   : > { %v2735_v23 = vpop.permute.xlu2 %2734  ;;  %v2800_v17 = vmul.f32 0.0, %v2792_v14 }
 0x597   : > { %v2739_v26 = vsel %vm2738_vm15, %v2733_v11, %v2735_v23 }
 0x598   : > { %v5438_v41 = vadd.f32 %v2739_v26, %v5389_v57 }
 0x59e   : > { %v2756_v36 = vpop.permute.xlu2 %2755 }
 0x59f   : > { %v2758_v47 = vsel %vm2757_vm4, %v2754_v3, %v2756_v36  ;;  %v2764_v4 = vmul.f32 0.0, %v2756_v36 }
 0x5a0   : > { %v2763_v49 = vmul.f32 %v2758_v47, %v5774_v28 }
 0x5a1   : > { %2772 = vrot.lane.b32.xlu0 %v2764_v4, %s3556_s18 }
 0x5a2   : > { %2770 = vrot.lane.b32.xlu2 %v2763_v49, %s3556_s18  ;;  %s3088_s18 = scalar_lea.hbm %s5542_s14, %s3252_s28  ;;  %s3440_s28 = scalar_lea.hbm %s5542_s14, 32 }
 0x5a6   : > { %v2826_v19 = vpop.permute.xlu2 %2825 }
 0x5a7   : > { %v2833_v34 = vmul.f32 %v2826_v19, %v4617_v0 }
 0x5a9   : > { %2808 = vrot.lane.b32.xlu0 %v2800_v17, %s3557_s3 }
 0x5ad   : > { %v2737_v63 = vpop.permute.xlu0 %2736 }
 0x5ae   : > { %v2740_v48 = vsel %vm2738_vm15, %v2735_v23, %v2737_v63  ;;  %v2862_v52 = vpop.permute.xlu2 %2861  ;;  %vm3050_vm15 = vcmask 211968  }
 0x5af   : > { %v5443_v62 = vadd.f32 %v2740_v48, %v5391_v38  ;;  %v2860_v38 = vpop.permute.xlu1 %2859  ;;  %v2869_v22 = vmul.f32 0.0, %v2862_v52 }
 0x5b0   : > { %v2863_v59 = vsel %vm2670_vm12, %v2860_v38, %v2862_v52  ;;  %v2867_v24 = vmul.f32 %v2860_v38, %v4617_v0  ;;  %vm5793_vm12 = vcmask 244736  }
 0x5b1   : > { %v2868_v29 = vmul.f32 %v2863_v59, %v5774_v28 }
 0x5b5   : > { %v2790_v9 = vpop.permute.xlu0 %2789 }
 0x5b6   : > { %v2794_v58 = vsel %vm2793_vm5, %v2790_v9, %v2792_v14  ;;  %v2798_v40 = vmul.f32 %v2790_v9, %v4617_v0  ;;  %v2926_v55 = vpop.permute.xlu2 %2925 }
 0x5b7   : > { %v2799_v56 = vmul.f32 %v2794_v58, %v5774_v28  ;;  %v2896_v2 = vpop.permute.xlu1 %2895  ;;  %v2933_v39 = vmul.f32 %v2926_v55, %v4617_v0 }
 0x5b8   : > { %2804 = vrot.lane.b32.xlu1 %v2798_v40, %s3557_s3  ;;  %v2903_v16 = vmul.f32 0.0, %v2896_v2 }
 0x5b9   : > { %2806 = vrot.lane.b32.xlu2 %v2799_v56, %s3557_s3  ;;  %s475_s3 = scalar_lea.vmem [#allocation2], %s3168_s25 }
 0x5bd   : > { %v2828_v37 = vpop.permute.xlu0 %2827 }
 0x5be   : > { %v2829_v57 = vsel %vm2704_vm1, %v2826_v19, %v2828_v37  ;;  %v2835_v10 = vmul.f32 0.0, %v2828_v37  ;;  %v2962_v13 = vpop.permute.xlu2 %2961  ;;  %vm5794_vm1 = vmmov %vm5793_vm12 }
 0x5bf   : > { %v2834_v60 = vmul.f32 %v2829_v57, %v5774_v28  ;;  %v2960_v43 = vpop.permute.xlu1 %2959  ;;  %v2970_v21 = vmul.f32 0.0, %v2962_v13 }
 0x5c0   : > { %2843 = vrot.lane.b32.xlu0 %v2835_v10, %s3547_s22  ;;  %2839 = vrot.lane.b32.xlu1 %v2833_v34, %s3547_s22  ;;  %v2964_v31 = vsel %vm2963_vm2, %v2960_v43, %v2962_v13  ;;  %v2968_v8 = vmul.f32 %v2960_v43, %v4617_v0 }
 0x5c1   : > { %2841 = vrot.lane.b32.xlu2 %v2834_v60, %s3547_s22  ;;  %v2969_v33 = vmul.f32 %v2964_v31, %v5774_v28  ;;  %s3560_s22 = smov 26  }
 0x5c5   : > { %v2894_v5 = vpop.permute.xlu0 %2893 }
 0x5c6   : > { %v2897_v20 = vsel %vm2634_vm11, %v2894_v5, %v2896_v2  ;;  %v2901_v61 = vmul.f32 %v2894_v5, %v4617_v0  ;;  %v3030_v25 = vpop.permute.xlu2 %3029  ;;  %vm2774_vm11 = vcmask 351232  }
 0x5c7   : > { %v2902_v30 = vmul.f32 %v2897_v20, %v5774_v28  ;;  %v2996_v53 = vpop.permute.xlu1 %2995  ;;  %v3038_v15 = vmul.f32 %v3030_v25, %v4617_v0 }
 0x5c8   : > { %2873 = vrot.lane.b32.xlu1 %v2867_v24, %s3532_s15  ;;  %2877 = vrot.lane.b32.xlu0 %v2869_v22, %s3532_s15  ;;  %v3004_v1 = vmul.f32 0.0, %v2996_v53 }
 0x5c9   : > { %2875 = vrot.lane.b32.xlu2 %v2868_v29, %s3532_s15  ;;  %s5790_s15 = smov 29  }
 0x5cd   : > { %v2928_v44 = vpop.permute.xlu0 %2927 }
 0x5ce   : > { %v2929_v51 = vsel %vm2598_vm0, %v2926_v55, %v2928_v44  ;;  %v2935_v6 = vmul.f32 0.0, %v2928_v44  ;;  %vm5791_vm0 = vcmask 252928  }
 0x5cf   : > { %v2934_v32 = vmul.f32 %v2929_v51, %v5774_v28  ;;  %vm5792_vm10 = vmmov %vm5791_vm0 }
 0x5d0   : > { %2907 = vrot.lane.b32.xlu1 %v2901_v61, %s3533_s19  ;;  %2911 = vrot.lane.b32.xlu0 %v2903_v16, %s3533_s19 }
 0x5d1   : > { %2909 = vrot.lane.b32.xlu2 %v2902_v30, %s3533_s19  ;;  %s3558_s19 = smov 28  }
 0x5d5   : > { %v2994_v12 = vpop.permute.xlu0 %2993 }
 0x5d6   : > { %v2998_v42 = vsel %vm2997_vm6, %v2994_v12, %v2996_v53  ;;  %v3002_v54 = vmul.f32 %v2994_v12, %v4617_v0 }
 0x5d7   : > { %v3003_v27 = vmul.f32 %v2998_v42, %v5774_v28 }
 0x5d8   : > { %2943 = vrot.lane.b32.xlu0 %v2935_v6, %s5790_s15  ;;  %2939 = vrot.lane.b32.xlu1 %v2933_v39, %s5790_s15 }
 0x5d9   : > { %2941 = vrot.lane.b32.xlu2 %v2934_v32, %s5790_s15  ;;  %s3090_s15 = sshll.u32 %s475_s3, 4  ;;  %s3091_s15 = int_to_ptr.vmem [resolvable:$true] %s3090_s15 }
 0x5dd   : > { %v3032_v50 = vpop.permute.xlu0 %3031 }
 0x5de   : > { %v3034_v18 = vsel %vm3033_vm14, %v3030_v25, %v3032_v50  ;;  %v3040_v45 = vmul.f32 0.0, %v3032_v50 }
 0x5df   : > { %v3039_v35 = vmul.f32 %v3034_v18, %v5774_v28 }
 0x5e0   : > { %2974 = vrot.lane.b32.xlu1 %v2968_v8, %s3558_s19  ;;  %2978 = vrot.lane.b32.xlu0 %v2970_v21, %s3558_s19 }
 0x5e1   : > { %2976 = vrot.lane.b32.xlu2 %v2969_v33, %s3558_s19  ;;  %s3092_s19 = sshll.u32 %s3088_s18, 4  ;;  %s3093_s19 = int_to_ptr.hbm [resolvable:$true] %s3092_s19 }
 0x5e8   : > { %3008 = vrot.lane.b32.xlu1 %v3002_v54, %s3559_s27  ;;  %3012 = vrot.lane.b32.xlu0 %v3004_v1, %s3559_s27 }
 0x5e9   : > { %3010 = vrot.lane.b32.xlu2 %v3003_v27, %s3559_s27 }
 0x5f0   : > { %3048 = vrot.lane.b32.xlu0 %v3040_v45, %s3560_s22  ;;  %3044 = vrot.lane.b32.xlu1 %v3038_v15, %s3560_s22 }
 0x5f1   : > { %3046 = vrot.lane.b32.xlu2 %v3039_v35, %s3560_s22 }
 0x5fc   : > { %v2771_v11 = vpop.permute.xlu2 %2770 }
 0x602   : > { %v2769_v23 = vpop.permute.xlu1 %2768 }
 0x603   : > { %v2775_v56 = vsel %vm2774_vm11, %v2769_v23, %v2771_v11  ;;  %v2780_v10 = vadd.f32 %v2769_v23, %v5433_v7 }
 0x604   : > { %v2781_v52 = vadd.f32 %v2775_v56, %v5438_v41 }
 0x613   : > { %v2807_v3 = vpop.permute.xlu2 %2806  ;;  %v2773_v46 = vpop.permute.xlu0 %2772 }
 0x614   : > { %v2776_v37 = vsel %vm2774_vm11, %v2771_v11, %v2773_v46 }
 0x615   : > { %v2782_v59 = vadd.f32 %v2776_v37, %v5443_v62 }
 0x61b   : > { %v2842_v26 = vpop.permute.xlu2 %2841  ;;  %v2809_v36 = vpop.permute.xlu0 %2808 }
 0x61c   : > { %v2812_v60 = vsel %vm2810_vm7, %v2807_v3, %v2809_v36 }
 0x61d   : > { %v2818_v5 = vadd.f32 %v2812_v60, %v2782_v59 }
 0x623   : > { %v2876_v4 = vpop.permute.xlu2 %2875 }
 0x62a   : > { %v2805_v47 = vpop.permute.xlu1 %2804 }
 0x62b   : > { %v2910_v17 = vpop.permute.xlu2 %2909  ;;  %v2811_v38 = vsel %vm2810_vm7, %v2805_v47, %v2807_v3  ;;  %v2816_v24 = vadd.f32 %v2805_v47, %v2780_v10 }
 0x62c   : > { %v2817_v2 = vadd.f32 %v2811_v38, %v2781_v52 }
 0x632   : > { %v2844_v49 = vpop.permute.xlu0 %2843  ;;  %v2840_v14 = vpop.permute.xlu1 %2839 }
 0x633   : > { %v2942_v28 = vpop.permute.xlu2 %2941  ;;  %v2846_v22 = vsel %vm2687_vm3, %v2842_v26, %v2844_v49  ;;  %v2845_v29 = vsel %vm2687_vm3, %v2840_v14, %v2842_v26  ;;  %v2850_v20 = vadd.f32 %v2840_v14, %v2816_v24  ;;  %vm5795_vm3 = vcmask 236544  }
 0x634   : > { %v2852_v7 = vadd.f32 %v2846_v22, %v2818_v5  ;;  %v2851_v30 = vadd.f32 %v2845_v29, %v2817_v2  ;;  %vm5796_vm8 = vmmov %vm5795_vm3 }
 0x63a   : > { %v2874_v63 = vpop.permute.xlu1 %2873  ;;  %v2878_v0 = vpop.permute.xlu0 %2877 }
 0x63b   : > { %v2977_v19 = vpop.permute.xlu2 %2976  ;;  %v2879_v16 = vsel %vm5791_vm0, %v2874_v63, %v2876_v4  ;;  %v2880_v61 = vsel %vm5792_vm10, %v2876_v4, %v2878_v0  ;;  %v2884_v44 = vadd.f32 %v2874_v63, %v2850_v20  ;;  %v3418_v0 = vld [vmem:[%s3695_s20] sm:$0xff] }
 0x63c   : > { %v2885_v51 = vadd.f32 %v2879_v16, %v2851_v30  ;;  %v2886_v39 = vadd.f32 %v2880_v61, %v2852_v7 }
 0x642   : > { %v2908_v48 = vpop.permute.xlu1 %2907  ;;  %v2912_v9 = vpop.permute.xlu0 %2911 }
 0x643   : > { %v3011_v55 = vpop.permute.xlu2 %3010  ;;  %v2913_v41 = vsel %vm5793_vm12, %v2908_v48, %v2910_v17  ;;  %v2914_v62 = vsel %vm5794_vm1, %v2910_v17, %v2912_v9  ;;  %v2918_v43 = vadd.f32 %v2908_v48, %v2884_v44 }
 0x644   : > { %v2919_v8 = vadd.f32 %v2913_v41, %v2885_v51  ;;  %v2920_v21 = vadd.f32 %v2914_v62, %v2886_v39 }
 0x64a   : > { %v2944_v58 = vpop.permute.xlu0 %2943  ;;  %v2940_v40 = vpop.permute.xlu1 %2939 }
 0x64b   : > { %v2946_v13 = vsel %vm5795_vm3, %v2942_v28, %v2944_v58  ;;  %v2945_v31 = vsel %vm5796_vm8, %v2940_v40, %v2942_v28  ;;  %v2950_v33 = vadd.f32 %v2940_v40, %v2918_v43  ;;  %v3047_v15 = vpop.permute.xlu2 %3046  ;;  %v3419_v28 = vld [vmem:[%s3695_s20 + $0x8] sm:$0xff] }
 0x64c   : > { %v2952_v42 = vadd.f32 %v2946_v13, %v2920_v21  ;;  %v2951_v1 = vadd.f32 %v2945_v31, %v2919_v8 }
 0x652   : > { %v2975_v34 = vpop.permute.xlu1 %2974  ;;  %v2979_v57 = vpop.permute.xlu0 %2978 }
 0x653   : > { %v2981_v12 = vsel %vm2980_vm13, %v2975_v34, %v2977_v19  ;;  %v2982_v53 = vsel %vm2980_vm13, %v2977_v19, %v2979_v57  ;;  %v2986_v54 = vadd.f32 %v2975_v34, %v2950_v33 }
 0x654   : > { %v2987_v25 = vadd.f32 %v2981_v12, %v2951_v1  ;;  %v2988_v18 = vadd.f32 %v2982_v53, %v2952_v42 }
 0x65a   : > { %v3009_v6 = vpop.permute.xlu1 %3008  ;;  %v3013_v32 = vpop.permute.xlu0 %3012 }
 0x65b   : > { %v3015_v27 = vsel %vm3014_vm9, %v3009_v6, %v3011_v55  ;;  %v3016_v50 = vsel %vm3014_vm9, %v3011_v55, %v3013_v32  ;;  %v3020_v45 = vadd.f32 %v3009_v6, %v2986_v54 }
 0x65c   : > { %v3021_v35 = vadd.f32 %v3015_v27, %v2987_v25  ;;  %v3022_v11 = vadd.f32 %v3016_v50, %v2988_v18 }
 0x662   : > { %v3049_v3 = vpop.permute.xlu0 %3048  ;;  %v3045_v46 = vpop.permute.xlu1 %3044 }
 0x663   : > { %v3052_v23 = vsel %vm3050_vm15, %v3047_v15, %v3049_v3  ;;  %v3051_v26 = vsel %vm3050_vm15, %v3045_v46, %v3047_v15  ;;  %v3056_v36 = vadd.f32 %v3045_v46, %v3020_v45 }
 0x664   : > { %v3058_v47 = vadd.f32 %v3052_v23, %v3022_v11  ;;  %v3057_v4 = vadd.f32 %v3051_v26, %v3021_v35 }
 0x665   : > { %3062 = vrot.lane.b32.xlu1 %v3056_v36, %s3555_s26 }
 0x666   : > { %3066 = vrot.lane.b32.xlu0 %v3058_v47, %s3555_s26  ;;  %3064 = vrot.lane.b32.xlu2 %v3057_v4, %s3555_s26  ;;  %s3434_s26 = sshra.s32 %s3093_s19, 4  ;;  %s3435_s26 = int_to_ptr.hbm [resolvable:$true] %s3434_s26 }
 0x667   : > { %s3436_s27 = scalar_lea.hbm %s3435_s26, 16  ;;  %p3441_p0 = scmp.lt.s32.totalorder %s3435_s26, %s5542_s14 }
 0x668   : > { %p3437_p11 = scmp.ne.s32.totalorder %s3435_s26, %s3436_s27  ;;  %p3442_p1 = scmp.lt.s32.totalorder %s3440_s28, %s3436_s27 }
 0x66a   : > { %p3438_p12 = pnand %p3437_p11, %p3674_p5  ;;  %p3443_p2 = por %p3442_p1, %p3441_p0 }
 0x66c   : > { %p3439_p13 = pneg %p3438_p12 }
 0x66e   : > { %p3444_p3 = pnand %p3443_p2, %p3439_p13 }
 0x6c0   : > { %v3065_v49 = vpop.permute.xlu2 %3064 }
 0x6d7   : > { %v3063_v14 = vpop.permute.xlu1 %3062 }
 0x6d8   : > { %v3068_v17 = vsel %vm3033_vm14, %v3063_v14, %v3065_v49  ;;  %v3067_v63 = vpop.permute.xlu0 %3066 }
 0x6d9   : > { %v3072_v48 = vadd.f32 %v3418_v0, %v3068_v17  ;;  %v3069_v9 = vsel %vm3033_vm14, %v3065_v49, %v3067_v63 }
 0x6da   : > { %v3073_v58 = vadd.f32 %v3419_v28, %v3069_v9 }
 0x6db   : > { %3074 = vst [vmem:[%s475_s3] sm:$0xff] %v3072_v48 }
 0x6dc   : > { %3075 = vst [vmem:[%s475_s3 + $0x8] sm:$0xff] %v3073_v58 }
 0x6dd   : > { %3447 = shalt.err (!%p3444_p3)
}
 0x6de   : > { %3255 = dma.vmem_to_hbm [thread:$0]  (%p3674_p5), %s3091_s15, 256, %s3093_s19, %s3077_s17  }
 0x6df PF: > { %p3261_p4 = scmp.ge.s32.totalorder %s3482_s16, 2  ;;  %s3104_s20 = sand.u32 1, %s3470_s29  }
 0x6e0   : > { %s3105_s1 = scalar_lea.sflag [#allocation3], %s3104_s20 }
 0x6e1   : > { %p3258_p7 = pnand %p3261_p4, %p3678_p6 }
 0x6e3   : > { %p3259_p8 = pneg %p3258_p7 }
 0x6e5   : > { %3465 = dma.done.wait (%p3259_p8), %s3105_s1, 256  }
 0x6e6   : > { %3467 = vsyncadd (%p3259_p8), %s3105_s1, 4294967040  ;;  %s5797_s16 = sld [smem:[#allocation6_spill]]  ;;  %s5800_s29 = smov %s3474_s30 }
 0x6e7   : > { %s5798_s18 = sld [smem:[#allocation5_spill]] }
 0x6e8   : > { %s5799_s15 = sld [smem:[#allocation7_spill]] }
 0x6ec   : > { %p24_p9 = scmp.ge.s32.totalorder %s5797_s16, 4  }
 0x6ed   : > { %s5801_s30 = smov %s5798_s18 }
 0x6ee   :  { %26 = sbr.rel (!%p24_p9) target bundleno = 7 (0x7), region = 114 }
 0x6f3   :  { %3111 = vsyncpa [#allocation3], 1 }
 0x6f4   :  { %3113 = vsyncpa [#allocation3 + $0x1], 1 }

</bundles_post_ra>
